<compile_context>
chip_gen: v5e
topology: v5e:2x2
jax: 0.10.0
libtpu: 0.0.40
codegen_flags: <defaults>
</compile_context>

<pallas_src>
import functools

import jax
import jax.numpy as jnp
import numpy as np
from jax.experimental import pallas as pl
from jax.experimental.pallas import tpu as pltpu

LANE = 128  # TPU lane width


def _round_up(x, m):
    return (x + m - 1) // m * m


def _silu_f32(v):
    # SiLU with both transcendental pieces (exp, reciprocal) on the EUP slot.
    # approx reciprocal => sigmoid is approximate; passes the 2e-2 tolerance.
    return v * pl.reciprocal(1.0 + jnp.exp(-v), approx=True)


# --------------------------------- kernel -----------------------------------

def _bottleneck_kernel(x_ref, w1_ref, b1_ref, w2_ref, b2_ref, o_ref,
                       hcat_ref, *, H, W, use_add):
    # x_ref:    (1, H*W, Cp)        f32   one image, channels padded to 128
    # w1_ref:   (Cp, Chp)           bf16  folded 1x1 conv weight
    # b1_ref:   (1, Chp)            f32   folded BN bias
    # w2_ref:   (3, 3*Chp, Cop)     bf16  row di holds [W2[di,0];W2[di,1];W2[di,2]]
    # b2_ref:   (1, Cop)            f32
    # o_ref:    (1, H*W, Cop)       f32
    # hcat_ref: ((H+2)*W, 3*Chp)    bf16  W-shift-concatenated activations with
    #                                     one zero halo row above and below
    HW = H * W
    Chp = w1_ref.shape[1]
    K3 = 3 * Chp

    # ---- conv1: 1x1 conv == channel matmul (bf16 in / f32 acc) + bias + SiLU
    x2d = x_ref[0]                                               # (HW, Cp) f32
    h = jnp.dot(x2d.astype(jnp.bfloat16), w1_ref[...],
                preferred_element_type=jnp.float32)
    h = _silu_f32(h + b1_ref[...])                               # (HW, Chp) f32

    # ---- W-shifted copies via sublane roll + column boundary mask ----------
    # (no W halo, no unaligned crops; roll rides the XLU slot)
    col = jax.lax.broadcasted_iota(jnp.int32, (HW, 1), 0) % W
    not_first = (col != 0).astype(jnp.float32)                   # mask j == 0
    not_last = (col != W - 1).astype(jnp.float32)                # mask j == W-1
    h_left = pltpu.roll(h, shift=1, axis=0) * not_first          # h[i, j-1]
    h_right = pltpu.roll(h, shift=HW - 1, axis=0) * not_last     # h[i, j+1]

    # ---- stage K-concatenated activations (bf16) + clear 1-row halos -------
    hcat_ref[0:W, :] = jnp.zeros((W, K3), jnp.bfloat16)
    hcat_ref[(H + 1) * W:(H + 2) * W, :] = jnp.zeros((W, K3), jnp.bfloat16)
    hcat_ref[W:(H + 1) * W, 0:Chp] = h_left.astype(jnp.bfloat16)
    hcat_ref[W:(H + 1) * W, Chp:2 * Chp] = h.astype(jnp.bfloat16)
    hcat_ref[W:(H + 1) * W, 2 * Chp:K3] = h_right.astype(jnp.bfloat16)

    # ---- conv2: 3 accumulated matmuls of K = 3*Chp; the 3x3-kernel row
    #      offset is a tile-aligned slice of the slab's leading sublane axis.
    acc = jnp.dot(hcat_ref[0 * W:0 * W + HW, :], w2_ref[0],
                  preferred_element_type=jnp.float32)
    acc = acc + jnp.dot(hcat_ref[1 * W:1 * W + HW, :], w2_ref[1],
                        preferred_element_type=jnp.float32)
    acc = acc + jnp.dot(hcat_ref[2 * W:2 * W + HW, :], w2_ref[2],
                        preferred_element_type=jnp.float32)
    y = _silu_f32(acc + b2_ref[...])

    # ---- residual (f32, uses the un-quantized input) ----
    if use_add:
        y = y + x2d

    o_ref[0] = y.astype(o_ref.dtype)


# -------------------------------- wrapper ------------------------------------

def bottleneck_pallas(x_nchw, kernel_params, out_channels, *, use_add):
    w1_k, b1_k, w2_k, b2_k = kernel_params
    N, Cin, H, W = x_nchw.shape
    Cp, Chp = w1_k.shape
    Cop = w2_k.shape[-1]
    HW = H * W
    if use_add:
        assert Cp == Cop, "residual add requires in_channels == out_channels"

    # NCHW -> NHWC -> (N, H*W, C), channels zero-padded to the lane width.
    # TODO(synk): for real YOLOX stacks keep this channel-padded NHWC layout
    # across consecutive Bottleneck layers (and pass tiny-C inputs unpadded)
    # instead of padding / transposing per call.
    x = jnp.transpose(x_nchw, (0, 2, 3, 1)).reshape(N, HW, Cin)
    x = jnp.pad(x, ((0, 0), (0, 0), (0, Cp - Cin)))

    flops = N * 2 * HW * Chp * (Cp + 9 * Cop)
    transc = N * HW * (Chp + Cop)
    bytes_acc = (x.size * 4 + N * HW * Cop * 4
                 + w1_k.size * 2 + w2_k.size * 2
                 + (b1_k.size + b2_k.size) * 4)

    kernel = functools.partial(_bottleneck_kernel, H=H, W=W, use_add=use_add)
    y = pl.pallas_call(
        kernel,
        out_shape=jax.ShapeDtypeStruct((N, HW, Cop), x_nchw.dtype),
        grid=(N,),
        in_specs=[
            pl.BlockSpec((1, HW, Cp), lambda n: (n, 0, 0)),
            pl.BlockSpec((Cp, Chp), lambda n: (0, 0)),
            pl.BlockSpec((1, Chp), lambda n: (0, 0)),
            pl.BlockSpec((3, 3 * Chp, Cop), lambda n: (0, 0, 0)),
            pl.BlockSpec((1, Cop), lambda n: (0, 0)),
        ],
        out_specs=pl.BlockSpec((1, HW, Cop), lambda n: (n, 0, 0)),
        scratch_shapes=[
            pltpu.VMEM(((H + 2) * W, 3 * Chp), jnp.bfloat16),    # activation slab
        ],
        compiler_params=pltpu.CompilerParams(
            dimension_semantics=("parallel",)),                  # images independent
        cost_estimate=pl.CostEstimate(flops=flops, transcendentals=transc,
                                      bytes_accessed=bytes_acc),
    )(x, w1_k, b1_k, w2_k, b2_k)

    y = y.reshape(N, H, W, Cop)[..., :out_channels]
    return jnp.transpose(y, (0, 3, 1, 2))                        # back to NCHW


# ----------------------------- parameter setup ------------------------------

def _fold_bn(w_oihw, gamma, beta, mean, var, eps=1e-5):
    """Fold inference-mode BatchNorm into a (bias-free) conv."""
    scale = gamma / jnp.sqrt(var + eps)
    w = w_oihw * scale[:, None, None, None]
    b = beta - mean * scale
    return w, b


def make_params(in_channels, out_channels, expansion=0.5,
                key=jax.random.PRNGKey(0)):
    hidden = int(out_channels * expansion)
    ks = jax.random.split(key, 10)
    # conv weights (PyTorch OIHW), bias=False
    w1_oihw = 0.3 * jax.random.normal(ks[0], (hidden, in_channels, 1, 1), jnp.float32)
    w2_oihw = 0.3 * jax.random.normal(ks[1], (out_channels, hidden, 3, 3), jnp.float32)
    # deterministic (non-default) BN params / running stats, eval-mode semantics
    g1 = 1.0 + 0.1 * jax.random.normal(ks[2], (hidden,), jnp.float32)
    be1 = 0.1 * jax.random.normal(ks[3], (hidden,), jnp.float32)
    m1 = 0.1 * jax.random.normal(ks[4], (hidden,), jnp.float32)
    v1 = 1.0 + 0.1 * jax.random.uniform(ks[5], (hidden,), jnp.float32)
    g2 = 1.0 + 0.1 * jax.random.normal(ks[6], (out_channels,), jnp.float32)
    be2 = 0.1 * jax.random.normal(ks[7], (out_channels,), jnp.float32)
    m2 = 0.1 * jax.random.normal(ks[8], (out_channels,), jnp.float32)
    v2 = 1.0 + 0.1 * jax.random.uniform(ks[9], (out_channels,), jnp.float32)

    w1f, b1f = _fold_bn(w1_oihw, g1, be1, m1, v1)
    w2f, b2f = _fold_bn(w2_oihw, g2, be2, m2, v2)

    # Folded weights kept at bf16 precision (what the MXU sees); biases f32.
    w1_2d = jnp.transpose(w1f[:, :, 0, 0], (1, 0))               # (Cin, Ch)
    w1_2d = w1_2d.astype(jnp.bfloat16).astype(jnp.float32)
    w2_hwio = jnp.transpose(w2f, (2, 3, 1, 0))                   # (3,3,Ch,Cout)
    w2_hwio = w2_hwio.astype(jnp.bfloat16).astype(jnp.float32)

    # Kernel layouts: channels zero-padded to the lane width.
    Cp, Chp, Cop = (_round_up(c, LANE)
                    for c in (in_channels, hidden, out_channels))
    w1_k = (jnp.zeros((Cp, Chp), jnp.bfloat16)
            .at[:in_channels, :hidden].set(w1_2d.astype(jnp.bfloat16)))
    b1_k = jnp.zeros((1, Chp), jnp.float32).at[0, :hidden].set(b1f)
    # (3, 3*Chp, Cop): row di holds [W2[di,0]; W2[di,1]; W2[di,2]] stacked on K.
    w2_k = (jnp.zeros((3, 3, Chp, Cop), jnp.bfloat16)
            .at[:, :, :hidden, :out_channels]
            .set(w2_hwio.astype(jnp.bfloat16))
            .reshape(3, 3 * Chp, Cop))
    b2_k = jnp.zeros((1, Cop), jnp.float32).at[0, :out_channels].set(b2f)

    kernel_params = (w1_k, b1_k, w2_k, b2_k)
    ref_params = (w1_2d, b1f, w2_hwio, b2f)
    return kernel_params, ref_params


# ------------------------------ pure-JAX reference ---------------------------

def _silu(x):
    return x * jax.nn.sigmoid(x)


def reference_forward(x_nchw, w1_2d, b1, w2_hwio, b2, *, use_add):
    x = jnp.transpose(x_nchw, (0, 2, 3, 1))                      # NHWC
    h = _silu(jnp.einsum('nhwc,cd->nhwd', x, w1_2d) + b1)
    y = jax.lax.conv_general_dilated(
        h, w2_hwio, window_strides=(1, 1), padding='SAME',
        dimension_numbers=('NHWC', 'HWIO', 'NHWC')) + b2
    y = _silu(y)
    if use_add:
        y = y + x
    return jnp.transpose(y, (0, 3, 1, 2))                        # back to NCHW


# ----------------------------------- main ------------------------------------

if __name__ == "__main__":
    # Bottleneck(in_channels=4, out_channels=4, shortcut=True, expansion=0.5)
    N, C, H, W = 2, 4, 16, 16
    in_channels = out_channels = C
    use_add = True  # shortcut and in_channels == out_channels

    key = jax.random.PRNGKey(0)
    kx, kp = jax.random.split(key)
    x_nchw = jax.random.normal(kx, (N, C, H, W), jnp.float32)

    kernel_params, ref_params = make_params(in_channels, out_channels, 0.5, kp)
    y_ref = reference_forward(x_nchw, *ref_params, use_add=use_add)

    y = bottleneck_pallas(x_nchw, kernel_params, out_channels, use_add=use_add)
    jax.block_until_ready(y)
    np.testing.assert_allclose(np.asarray(y), np.asarray(y_ref),
                               atol=2e-2, rtol=2e-2)

    print("KERNEL_OK")
</pallas_src>

<mosaic_0001>
module attributes {stable_mosaic.version = 11 : i64} {
  func.func @_bottleneck_kernel(%arg0: i32, %arg1: memref<1x256x128xf32, #tpu.memory_space<vmem>>, %arg2: memref<128x128xbf16, #tpu.memory_space<vmem>>, %arg3: memref<1x128xf32, #tpu.memory_space<vmem>>, %arg4: memref<3x384x128xbf16, #tpu.memory_space<vmem>>, %arg5: memref<1x128xf32, #tpu.memory_space<vmem>>, %arg6: memref<1x256x128xf32, #tpu.memory_space<vmem>>, %arg7: memref<288x384xbf16, #tpu.memory_space<vmem>>) attributes {dimension_semantics = [#tpu.dimension_semantics<parallel>], iteration_bounds = array<i64: 2>, scalar_prefetch = 0 : i64, scratch_operands = 1 : i64, tpu.core_type = #tpu.core_type<tc>, window_params = [{transform_indices = @transform_0, window_bounds = array<i64: 1, 256, 128>}, {pipeline_mode = #tpu.pipeline_mode<synchronous>, transform_indices = @transform_1, window_bounds = array<i64: 128, 128>}, {pipeline_mode = #tpu.pipeline_mode<synchronous>, transform_indices = @transform_2, window_bounds = array<i64: 1, 128>}, {pipeline_mode = #tpu.pipeline_mode<synchronous>, transform_indices = @transform_3, window_bounds = array<i64: 3, 384, 128>}, {pipeline_mode = #tpu.pipeline_mode<synchronous>, transform_indices = @transform_4, window_bounds = array<i64: 1, 128>}, {transform_indices = @transform_5, window_bounds = array<i64: 1, 256, 128>}]} {
    %c0 = arith.constant 0 : index
    %c0_0 = arith.constant 0 : index
    %c0_1 = arith.constant 0 : index
    %0 = vector.load %arg1[%c0, %c0_0, %c0_1] : memref<1x256x128xf32, #tpu.memory_space<vmem>>, vector<1x256x128xf32>
    %1 = vector.shape_cast %0 : vector<1x256x128xf32> to vector<256x128xf32>
    %2 = arith.truncf %1 : vector<256x128xf32> to vector<256x128xbf16>
    %c0_2 = arith.constant 0 : index
    %c0_3 = arith.constant 0 : index
    %3 = vector.load %arg2[%c0_2, %c0_3] : memref<128x128xbf16, #tpu.memory_space<vmem>>, vector<128x128xbf16>
    %cst = arith.constant dense<0.000000e+00> : vector<256x128xf32>
    %4 = tpu.matmul %2, %3, %cst {dimension_numbers = #tpu.dot_dimension_numbers<[1], [0], [0], [1], [0, 0, 1, 1], [], []>} : vector<256x128xbf16>, vector<128x128xbf16>, vector<256x128xf32> -> vector<256x128xf32>
    %c0_4 = arith.constant 0 : index
    %c0_5 = arith.constant 0 : index
    %5 = vector.load %arg3[%c0_4, %c0_5] : memref<1x128xf32, #tpu.memory_space<vmem>>, vector<1x128xf32>
    %6 = vector.broadcast %5 : vector<1x128xf32> to vector<256x128xf32>
    %7 = arith.addf %4, %6 : vector<256x128xf32>
    %cst_6 = arith.constant 0.000000e+00 : f32
    %8 = vector.broadcast %cst_6 : f32 to vector<256x128xf32>
    %9 = arith.subf %8, %7 : vector<256x128xf32>
    %10 = math.exp %9 : vector<256x128xf32>
    %cst_7 = arith.constant 1.000000e+00 : f32
    %11 = vector.broadcast %cst_7 : f32 to vector<256x128xf32>
    %12 = arith.addf %11, %10 : vector<256x128xf32>
    %13 = tpu.reciprocal %12 {approx = true} : vector<256x128xf32> -> vector<256x128xf32>
    %14 = arith.mulf %7, %13 : vector<256x128xf32>
    %15 = tpu.iota {dimensions = array<i32: 0>} : vector<256x1xi32>
    %c16_i32 = arith.constant 16 : i32
    %c0_i32 = arith.constant 0 : i32
    %16 = arith.cmpi eq, %c16_i32, %c0_i32 : i32
    %c1_i32 = arith.constant 1 : i32
    %17 = arith.select %16, %c1_i32, %c16_i32 : i32
    %18 = vector.broadcast %17 : i32 to vector<256x1xi32>
    %19 = arith.remsi %15, %18 : vector<256x1xi32>
    %c0_i32_8 = arith.constant 0 : i32
    %20 = vector.broadcast %c0_i32_8 : i32 to vector<256x1xi32>
    %21 = arith.cmpi ne, %19, %20 : vector<256x1xi32>
    %c0_i32_9 = arith.constant 0 : i32
    %22 = vector.broadcast %c0_i32_9 : i32 to vector<256x1xi32>
    %23 = arith.cmpi slt, %19, %22 : vector<256x1xi32>
    %c0_i32_10 = arith.constant 0 : i32
    %24 = arith.cmpi slt, %17, %c0_i32_10 : i32
    %25 = vector.broadcast %24 : i1 to vector<256x1xi1>
    %26 = vector.broadcast %25 : vector<256x1xi1> to vector<256x1xi1>
    %27 = arith.xori %23, %26 : vector<256x1xi1>
    %28 = arith.andi %27, %21 : vector<256x1xi1>
    %29 = vector.broadcast %17 : i32 to vector<256x1xi32>
    %30 = arith.addi %19, %29 : vector<256x1xi32>
    %31 = arith.select %28, %30, %19 : vector<256x1xi1>, vector<256x1xi32>
    %c0_i32_11 = arith.constant 0 : i32
    %32 = vector.broadcast %c0_i32_11 : i32 to vector<256x1xi32>
    %33 = arith.cmpi ne, %31, %32 : vector<256x1xi32>
    %34 = arith.extui %33 : vector<256x1xi1> to vector<256x1xi32>
    %35 = arith.sitofp %34 : vector<256x1xi32> to vector<256x1xf32>
    %c15_i32 = arith.constant 15 : i32
    %36 = vector.broadcast %c15_i32 : i32 to vector<256x1xi32>
    %37 = arith.cmpi ne, %31, %36 : vector<256x1xi32>
    %38 = arith.extui %37 : vector<256x1xi1> to vector<256x1xi32>
    %39 = arith.sitofp %38 : vector<256x1xi32> to vector<256x1xf32>
    %c1_i32_12 = arith.constant 1 : i32
    %40 = tpu.dynamic_rotate %14 by %c1_i32_12 dim 0 : vector<256x128xf32>, i32 -> vector<256x128xf32>
    %41 = vector.broadcast %35 : vector<256x1xf32> to vector<256x128xf32>
    %42 = arith.mulf %40, %41 : vector<256x128xf32>
    %c255_i32 = arith.constant 255 : i32
    %43 = tpu.dynamic_rotate %14 by %c255_i32 dim 0 : vector<256x128xf32>, i32 -> vector<256x128xf32>
    %44 = vector.broadcast %39 : vector<256x1xf32> to vector<256x128xf32>
    %45 = arith.mulf %43, %44 : vector<256x128xf32>
    %cst_13 = arith.constant 0.000000e+00 : bf16
    %46 = vector.broadcast %cst_13 : bf16 to vector<16x384xbf16>
    %c0_14 = arith.constant 0 : index
    %c0_15 = arith.constant 0 : index
    %47 = vector.load %arg7[%c0_14, %c0_15] : memref<288x384xbf16, #tpu.memory_space<vmem>>, vector<16x384xbf16>
    tpu.vector_store %arg7[%c0_14, %c0_15], %46 {strides = array<i32>} : memref<288x384xbf16, #tpu.memory_space<vmem>>, vector<16x384xbf16>,
    %cst_16 = arith.constant 0.000000e+00 : bf16
    %48 = vector.broadcast %cst_16 : bf16 to vector<16x384xbf16>
    %c272 = arith.constant 272 : index
    %c0_17 = arith.constant 0 : index
    %49 = vector.load %arg7[%c272, %c0_17] : memref<288x384xbf16, #tpu.memory_space<vmem>>, vector<16x384xbf16>
    tpu.vector_store %arg7[%c272, %c0_17], %48 {strides = array<i32>} : memref<288x384xbf16, #tpu.memory_space<vmem>>, vector<16x384xbf16>,
    %50 = arith.truncf %42 : vector<256x128xf32> to vector<256x128xbf16>
    %c16 = arith.constant 16 : index
    %c0_18 = arith.constant 0 : index
    %51 = vector.load %arg7[%c16, %c0_18] : memref<288x384xbf16, #tpu.memory_space<vmem>>, vector<256x128xbf16>
    tpu.vector_store %arg7[%c16, %c0_18], %50 {strides = array<i32>} : memref<288x384xbf16, #tpu.memory_space<vmem>>, vector<256x128xbf16>,
    %52 = arith.truncf %14 : vector<256x128xf32> to vector<256x128xbf16>
    %c16_19 = arith.constant 16 : index
    %c128 = arith.constant 128 : index
    %53 = vector.load %arg7[%c16_19, %c128] : memref<288x384xbf16, #tpu.memory_space<vmem>>, vector<256x128xbf16>
    tpu.vector_store %arg7[%c16_19, %c128], %52 {strides = array<i32>} : memref<288x384xbf16, #tpu.memory_space<vmem>>, vector<256x128xbf16>,
    %54 = arith.truncf %45 : vector<256x128xf32> to vector<256x128xbf16>
    %c16_20 = arith.constant 16 : index
    %c256 = arith.constant 256 : index
    %55 = vector.load %arg7[%c16_20, %c256] : memref<288x384xbf16, #tpu.memory_space<vmem>>, vector<256x128xbf16>
    tpu.vector_store %arg7[%c16_20, %c256], %54 {strides = array<i32>} : memref<288x384xbf16, #tpu.memory_space<vmem>>, vector<256x128xbf16>,
    %c0_21 = arith.constant 0 : index
    %c0_22 = arith.constant 0 : index
    %56 = vector.load %arg7[%c0_21, %c0_22] : memref<288x384xbf16, #tpu.memory_space<vmem>>, vector<256x384xbf16>
    %c0_23 = arith.constant 0 : index
    %c0_24 = arith.constant 0 : index
    %c0_25 = arith.constant 0 : index
    %57 = vector.load %arg4[%c0_23, %c0_24, %c0_25] : memref<3x384x128xbf16, #tpu.memory_space<vmem>>, vector<1x384x128xbf16>
    %58 = vector.shape_cast %57 : vector<1x384x128xbf16> to vector<384x128xbf16>
    %cst_26 = arith.constant dense<0.000000e+00> : vector<256x128xf32>
    %59 = tpu.matmul %56, %58, %cst_26 {dimension_numbers = #tpu.dot_dimension_numbers<[1], [0], [0], [1], [0, 0, 1, 1], [], []>} : vector<256x384xbf16>, vector<384x128xbf16>, vector<256x128xf32> -> vector<256x128xf32>
    %c16_27 = arith.constant 16 : index
    %c0_28 = arith.constant 0 : index
    %60 = vector.load %arg7[%c16_27, %c0_28] : memref<288x384xbf16, #tpu.memory_space<vmem>>, vector<256x384xbf16>
    %c1 = arith.constant 1 : index
    %c0_29 = arith.constant 0 : index
    %c0_30 = arith.constant 0 : index
    %61 = vector.load %arg4[%c1, %c0_29, %c0_30] : memref<3x384x128xbf16, #tpu.memory_space<vmem>>, vector<1x384x128xbf16>
    %62 = vector.shape_cast %61 : vector<1x384x128xbf16> to vector<384x128xbf16>
    %cst_31 = arith.constant dense<0.000000e+00> : vector<256x128xf32>
    %63 = tpu.matmul %60, %62, %cst_31 {dimension_numbers = #tpu.dot_dimension_numbers<[1], [0], [0], [1], [0, 0, 1, 1], [], []>} : vector<256x384xbf16>, vector<384x128xbf16>, vector<256x128xf32> -> vector<256x128xf32>
    %64 = arith.addf %59, %63 : vector<256x128xf32>
    %c32 = arith.constant 32 : index
    %c0_32 = arith.constant 0 : index
    %65 = vector.load %arg7[%c32, %c0_32] : memref<288x384xbf16, #tpu.memory_space<vmem>>, vector<256x384xbf16>
    %c2 = arith.constant 2 : index
    %c0_33 = arith.constant 0 : index
    %c0_34 = arith.constant 0 : index
    %66 = vector.load %arg4[%c2, %c0_33, %c0_34] : memref<3x384x128xbf16, #tpu.memory_space<vmem>>, vector<1x384x128xbf16>
    %67 = vector.shape_cast %66 : vector<1x384x128xbf16> to vector<384x128xbf16>
    %cst_35 = arith.constant dense<0.000000e+00> : vector<256x128xf32>
    %68 = tpu.matmul %65, %67, %cst_35 {dimension_numbers = #tpu.dot_dimension_numbers<[1], [0], [0], [1], [0, 0, 1, 1], [], []>} : vector<256x384xbf16>, vector<384x128xbf16>, vector<256x128xf32> -> vector<256x128xf32>
    %69 = arith.addf %64, %68 : vector<256x128xf32>
    %c0_36 = arith.constant 0 : index
    %c0_37 = arith.constant 0 : index
    %70 = vector.load %arg5[%c0_36, %c0_37] : memref<1x128xf32, #tpu.memory_space<vmem>>, vector<1x128xf32>
    %71 = vector.broadcast %70 : vector<1x128xf32> to vector<256x128xf32>
    %72 = arith.addf %69, %71 : vector<256x128xf32>
    %cst_38 = arith.constant 0.000000e+00 : f32
    %73 = vector.broadcast %cst_38 : f32 to vector<256x128xf32>
    %74 = arith.subf %73, %72 : vector<256x128xf32>
    %75 = math.exp %74 : vector<256x128xf32>
    %cst_39 = arith.constant 1.000000e+00 : f32
    %76 = vector.broadcast %cst_39 : f32 to vector<256x128xf32>
    %77 = arith.addf %76, %75 : vector<256x128xf32>
    %78 = tpu.reciprocal %77 {approx = true} : vector<256x128xf32> -> vector<256x128xf32>
    %79 = arith.mulf %72, %78 : vector<256x128xf32>
    %80 = arith.addf %79, %1 : vector<256x128xf32>
    %c0_40 = arith.constant 0 : index
    %c0_41 = arith.constant 0 : index
    %c0_42 = arith.constant 0 : index
    %81 = vector.load %arg6[%c0_40, %c0_41, %c0_42] : memref<1x256x128xf32, #tpu.memory_space<vmem>>, vector<1x256x128xf32>
    %82 = vector.shape_cast %81 : vector<1x256x128xf32> to vector<256x128xf32>
    %83 = vector.shape_cast %80 : vector<256x128xf32> to vector<1x256x128xf32>
    tpu.vector_store %arg6[%c0_40, %c0_41, %c0_42], %83 {strides = array<i32>} : memref<1x256x128xf32, #tpu.memory_space<vmem>>, vector<1x256x128xf32>,
    return
  }
  func.func @transform_0(%arg0: i32) -> (i32, i32, i32) {
    %c0_i32 = arith.constant 0 : i32
    %c0_i32_0 = arith.constant 0 : i32
    %c0_i32_1 = arith.constant 0 : i32
    return %arg0, %c0_i32, %c0_i32_0 : i32, i32, i32
  }
  func.func @transform_1(%arg0: i32) -> (i32, i32) {
    %c0_i32 = arith.constant 0 : i32
    %c0_i32_0 = arith.constant 0 : i32
    %c0_i32_1 = arith.constant 0 : i32
    return %c0_i32, %c0_i32_0 : i32, i32
  }
  func.func @transform_2(%arg0: i32) -> (i32, i32) {
    %c0_i32 = arith.constant 0 : i32
    %c0_i32_0 = arith.constant 0 : i32
    %c0_i32_1 = arith.constant 0 : i32
    return %c0_i32, %c0_i32_0 : i32, i32
  }
  func.func @transform_3(%arg0: i32) -> (i32, i32, i32) {
    %c0_i32 = arith.constant 0 : i32
    %c0_i32_0 = arith.constant 0 : i32
    %c0_i32_1 = arith.constant 0 : i32
    %c0_i32_2 = arith.constant 0 : i32
    return %c0_i32, %c0_i32_0, %c0_i32_1 : i32, i32, i32
  }
  func.func @transform_4(%arg0: i32) -> (i32, i32) {
    %c0_i32 = arith.constant 0 : i32
    %c0_i32_0 = arith.constant 0 : i32
    %c0_i32_1 = arith.constant 0 : i32
    return %c0_i32, %c0_i32_0 : i32, i32
  }
  func.func @transform_5(%arg0: i32) -> (i32, i32, i32) {
    %c0_i32 = arith.constant 0 : i32
    %c0_i32_0 = arith.constant 0 : i32
    %c0_i32_1 = arith.constant 0 : i32
    return %arg0, %c0_i32, %c0_i32_0 : i32, i32, i32
  }
}

</mosaic_0001>

<bundles_post_ra>
// kernel: tpu_custom_call.1
= control target key start
LH: loop header
LB: loop body
LE: loop exit
PB: predicated region body
PF: predicated region fallthrough
CT: control target
= control target key end

     0   :  { %10 = vsyncpa [#allocation4], 0  ;;  %s7416_s0 = inlined_call_operand.hbm [shape: f32[2,256,128], index: 0, kind: input, shape index: {}]   ;;  %s7417_s1 = inlined_call_operand.hbm [shape: bf16[128,128], index: 1, kind: input, shape index: {}]   ;;  %s7418_s2 = inlined_call_operand.vmem [shape: f32[1,128], index: 2, kind: input, shape index: {}]   ;;  %s7419_s3 = inlined_call_operand.hbm [shape: bf16[3,384,128], index: 3, kind: input, shape index: {}]   ;;  %s7420_s4 = inlined_call_operand.vmem [shape: f32[1,128], index: 4, kind: input, shape index: {}]   ;;  %s7421_s5 = inlined_call_operand.hbm [shape: f32[2,256,128], index: 5, kind: output, shape index: {}]  }
   0x1   :  { %12 = vsyncpa [#allocation4 + $0x1], 0 }
   0x2   :  { %13 = vsyncpa [#allocation7], 0 }
   0x3   :  { %14 = vsyncpa [#allocation5], 0 }
   0x4   :  { %16 = vsyncpa [#allocation5 + $0x1], 0  ;;  %s5682_s18 = smov 0   ;;  %s5684_s19 = smov 0  }
   0x5   :  { %s5686_s20 = smov 0   ;;  %s5688_s21 = smov 0  }
   0x6 LB: > { %s5703_s22 = sadd.s32 4294967295, %s5640_s21   ;;  %s4150_s23 = sadd.s32 4294967294, %s5640_s21   ;;  %s5640_s21 = sphi %s5688_s21, %s7547_s21   ;;  %s5636_s20 = sphi %s5686_s20, %s7546_s20   ;;  %s5632_s19 = sphi %s5684_s19, %s7545_s19   ;;  %s5628_s18 = sphi %s5682_s18, %s7544_s18  }
   0x7   : > { %p42_p0 = scmp.ne.s32.totalorder %s5632_s19, %s5628_s18  ;;  %p43_p1 = scmp.eq.s32.totalorder %s5703_s22, 0 }
   0x8   : > { %p150_p2 = scmp.eq.s32.totalorder %s5703_s22, 1  ;;  %p156_p3 = scmp.eq.s32.totalorder %s4150_s23, 1 }
   0x9   : > { %p5712_p4 = por %p43_p1, %p42_p0  ;;  %p4151_p5 = scmp.ge.s32.totalorder %s5640_s21, 1 }
   0xa   : > { %p5717_p6 = por %p156_p3, %p42_p0  ;;  %p163_p7 = scmp.lt.s32.totalorder %s5640_s21, 3 }
   0xb   : > { %s174_s28 = sshll.u32 %s7417_s1, 4  ;;  %s5642_s30 = smov [#allocation6]   ;;  %s175_s28 = int_to_ptr.hbm [resolvable:$true] %s174_s28 }
   0xc   : > { %p5725_p8 = pnand %p4151_p5, %p163_p7  ;;  %s176_s6 = sshll.u32 %s5642_s30, 4  ;;  %s177_s6 = int_to_ptr.vmem [resolvable:$true] %s176_s6 }
   0xd   : > { %s191_s9 = sshll.u32 %s7419_s3, 4  ;;  %s5643_s10 = smov 64   ;;  %s192_s9 = int_to_ptr.hbm [resolvable:$true] %s191_s9 }
   0xe   : > { %p5125_p9 = pneg %p5725_p8  ;;  %s5644_s11 = smov 4  }
   0xf   : > { %s5645_s12 = smov [#allocation8]   ;;  %s5738_s14 = sadd.s32 1, %s5640_s21  }
  0x10   : > { %p5126_p10 = pnand %p5125_p9, %p43_p1  ;;  %s193_s13 = sshll.u32 %s5645_s12, 4  ;;  %s194_s13 = int_to_ptr.vmem [resolvable:$true] %s193_s13 }
  0x11   : > { %s29_s15 = sadd.s32 1, %s5636_s20  ;;  %s26_s16 = ssub.s32 %s5640_s21, %s5738_s14 }
  0x12   : > { %5128 = dma.hbm_to_vmem [thread:$0]  (!%p5126_p10), %s175_s28, 1024, %s177_s6, [#allocation7], %s5643_s10, %s5643_s10, %s5644_s11  }
  0x13   : > { %5131 = dma.hbm_to_vmem [thread:$0]  (!%p5126_p10), %s192_s9, 9216, %s194_s13, [#allocation7], %s5643_s10, %s5643_s10, %s5644_s11  }
  0x14   : > { %p36_p12 = scmp.ne.s32.totalorder %s5636_s20, %s5632_s19  ;;  %p27_p13 = scmp.eq.s32.totalorder %s26_s16, 0 }
  0x15   : > { %p37_p0 = scmp.eq.s32.totalorder %s5640_s21, 0  ;;  %p5142_p5 = scmp.lt.s32.totalorder %s5640_s21, 2 }
  0x16   : > { %p5748_p3 = por %p150_p2, %p36_p12  ;;  %s210_s26 = sand.u32 1, %s5636_s20  }
  0x17   : > { %s5754_s23 = scalar_select %p27_p13, %s5636_s20, %s29_s15  }
  0x18   : > { %p38_p7 = por %p37_p0, %p36_p12  ;;  %s4155_s27 = sshll.u32 %s210_s26, 8 }
  0x19   : > { %s4916_s28 = sshll.u32 %s5640_s21, 8  ;;  %s214_s8 = scalar_lea.vmem [#allocation3], %s4155_s27 }
  0x1a   : > { %s219_s7 = scalar_lea.hbm %s7416_s0, %s4916_s28  ;;  %s222_s9 = sshll.u32 %s214_s8, 4  ;;  %s223_s9 = int_to_ptr.vmem [resolvable:$true] %s222_s9 }
  0x1b   : > { %s220_s10 = sshll.u32 %s219_s7, 4  ;;  %p5761_p2 = pnand %p5142_p5, %p38_p7  ;;  %s221_s10 = int_to_ptr.hbm [resolvable:$true] %s220_s10 }
  0x1c   : > { %s211_s12 = scalar_lea.sflag [#allocation4], %s210_s26  ;;  %s5540_s13 = sshra.s32 %s221_s10, 4  ;;  %s5541_s13 = int_to_ptr.hbm [resolvable:$true] %s5540_s13 }
  0x1d   : > { %s5542_s15 = scalar_lea.hbm %s5541_s13, 256  ;;  %p5544_p10 = pneg %p5761_p2 }
  0x1e   : > { %p5543_p9 = scmp.ne.s32.totalorder %s5541_s13, %s5542_s15  ;;  %s5547_s28 = scalar_lea.hbm %s7416_s0, 512 }
  0x1f   : > { %p5548_p0 = scmp.lt.s32.totalorder %s5541_s13, %s7416_s0  ;;  %p5549_p5 = scmp.lt.s32.totalorder %s5547_s28, %s5542_s15 }
  0x20   : > { %p5545_p12 = pnand %p5544_p10, %p5543_p9 }
  0x21   : > { %p5550_p7 = por %p5549_p5, %p5548_p0 }
  0x22   : > { %p5546_p13 = pneg %p5545_p12 }
  0x24   : > { %p5551_p11 = pnand %p5550_p7, %p5546_p13 }
  0x26   : > { %5554 = shalt.err (!%p5551_p11)
}
  0x27   : > { %s5646_s26 = smov 128   ;;  %s5647_s7 = smov 8  }
  0x28   : > { %5135 = dma.hbm_to_vmem [thread:$0]  (!%p5761_p2), %s221_s10, 4096, %s223_s9, %s211_s12, %s5646_s26, %s5646_s26, %s5647_s7  }
  0x29   : > { %234 = sbr.rel (%p5725_p8) target bundleno = 1191 (0x4a7), region = 40 }
  0x2e   : > { %s5778_s8 = sand.u32 1, %s5632_s19  }
  0x2f   : > { %s4159_s13 = sshll.u32 %s5778_s8, 8  ;;  %s237_s15 = scalar_lea.sflag [#allocation4], %s5778_s8 }
  0x30   : > { %s5784_s16 = scalar_lea.vmem [#allocation3], %s4159_s13 }
  0x31   : > { %5615 = dma.done.wait (%p5712_p4), %s237_s15, 4096  }
  0x32   : > { %5617 = vsyncadd (%p5712_p4), %s237_s15, 4294963200 }
  0x33   : > { %5619 = dma.done.wait (%p43_p1), [#allocation7], 10240  }
  0x34   : > { %5621 = vsyncadd (%p43_p1), [#allocation7], 4294957056  ;;  %v4924_v0 = vld [vmem:[#allocation6 + $0x38] sm:$0xff]  ;;  %v4923_v1 = vld [vmem:[#allocation6 + $0x30] sm:$0xff]  ;;  %s7160_s27 = scalar_lea.vmem [#allocation9], %s4159_s13  ;;  %s5096_s6 = sshll.u32 %s5703_s22, 8 }
  0x35   : > { %395 = vmatpush.bf16.msra.mxu0 %v4924_v0  ;;  %5097 = vmatpush.bf16.msra.mxu2 %v4924_v0  ;;  %v4922_v2 = vld [vmem:[#allocation6 + $0x28] sm:$0xff]  ;;  %v4921_v3 = vld [vmem:[#allocation6 + $0x20] sm:$0xff]  ;;  %v4920_v4 = vld [vmem:[#allocation6 + $0x18] sm:$0xff]  ;;  %s4054_s13 = scalar_lea.hbm %s7421_s5, %s5096_s6  ;;  %s4055_s15 = sshll.u32 %s7160_s27, 4  ;;  %s4056_s15 = int_to_ptr.vmem [resolvable:$true] %s4055_s15 }
  0x36   : > { %v4919_v5 = vld [vmem:[#allocation6 + $0x10] sm:$0xff]  ;;  %v4918_v6 = vld [vmem:[#allocation6 + $0x8] sm:$0xff]  ;;  %v4917_v7 = vld [vmem:[#allocation6] sm:$0xff]  ;;  %s4057_s24 = sshll.u32 %s4054_s13, 4  ;;  %s4043_s29 = scalar_lea.sflag [#allocation5], %s5778_s8  ;;  %s4058_s24 = int_to_ptr.hbm [resolvable:$true] %s4057_s24 }
  0x37   : > { %v279_v8 = vld [vmem:[%s5784_s16] sm:$0xff]  ;;  %v280_v9 = vld [vmem:[%s5784_s16 + $0x8] sm:$0xff]  ;;  %v281_v14 = vld [vmem:[%s5784_s16 + $0x10] sm:$0xff]  ;;  %s5584_s22 = sshra.s32 %s4058_s24, 4  ;;  %s5590_s12 = scalar_lea.hbm %s7421_s5, 512  ;;  %s5585_s22 = int_to_ptr.hbm [resolvable:$true] %s5584_s22 }
  0x38   : > { %v295_v10 = vld [vmem:[%s5784_s16 + $0x80] sm:$0xff]  ;;  %v296_v11 = vld [vmem:[%s5784_s16 + $0x88] sm:$0xff]  ;;  %v311_v12 = vpack.c.bf16 %v280_v9, %v279_v8  ;;  %v282_v15 = vld [vmem:[%s5784_s16 + $0x18] sm:$0xff]  ;;  %v676_v8 = vlaneseq  ;;  %s5586_s9 = scalar_lea.hbm %s5585_s22, 256  ;;  %p5591_p11 = scmp.lt.s32.totalorder %s5585_s22, %s7421_s5 }
  0x39   : > { %396 = vmatpush.bf16.msra.mxu0 %v4923_v1  ;;  %5098 = vmatpush.bf16.msra.mxu2 %v4923_v1  ;;  %v319_v13 = vpack.c.bf16 %v296_v11, %v295_v10  ;;  %v297_v16 = vld [vmem:[%s5784_s16 + $0x90] sm:$0xff]  ;;  %v298_v17 = vld [vmem:[%s5784_s16 + $0x98] sm:$0xff]  ;;  %v312_v18 = vpack.c.bf16 %v282_v15, %v281_v14  ;;  %v283_v20 = vld [vmem:[%s5784_s16 + $0x20] sm:$0xff]  ;;  %p5587_p1 = scmp.ne.s32.totalorder %s5585_s22, %s5586_s9  ;;  %p5592_p2 = scmp.lt.s32.totalorder %s5590_s12, %s5586_s9 }
  0x3a   : > { %v320_v19 = vpack.c.bf16 %v298_v17, %v297_v16  ;;  %v284_v21 = vld [vmem:[%s5784_s16 + $0x28] sm:$0xff]  ;;  %v299_v22 = vld [vmem:[%s5784_s16 + $0xa0] sm:$0xff]  ;;  %v285_v26 = vld [vmem:[%s5784_s16 + $0x30] sm:$0xff]  ;;  %v5840_v15 = vshrl.u32 %v676_v8, 7 }
  0x3b   : > { %v300_v23 = vld [vmem:[%s5784_s16 + $0xa8] sm:$0xff]  ;;  %v313_v24 = vpack.c.bf16 %v284_v21, %v283_v20  ;;  %v286_v27 = vld [vmem:[%s5784_s16 + $0x38] sm:$0xff]  ;;  %v301_v28 = vld [vmem:[%s5784_s16 + $0xb0] sm:$0xff]  ;;  %p5588_p4 = pnand %p5587_p1, %p5748_p3  ;;  %p5593_p9 = por %p5592_p2, %p5591_p11 }
  0x3c   : > { %v321_v25 = vpack.c.bf16 %v300_v23, %v299_v22  ;;  %v302_v29 = vld [vmem:[%s5784_s16 + $0xb8] sm:$0xff]  ;;  %v314_v30 = vpack.c.bf16 %v286_v27, %v285_v26  ;;  %v287_v32 = vld [vmem:[%s5784_s16 + $0x40] sm:$0xff]  ;;  %v288_v33 = vld [vmem:[%s5784_s16 + $0x48] sm:$0xff]  ;;  %v678_v23 = vadd.s32 8, %v5840_v15  ;;  %vm1317_vm1 = vcmp.lt.s32.totalorder %v5840_v15, 1 }
  0x3d   : > { %397 = vmatpush.bf16.msra.mxu0 %v4922_v2  ;;  %5099 = vmatpush.bf16.msra.mxu2 %v4922_v2  ;;  %v322_v31 = vpack.c.bf16 %v302_v29, %v301_v28  ;;  %v303_v34 = vld [vmem:[%s5784_s16 + $0xc0] sm:$0xff]  ;;  %v304_v35 = vld [vmem:[%s5784_s16 + $0xc8] sm:$0xff]  ;;  %v315_v36 = vpack.c.bf16 %v288_v33, %v287_v32  ;;  %v289_v38 = vld [vmem:[%s5784_s16 + $0x50] sm:$0xff]  ;;  %v695_v29 = vadd.s32 144, %v5840_v15  ;;  %vm1414_vm3 = vcmp.lt.s32.totalorder %v5840_v15, 7  ;;  %p5589_p8 = pneg %p5588_p4 }
  0x3e   : > { %v323_v37 = vpack.c.bf16 %v304_v35, %v303_v34  ;;  %v290_v39 = vld [vmem:[%s5784_s16 + $0x58] sm:$0xff]  ;;  %v305_v40 = vld [vmem:[%s5784_s16 + $0xd0] sm:$0xff]  ;;  %v291_v44 = vld [vmem:[%s5784_s16 + $0x60] sm:$0xff]  ;;  %v720_v34 = vand.u32 15, %v678_v23 }
  0x3f   : > { %v306_v41 = vld [vmem:[%s5784_s16 + $0xd8] sm:$0xff]  ;;  %v316_v42 = vpack.c.bf16 %v290_v39, %v289_v38  ;;  %v292_v45 = vld [vmem:[%s5784_s16 + $0x68] sm:$0xff]  ;;  %v307_v46 = vld [vmem:[%s5784_s16 + $0xe0] sm:$0xff]  ;;  %v839_v39 = vand.u32 15, %v695_v29  ;;  %p5594_p10 = pnand %p5593_p9, %p5589_p8 }
  0x40   : > { %v324_v43 = vpack.c.bf16 %v306_v41, %v305_v40  ;;  %v308_v47 = vld [vmem:[%s5784_s16 + $0xe8] sm:$0xff]  ;;  %v317_v48 = vpack.c.bf16 %v292_v45, %v291_v44  ;;  %v293_v50 = vld [vmem:[%s5784_s16 + $0x70] sm:$0xff]  ;;  %v294_v51 = vld [vmem:[%s5784_s16 + $0x78] sm:$0xff]  ;;  %vm1190_vm2 = vcmp.ne.s32.totalorder %v720_v34, 15 }
  0x41   : > { %398 = vmatpush.bf16.msra.mxu0 %v4921_v3  ;;  %5100 = vmatpush.bf16.msra.mxu2 %v4921_v3  ;;  %v325_v49 = vpack.c.bf16 %v308_v47, %v307_v46  ;;  %v309_v52 = vld [vmem:[%s5784_s16 + $0xf0] sm:$0xff]  ;;  %v310_v53 = vld [vmem:[%s5784_s16 + $0xf8] sm:$0xff]  ;;  %v318_v55 = vpack.c.bf16 %v294_v51, %v293_v50  ;;  %v5013_v58 = vld [vmem:[#allocation8 + $0x128] sm:$0xff]  ;;  %v681_v47 = vadd.s32 32, %v5840_v15  ;;  %v5648_v50 = vmov 0.0  }
  0x42   : > { %v5015_v54 = vld [vmem:[#allocation8 + $0x138] sm:$0xff]  ;;  %v326_v56 = vpack.c.bf16 %v310_v53, %v309_v52  ;;  %v5014_v57 = vld [vmem:[#allocation8 + $0x130] sm:$0xff]  ;;  %v5012_v59 = vld [vmem:[#allocation8 + $0x120] sm:$0xff]  ;;  %vm1111_vm4 = vcmp.ne.s32.totalorder %v839_v39, 0 }
  0x43   : > { %v5829_v60 = vld [vmem:[%s7418_s2] ss:$0 sm:$0xff]  ;;  %v5011_v62 = vld [vmem:[#allocation8 + $0x118] sm:$0xff]  ;;  %v5009_v9 = vld [vmem:[#allocation8 + $0x108] sm:$0xff] }
  0x44   : > { %v5010_v3 = vld [vmem:[#allocation8 + $0x110] sm:$0xff]  ;;  %v5008_v20 = vld [vmem:[#allocation8 + $0x100] sm:$0xff] }
  0x45   : > { %399 = vmatpush.bf16.msra.mxu0 %v4920_v4  ;;  %5101 = vmatpush.bf16.msra.mxu2 %v4920_v4 }
  0x49   : > { %400 = vmatpush.bf16.msra.mxu0 %v4919_v5  ;;  %5102 = vmatpush.bf16.msra.mxu2 %v4919_v5 }
  0x4d   : > { %401 = vmatpush.bf16.msra.mxu0 %v4918_v6  ;;  %5103 = vmatpush.bf16.msra.mxu2 %v4918_v6 }
  0x51   : > { %402 = vmatpush.bf16.msra.mxu0 %v4917_v7  ;;  %5104 = vmatpush.bf16.msra.mxu2 %v4917_v7 }
  0x54   : > { %403 = vmatmul.bf16.vlgmr.msra.gmra.mxu0 %v311_v12  ;;  %443 = vmatmul.bf16.vlgmr.msra.gmra.mxu2 %v319_v13 }
  0x55   : > { %2333 = vmatpush.bf16.msrb.mxu2 %v5015_v54 }
  0x59   : > { %2334 = vmatpush.bf16.msrb.mxu2 %v5014_v57 }
  0x5d   : > { %2335 = vmatpush.bf16.msrb.mxu2 %v5013_v58 }
  0x61   : > { %2336 = vmatpush.bf16.msrb.mxu2 %v5012_v59 }
  0x64   : > { %408 = vmatmul.bf16.gmra.mxu0 %v312_v18  ;;  %448 = vmatmul.bf16.gmra.mxu2 %v320_v19  ;;  %v679_v19 = vadd.s32 16, %v5840_v15 }
  0x65   : > { %2337 = vmatpush.bf16.msrb.mxu2 %v5011_v62  ;;  %v680_v62 = vadd.s32 24, %v5840_v15 }
  0x66   : > { %v727_v28 = vand.u32 15, %v679_v19 }
  0x68   : > { %vm5858_vm0 = vcmp.ne.s32.totalorder %v727_v28, 0 }
  0x69   : > { %2338 = vmatpush.bf16.msrb.mxu2 %v5010_v3  ;;  %v5875_v51 = vsel %vm5858_vm0, 1.0, %v5648_v50 }
  0x6d   : > { %2339 = vmatpush.bf16.msrb.mxu2 %v5009_v9 }
  0x71   : > { %2340 = vmatpush.bf16.msrb.mxu2 %v5008_v20 }
  0x74   : > { %413 = vmatmul.bf16.gmra.mxu0 %v313_v24  ;;  %453 = vmatmul.bf16.gmra.mxu2 %v321_v25 }
  0x84   : > { %418 = vmatmul.bf16.gmra.mxu0 %v314_v30  ;;  %458 = vmatmul.bf16.gmra.mxu2 %v322_v31 }
  0x94   : > { %423 = vmatmul.bf16.gmra.mxu0 %v315_v36  ;;  %463 = vmatmul.bf16.gmra.mxu2 %v323_v37 }
  0xa4   : > { %428 = vmatmul.bf16.gmra.mxu0 %v316_v42  ;;  %468 = vmatmul.bf16.gmra.mxu2 %v324_v43  ;;  %v694_v43 = vadd.s32 136, %v5840_v15 }
  0xb4   : > { %433 = vmatmul.bf16.gmra.mxu0 %v317_v48  ;;  %473 = vmatmul.bf16.gmra.mxu2 %v325_v49 }
  0xc4   : > { %438 = vmatmul.bf16.gmra.mxu0 %v318_v55  ;;  %478 = vmatmul.bf16.gmra.mxu2 %v326_v56  ;;  %v5882_v55 = vsel %vm1190_vm2, 1.0, %v5648_v50  ;;  %v832_v56 = vand.u32 15, %v694_v43 }
  0xc6   : > { %vm5902_vm5 = vcmp.ne.s32.totalorder %v832_v56, 15 }
  0xd1   : > { %v404_v61 = vpop.f32.mrf.mxu0 }
  0xd2   : > { %v405_v63 = vadd.f32 %v5829_v60, %v404_v61 }
  0xd4   : > { %v484_v0 = vsub.f32 0.0, %v405_v63 }
  0xd6   : > { %v516_v1 = vmul.f32 1.442695, %v484_v0 }
  0xd7   : > { %v444_v2 = vpop.f32.mrf.mxu2 }
  0xd8   : > { %5190 = vpow2.f32 %v516_v1  ;;  %v5833_v4 = vadd.f32 %v5829_v60, %v444_v2  ;;  %v5891_v1 = vsel %vm1111_vm4, 1.0, %v5648_v50  ;;  %v741_v2 = vand.u32 15, %v681_v47 }
  0xd9   : > { %v406_v5 = vpop.f32.mrf.mxu0 }
  0xda   : > { %v500_v6 = vsub.f32 0.0, %v5833_v4  ;;  %v5837_v7 = vadd.f32 %v5829_v60, %v406_v5  ;;  %vm5921_vm6 = vcmp.ne.s32.totalorder %v741_v2, 0 }
  0xdc   : > { %v548_v10 = vmul.f32 1.442695, %v500_v6  ;;  %v485_v11 = vsub.f32 0.0, %v5837_v7 }
  0xde   : > { %v5191_v12 = vpop.eup %5190  ;;  %5192 = vpow2.f32 %v548_v10  ;;  %v518_v13 = vmul.f32 1.442695, %v485_v11 }
  0xdf   : > { %v580_v14 = vadd.f32 1.0, %v5191_v12  ;;  %v446_v16 = vpop.f32.mrf.mxu2 }
  0xe0   : > { %5194 = vpow2.f32 %v518_v13  ;;  %v5843_v17 = vadd.f32 %v5829_v60, %v446_v16  ;;  %v734_v13 = vand.u32 15, %v680_v62 }
  0xe1   : > { %5196 = vrcp.f32 %v580_v14  ;;  %v409_v18 = vpop.f32.mrf.mxu0  ;;  %v5911_v14 = vadd.s32 152, %v5840_v15 }
  0xe2   : > { %v501_v21 = vsub.f32 0.0, %v5843_v17  ;;  %v5848_v22 = vadd.f32 %v5829_v60, %v409_v18  ;;  %vm5932_vm7 = vcmp.ne.s32.totalorder %v734_v13, 15 }
  0xe4   : > { %v5193_v24 = vpop.eup %5192  ;;  %v550_v25 = vmul.f32 1.442695, %v501_v21  ;;  %v486_v26 = vsub.f32 0.0, %v5848_v22  ;;  %v697_v21 = vadd.s32 160, %v5840_v15 }
  0xe5   : > { %v596_v27 = vadd.f32 1.0, %v5193_v24 }
  0xe6   : > { %v5195_v30 = vpop.eup %5194  ;;  %5198 = vpow2.f32 %v550_v25  ;;  %v520_v31 = vmul.f32 1.442695, %v486_v26  ;;  %v853_v38 = vand.u32 15, %v697_v21 }
  0xe7   : > { %v5197_v32 = vpop.eup %5196  ;;  %5200 = vrcp.f32 %v596_v27  ;;  %v581_v33 = vadd.f32 1.0, %v5195_v30  ;;  %v449_v35 = vpop.f32.mrf.mxu2 }
  0xe8   : > { %v5853_v36 = vmul.f32 %v5197_v32, %v405_v63  ;;  %5202 = vpow2.f32 %v520_v31  ;;  %v5856_v37 = vadd.f32 %v5829_v60, %v449_v35  ;;  %v846_v35 = vand.u32 15, %v5911_v14 }
  0xe9   : > { %5204 = vrcp.f32 %v581_v33  ;;  %v411_v40 = vpop.f32.mrf.mxu0  ;;  %vm5986_vm8 = vcmp.ne.s32.totalorder %v853_v38, 0 }
  0xea   : > { %v1551_v41 = vpack.c.bf16 %v5853_v36, %v5853_v36  ;;  %v502_v42 = vsub.f32 0.0, %v5856_v37  ;;  %v5868_v44 = vadd.f32 %v5829_v60, %v411_v40  ;;  %v1285_v3 = vrot.slane %v5853_v36, 7 }
  0xeb   : > { %vm5990_vm9 = vcmp.ne.s32.totalorder %v846_v35, 15 }
  0xec   : > { %v5199_v45 = vpop.eup %5198  ;;  %1583 = vst [vmem:[#allocation2 + $0x1c] sm:$0xf] %v1551_v41  ;;  %v552_v46 = vmul.f32 1.442695, %v502_v42  ;;  %v487_v52 = vsub.f32 0.0, %v5868_v44 }
  0xed   : > { %v5201_v48 = vpop.eup %5200  ;;  %v597_v49 = vadd.f32 1.0, %v5199_v45 }
  0xee   : > { %v5203_v53 = vpop.eup %5202  ;;  %v5879_v54 = vmul.f32 %v5201_v48, %v5833_v4  ;;  %5206 = vpow2.f32 %v552_v46  ;;  %v522_v59 = vmul.f32 1.442695, %v487_v52  ;;  %v1382_v4 = vrot.slane %v5853_v36, 1 }
  0xef   : > { %v5205_v57 = vpop.eup %5204  ;;  %5208 = vrcp.f32 %v597_v49  ;;  %v582_v58 = vadd.f32 1.0, %v5203_v53  ;;  %v451_v61 = vpop.f32.mrf.mxu2 }
  0xf0   : > { %v1567_v63 = vpack.c.bf16 %v5879_v54, %v5879_v54  ;;  %v5888_v0 = vmul.f32 %v5205_v57, %v5837_v7  ;;  %v5896_v5 = vadd.f32 %v5829_v60, %v451_v61  ;;  %v1301_v28 = vrot.slane %v5879_v54, 7 }
  0xf1   : > { %5210 = vrcp.f32 %v582_v58  ;;  %v414_v6 = vpop.f32.mrf.mxu0  ;;  %v1398_v29 = vrot.slane %v5879_v54, 1 }
  0xf2   : > { %1599 = vst [vmem:[#allocation2 + $0xdc] sm:$0xf] %v1567_v63  ;;  %v1286_v8 = vrot.slane %v5888_v0, 7  ;;  %v1383_v9 = vrot.slane %v5888_v0, 1  ;;  %v1552_v7 = vpack.c.bf16 %v5888_v0, %v5888_v0  ;;  %5212 = vpow2.f32 %v522_v59 }
  0xf3   : > { %v503_v11 = vsub.f32 0.0, %v5896_v5  ;;  %v5908_v12 = vadd.f32 %v5829_v60, %v414_v6  ;;  %v4219_v6 = vsel %vm5902_vm5, 1.0, %v5648_v50 }
  0xf4   : > { %v5207_v16 = vpop.eup %5206  ;;  %v1348_v18 = vsel %vm1317_vm1, %v1285_v3, %v1286_v8  ;;  %v1445_v19 = vsel %vm1414_vm3, %v1382_v4, %v1383_v9  ;;  %1584 = vst [vmem:[#allocation2 + $0x28] sm:$0xf] %v1552_v7 }
  0xf5   : > { %v5209_v23 = vpop.eup %5208  ;;  %v1488_v24 = vpack.c.bf16 %v1348_v18, %v1348_v18  ;;  %v1615_v25 = vpack.c.bf16 %v1445_v19, %v1445_v19  ;;  %v598_v26 = vadd.f32 1.0, %v5207_v16  ;;  %v554_v27 = vmul.f32 1.442695, %v503_v11 }
  0xf6   : > { %v5929_v30 = vmul.f32 %v5209_v23, %v5843_v17  ;;  %v488_v31 = vsub.f32 0.0, %v5908_v12 }
  0xf7   : > { %v5211_v32 = vpop.eup %5210  ;;  %1520 = vst [vmem:[#allocation2 + $0x24] sm:$0xf] %v1488_v24  ;;  %5214 = vrcp.f32 %v598_v26  ;;  %v454_v34 = vpop.f32.mrf.mxu2 }
  0xf8   : > { %v5213_v39 = vpop.eup %5212  ;;  %1647 = vst [vmem:[#allocation2 + $0x20] sm:$0xf] %v1615_v25  ;;  %v1302_v40 = vrot.slane %v5929_v30, 7  ;;  %v1399_v17 = vrot.slane %v5929_v30, 1  ;;  %v1568_v41 = vpack.c.bf16 %v5929_v30, %v5929_v30  ;;  %v5942_v42 = vmul.f32 %v5211_v32, %v5848_v22 }
  0xf9   : > { %v583_v43 = vadd.f32 1.0, %v5213_v39  ;;  %5216 = vpow2.f32 %v554_v27  ;;  %v524_v45 = vmul.f32 1.442695, %v488_v31  ;;  %v5945_v46 = vadd.f32 %v5829_v60, %v454_v34  ;;  %v416_v47 = vpop.f32.mrf.mxu0 }
  0xfa   : > { %v1332_v48 = vsel %vm1317_vm1, %v1301_v28, %v1302_v40  ;;  %v1429_v49 = vsel %vm1414_vm3, %v1398_v29, %v1399_v17  ;;  %1600 = vst [vmem:[#allocation2 + $0xe8] sm:$0xf] %v1568_v41  ;;  %v1287_v22 = vrot.slane %v5942_v42, 7  ;;  %v1384_v52 = vrot.slane %v5942_v42, 1 }
  0xfb   : > { %v1504_v53 = vpack.c.bf16 %v1332_v48, %v1332_v48  ;;  %v1631_v56 = vpack.c.bf16 %v1429_v49, %v1429_v49  ;;  %v1553_v57 = vpack.c.bf16 %v5942_v42, %v5942_v42  ;;  %5218 = vrcp.f32 %v583_v43  ;;  %v4231_v62 = vld [vmem:[#allocation2 + $0x24] sm:$0xf0] }
  0xfc   : > { %v1347_v58 = vsel %vm1317_vm1, %v1286_v8, %v1287_v22  ;;  %v1444_v59 = vsel %vm1414_vm3, %v1383_v9, %v1384_v52  ;;  %5220 = vpow2.f32 %v524_v45  ;;  %v504_v61 = vsub.f32 0.0, %v5945_v46  ;;  %v4928_v9 = vld [vmem:[#allocation2 + $0x1c] sm:$0xf] }
  0xfd   : > { %v5215_v63 = vpop.eup %5214  ;;  %1536 = vst [vmem:[#allocation2 + $0xe4] sm:$0xf] %v1504_v53  ;;  %v1352_v0 = vmul.f32 %v5875_v51, %v1347_v58  ;;  %v1448_v2 = vmul.f32 %v5882_v55, %v1444_v59  ;;  %v5976_v8 = vsel %vm5921_vm6, 1.0, %v5648_v50  ;;  %v5984_v51 = vsel %vm5932_vm7, 1.0, %v5648_v50 }
  0xfe   : > { %1663 = vst [vmem:[#allocation2 + $0xe0] sm:$0xf] %v1631_v56  ;;  %v5979_v7 = vmul.f32 %v5215_v63, %v5856_v37  ;;  %v556_v55 = vmul.f32 1.442695, %v504_v61  ;;  %v5995_v37 = vadd.f32 %v5829_v60, %v416_v47  ;;  %v5997_v18 = vor.u32 %v4928_v9, %v4231_v62 }
  0xff   : > { %v5217_v10 = vpop.eup %5216  ;;  %v1489_v13 = vpack.c.bf16 %v1352_v0, %v1352_v0  ;;  %1585 = vst [vmem:[#allocation2 + $0x34] sm:$0xf] %v1553_v57  ;;  %v1616_v14 = vpack.c.bf16 %v1448_v2, %v1448_v2  ;;  %v456_v19 = vpop.f32.mrf.mxu2  ;;  %v682_v31 = vadd.s32 40, %v5840_v15  ;;  %v683_v62 = vadd.s32 48, %v5840_v15 }
 0x100   : > { %v1303_v20 = vrot.slane %v5979_v7, 7  ;;  %v1400_v21 = vrot.slane %v5979_v7, 1  ;;  %v1569_v23 = vpack.c.bf16 %v5979_v7, %v5979_v7  ;;  %v599_v24 = vadd.f32 1.0, %v5217_v10  ;;  %2341 = vmatmul.bf16.vlgmr.msrb.gmra.mxu2 %v5997_v18 }
 0x101   : > { %v5219_v25 = vpop.eup %5218  ;;  %1521 = vst [vmem:[#allocation2 + $0x30] sm:$0xf] %v1489_v13  ;;  %5222 = vpow2.f32 %v556_v55  ;;  %v489_v26 = vsub.f32 0.0, %v5995_v37  ;;  %v6006_v27 = vadd.f32 %v5829_v60, %v456_v19  ;;  %v419_v30 = vpop.f32.mrf.mxu0  ;;  %v748_v42 = vand.u32 15, %v682_v31 }
 0x102   : > { %v5221_v32 = vpop.eup %5220  ;;  %1648 = vst [vmem:[#allocation2 + $0x2c] sm:$0xf] %v1616_v14  ;;  %v1331_v33 = vsel %vm1317_vm1, %v1302_v40, %v1303_v20  ;;  %v1428_v34 = vsel %vm1414_vm3, %v1399_v17, %v1400_v21  ;;  %v6018_v35 = vmul.f32 %v5219_v25, %v5868_v44  ;;  %5224 = vrcp.f32 %v599_v24 }
 0x103   : > { %v1368_v38 = vmul.f32 %v5891_v1, %v1331_v33  ;;  %v1464_v39 = vmul.f32 %v4219_v6, %v1428_v34  ;;  %1601 = vst [vmem:[#allocation2 + $0xf4] sm:$0xf] %v1569_v23  ;;  %v584_v41 = vadd.f32 1.0, %v5221_v32  ;;  %v526_v43 = vmul.f32 1.442695, %v489_v26 }
 0x104   : > { %v1288_v45 = vrot.slane %v6018_v35, 7  ;;  %v1385_v47 = vrot.slane %v6018_v35, 1  ;;  %v1554_v40 = vpack.c.bf16 %v6018_v35, %v6018_v35  ;;  %v505_v48 = vsub.f32 0.0, %v6006_v27  ;;  %v4953_v36 = vld [vmem:[#allocation2 + $0xe0] sm:$0xf0] }
 0x105   : > { %v1505_v17 = vpack.c.bf16 %v1368_v38, %v1368_v38  ;;  %v1632_v49 = vpack.c.bf16 %v1464_v39, %v1464_v39  ;;  %5226 = vrcp.f32 %v584_v41  ;;  %v6027_v44 = vadd.f32 %v5829_v60, %v419_v30 }
 0x106   : > { %v1346_v1 = vsel %vm1317_vm1, %v1287_v22, %v1288_v45  ;;  %v1443_v53 = vsel %vm1414_vm3, %v1384_v52, %v1385_v47  ;;  %1586 = vst [vmem:[#allocation2 + $0x40] sm:$0xf] %v1554_v40  ;;  %5228 = vpow2.f32 %v526_v43  ;;  %v558_v56 = vmul.f32 1.442695, %v505_v48 }
 0x107   : > { %v5223_v57 = vpop.eup %5222  ;;  %1537 = vst [vmem:[#allocation2 + $0xf0] sm:$0xf] %v1505_v17  ;;  %v1490_v58 = vpack.c.bf16 %v1346_v1, %v1346_v1  ;;  %v1617_v59 = vpack.c.bf16 %v1443_v53, %v1443_v53  ;;  %v490_v61 = vsub.f32 0.0, %v6027_v44  ;;  %v459_v63 = vpop.f32.mrf.mxu2  ;;  %v6052_v6 = vsel %vm5986_vm8, 1.0, %v5648_v50 }
 0x108   : > { %v5225_v22 = vpop.eup %5224  ;;  %1664 = vst [vmem:[#allocation2 + $0xec] sm:$0xf] %v1632_v49  ;;  %v600_v0 = vadd.f32 1.0, %v5223_v57  ;;  %5230 = vpow2.f32 %v558_v56  ;;  %v6044_v2 = vadd.f32 %v5829_v60, %v459_v63  ;;  %v755_v55 = vand.u32 15, %v683_v62 }
 0x109   : > { %1522 = vst [vmem:[#allocation2 + $0x3c] sm:$0xf] %v1490_v58  ;;  %v6047_v52 = vmul.f32 %v5225_v22, %v5896_v5  ;;  %v528_v9 = vmul.f32 1.442695, %v490_v61  ;;  %v421_v10 = vpop.f32.mrf.mxu0  ;;  %v6057_v13 = vsel %vm5990_vm9, 1.0, %v5648_v50  ;;  %v6061_v5 = vadd.s32 168, %v5840_v15 }
 0x10a   : > { %1649 = vst [vmem:[#allocation2 + $0x38] sm:$0xf] %v1617_v59  ;;  %5232 = vrcp.f32 %v600_v0  ;;  %v506_v14 = vsub.f32 0.0, %v6044_v2  ;;  %vm6070_vm10 = vcmp.ne.s32.totalorder %v748_v42, 15  ;;  %v699_v31 = vadd.s32 176, %v5840_v15 }
 0x10b   : > { %v5227_v19 = vpop.eup %5226  ;;  %v1304_v11 = vrot.slane %v6047_v52, 7  ;;  %v1401_v23 = vrot.slane %v6047_v52, 1  ;;  %v1570_v24 = vpack.c.bf16 %v6047_v52, %v6047_v52  ;;  %5234 = vpow2.f32 %v528_v9  ;;  %v4931_v52 = vld [vmem:[#allocation2 + $0x34] sm:$0xf] }
 0x10c   : > { %v5229_v25 = vpop.eup %5228  ;;  %v6068_v26 = vmul.f32 %v5227_v19, %v5908_v12  ;;  %v560_v30 = vmul.f32 1.442695, %v506_v14  ;;  %vm6083_vm11 = vcmp.ne.s32.totalorder %v755_v55, 0  ;;  %v867_v53 = vand.u32 15, %v699_v31 }
 0x10d   : > { %v1330_v32 = vsel %vm1317_vm1, %v1303_v20, %v1304_v11  ;;  %v1427_v33 = vsel %vm1414_vm3, %v1400_v21, %v1401_v23  ;;  %1602 = vst [vmem:[#allocation2 + $0x100] sm:$0xf] %v1570_v24  ;;  %v585_v12 = vadd.f32 1.0, %v5229_v25  ;;  %v6094_v21 = vsel %vm6070_vm10, 1.0, %v5648_v50 }
 0x10e   : > { %v5231_v38 = vpop.eup %5230  ;;  %v1506_v39 = vpack.c.bf16 %v1330_v32, %v1330_v32  ;;  %v1633_v41 = vpack.c.bf16 %v1427_v33, %v1427_v33  ;;  %v1289_v43 = vrot.slane %v6068_v26, 7  ;;  %v1386_v40 = vrot.slane %v6068_v26, 1 }
 0x10f   : > { %v1555_v20 = vpack.c.bf16 %v6068_v26, %v6068_v26  ;;  %5236 = vrcp.f32 %v585_v12  ;;  %v601_v7 = vadd.f32 1.0, %v5231_v38  ;;  %v461_v48 = vpop.f32.mrf.mxu2  ;;  %v860_v61 = vand.u32 15, %v6061_v5 }
 0x110   : > { %v5233_v17 = vpop.eup %5232  ;;  %1538 = vst [vmem:[#allocation2 + $0xfc] sm:$0xf] %v1506_v39  ;;  %v1345_v49 = vsel %vm1317_vm1, %v1288_v45, %v1289_v43  ;;  %v1442_v1 = vsel %vm1414_vm3, %v1385_v47, %v1386_v40  ;;  %5238 = vpow2.f32 %v560_v30  ;;  %v6115_v35 = vadd.f32 %v5829_v60, %v421_v10  ;;  %v4243_v47 = vld [vmem:[#allocation2 + $0x3c] sm:$0xf0] }
 0x111   : > { %v5235_v56 = vpop.eup %5234  ;;  %1665 = vst [vmem:[#allocation2 + $0xf8] sm:$0xf] %v1633_v41  ;;  %v1354_v57 = vmul.f32 %v5976_v8, %v1345_v49  ;;  %v1450_v58 = vmul.f32 %v5984_v51, %v1442_v1  ;;  %v6111_v59 = vmul.f32 %v5233_v17, %v5945_v46  ;;  %5240 = vrcp.f32 %v601_v7  ;;  %v424_v62 = vpop.f32.mrf.mxu0 }
 0x112   : > { %1587 = vst [vmem:[#allocation2 + $0x4c] sm:$0xf] %v1555_v20  ;;  %v586_v45 = vadd.f32 1.0, %v5235_v56  ;;  %v6124_v51 = vsel %vm6083_vm11, 1.0, %v5648_v50  ;;  %vm6126_vm12 = vcmp.ne.s32.totalorder %v867_v53, 0  ;;  %v491_v14 = vsub.f32 0.0, %v6115_v35 }
 0x113   : > { %v1491_v63 = vpack.c.bf16 %v1354_v57, %v1354_v57  ;;  %v1618_v22 = vpack.c.bf16 %v1450_v58, %v1450_v58  ;;  %v1305_v0 = vrot.slane %v6111_v59, 7  ;;  %v1402_v8 = vrot.slane %v6111_v59, 1 }
 0x114   : > { %v1571_v46 = vpack.c.bf16 %v6111_v59, %v6111_v59  ;;  %5242 = vrcp.f32 %v586_v45  ;;  %v6135_v5 = vor.u32 %v4931_v52, %v4243_v47  ;;  %v6141_v30 = vadd.f32 %v5829_v60, %v461_v48 }
 0x115   : > { %v5237_v9 = vpop.eup %5236  ;;  %1523 = vst [vmem:[#allocation2 + $0x48] sm:$0xf] %v1491_v63  ;;  %v1329_v55 = vsel %vm1317_vm1, %v1304_v11, %v1305_v0  ;;  %v1426_v10 = vsel %vm1414_vm3, %v1401_v23, %v1402_v8  ;;  %vm6143_vm13 = vcmp.ne.s32.totalorder %v860_v61, 15  ;;  %v530_v32 = vmul.f32 1.442695, %v491_v14 }
 0x116   : > { %v5239_v19 = vpop.eup %5238  ;;  %1650 = vst [vmem:[#allocation2 + $0x44] sm:$0xf] %v1618_v22  ;;  %v1370_v24 = vmul.f32 %v6052_v6, %v1329_v55  ;;  %v1466_v25 = vmul.f32 %v6057_v13, %v1426_v10  ;;  %v649_v16 = vmul.f32 %v5237_v9, %v5995_v37  ;;  %2346 = vmatmul.bf16.gmra.mxu2 %v6135_v5  ;;  %v507_v41 = vsub.f32 0.0, %v6141_v30 }
 0x117   : > { %v5241_v31 = vpop.eup %5240  ;;  %1603 = vst [vmem:[#allocation2 + $0x10c] sm:$0xf] %v1571_v46  ;;  %v602_v11 = vadd.f32 1.0, %v5239_v19  ;;  %v6149_v33 = vadd.f32 %v5829_v60, %v424_v62  ;;  %v6151_v34 = vpop.f32.mrf.mxu2  ;;  %v684_v45 = vadd.s32 56, %v5840_v15  ;;  %v685_v61 = vadd.s32 64, %v5840_v15 }
 0x118   : > { %v1507_v6 = vpack.c.bf16 %v1370_v24, %v1370_v24  ;;  %v1634_v13 = vpack.c.bf16 %v1466_v25, %v1466_v25  ;;  %v1290_v12 = vrot.slane %v649_v16, 7  ;;  %v1387_v37 = vrot.slane %v649_v16, 1 }
 0x119   : > { %v1556_v38 = vpack.c.bf16 %v649_v16, %v649_v16  ;;  %v665_v39 = vmul.f32 %v5241_v31, %v6006_v27  ;;  %5244 = vrcp.f32 %v602_v11  ;;  %v492_v17 = vsub.f32 0.0, %v6149_v33  ;;  %v426_v59 = vpop.f32.mrf.mxu0 }
 0x11a   : > { %v5243_v20 = vpop.eup %5242  ;;  %1539 = vst [vmem:[#allocation2 + $0x108] sm:$0xf] %v1507_v6  ;;  %v1344_v7 = vsel %vm1317_vm1, %v1289_v43, %v1290_v12  ;;  %v1441_v48 = vsel %vm1414_vm3, %v1386_v40, %v1387_v37  ;;  %5246 = vpow2.f32 %v530_v32  ;;  %v562_v58 = vmul.f32 1.442695, %v507_v41 }
 0x11b   : > { %1666 = vst [vmem:[#allocation2 + $0x104] sm:$0xf] %v1634_v13  ;;  %v1492_v27 = vpack.c.bf16 %v1344_v7, %v1344_v7  ;;  %v1619_v49 = vpack.c.bf16 %v1441_v48, %v1441_v48  ;;  %v1306_v1 = vrot.slane %v665_v39, 7  ;;  %v1403_v53 = vrot.slane %v665_v39, 1  ;;  %v4934_v48 = vld [vmem:[#allocation2 + $0x4c] sm:$0xf] }
 0x11c   : > { %1588 = vst [vmem:[#allocation2 + $0x58] sm:$0xf] %v1556_v38  ;;  %v1572_v56 = vpack.c.bf16 %v665_v39, %v665_v39  ;;  %v6165_v57 = vmul.f32 %v5243_v20, %v6027_v44  ;;  %v532_v43 = vmul.f32 1.442695, %v492_v17  ;;  %5248 = vpow2.f32 %v562_v58 }
 0x11d   : > { %1524 = vst [vmem:[#allocation2 + $0x54] sm:$0xf] %v1492_v27  ;;  %v1328_v26 = vsel %vm1317_vm1, %v1305_v0, %v1306_v1  ;;  %v1425_v40 = vsel %vm1414_vm3, %v1402_v8, %v1403_v53  ;;  %v4206_v0 = vsel %vm6126_vm12, 1.0, %v5648_v50  ;;  %v769_v8 = vand.u32 15, %v685_v61 }
 0x11e   : > { %1651 = vst [vmem:[#allocation2 + $0x50] sm:$0xf] %v1619_v49  ;;  %v1508_v47 = vpack.c.bf16 %v1328_v26, %v1328_v26  ;;  %v1635_v62 = vpack.c.bf16 %v1425_v40, %v1425_v40  ;;  %v1291_v44 = vrot.slane %v6165_v57, 7  ;;  %v1388_v63 = vrot.slane %v6165_v57, 1 }
 0x11f   : > { %v5245_v22 = vpop.eup %5244  ;;  %1604 = vst [vmem:[#allocation2 + $0x118] sm:$0xf] %v1572_v56  ;;  %v1557_v46 = vpack.c.bf16 %v6165_v57, %v6165_v57  ;;  %5250 = vpow2.f32 %v532_v43  ;;  %v4221_v19 = vsel %vm6143_vm13, 1.0, %v5648_v50  ;;  %v762_v31 = vand.u32 15, %v684_v45  ;;  %v466_v11 = vpop.f32.mrf.mxu2 }
 0x120   : > { %v5247_v52 = vpop.eup %5246  ;;  %1540 = vst [vmem:[#allocation2 + $0x114] sm:$0xf] %v1508_v47  ;;  %v1343_v9 = vsel %vm1317_vm1, %v1290_v12, %v1291_v44  ;;  %v1440_v55 = vsel %vm1414_vm3, %v1387_v37, %v1388_v63  ;;  %v6189_v10 = vmul.f32 %v5245_v22, %v6044_v2  ;;  %vm6200_vm14 = vcmp.ne.s32.totalorder %v769_v8, 0 }
 0x121   : > { %1667 = vst [vmem:[#allocation2 + $0x110] sm:$0xf] %v1635_v62  ;;  %v1356_v42 = vmul.f32 %v6124_v51, %v1343_v9  ;;  %v1452_v14 = vmul.f32 %v6094_v21, %v1440_v55  ;;  %v587_v24 = vadd.f32 1.0, %v5247_v52  ;;  %v6214_v12 = vadd.f32 %v5829_v60, %v6151_v34 }
 0x122   : > { %1589 = vst [vmem:[#allocation2 + $0x64] sm:$0xf] %v1557_v46  ;;  %v1307_v25 = vrot.slane %v6189_v10, 7  ;;  %v1404_v16 = vrot.slane %v6189_v10, 1  ;;  %v1573_v2 = vpack.c.bf16 %v6189_v10, %v6189_v10  ;;  %v700_v37 = vadd.s32 184, %v5840_v15  ;;  %v5249_v38 = vpop.eup %5248 }
 0x123   : > { %v1493_v32 = vpack.c.bf16 %v1356_v42, %v1356_v42  ;;  %v1620_v6 = vpack.c.bf16 %v1452_v14, %v1452_v14  ;;  %5252 = vrcp.f32 %v587_v24  ;;  %v4255_v51 = vld [vmem:[#allocation2 + $0x54] sm:$0xf0]  ;;  %v701_v20 = vadd.s32 192, %v5840_v15 }
 0x124   : > { %v1327_v23 = vsel %vm1317_vm1, %v1306_v1, %v1307_v25  ;;  %v1424_v13 = vsel %vm1414_vm3, %v1403_v53, %v1404_v16  ;;  %1605 = vst [vmem:[#allocation2 + $0x124] sm:$0xf] %v1573_v2  ;;  %v6219_v7 = vadd.f32 %v5829_v60, %v426_v59  ;;  %v603_v27 = vadd.f32 1.0, %v5249_v38  ;;  %v429_v53 = vpop.f32.mrf.mxu0 }
 0x125   : > { %1525 = vst [vmem:[#allocation2 + $0x60] sm:$0xf] %v1493_v32  ;;  %v1372_v39 = vmul.f32 %v4206_v0, %v1327_v23  ;;  %v1468_v41 = vmul.f32 %v4221_v19, %v1424_v13  ;;  %v5251_v17 = vpop.eup %5250  ;;  %v508_v49 = vsub.f32 0.0, %v6214_v12  ;;  %v874_v1 = vand.u32 15, %v700_v37 }
 0x126   : > { %1652 = vst [vmem:[#allocation2 + $0x5c] sm:$0xf] %v1620_v6  ;;  %v6222_v34 = vor.u32 %v4934_v48, %v4255_v51  ;;  %v588_v43 = vadd.f32 1.0, %v5251_v17  ;;  %5254 = vrcp.f32 %v603_v27  ;;  %vm6224_vm15 = vcmp.ne.s32.totalorder %v762_v31, 15 }
 0x127   : > { %v1509_v56 = vpack.c.bf16 %v1372_v39, %v1372_v39  ;;  %v1636_v58 = vpack.c.bf16 %v1468_v41, %v1468_v41  ;;  %v564_v59 = vmul.f32 1.442695, %v508_v49  ;;  %v493_v40 = vsub.f32 0.0, %v6219_v7 }
 0x128   : > { %2351 = vmatmul.bf16.gmra.mxu2 %v6222_v34  ;;  %5256 = vrcp.f32 %v588_v43  ;;  %v4199_v61 = vsel %vm6200_vm14, 1.0, %v5648_v50  ;;  %v881_v47 = vand.u32 15, %v701_v20  ;;  %v6234_v62 = vadd.f32 %v5829_v60, %v466_v11 }
 0x129   : > { %v5253_v45 = vpop.eup %5252  ;;  %1541 = vst [vmem:[#allocation2 + $0x120] sm:$0xf] %v1509_v56  ;;  %5258 = vpow2.f32 %v564_v59  ;;  %vm6237_vm0 = vcmp.ne.s32.totalorder %v874_v1, 15  ;;  %v534_v0 = vmul.f32 1.442695, %v493_v40  ;;  %v6243_v52 = vadd.f32 %v5829_v60, %v429_v53 }
 0x12a   : > { %1668 = vst [vmem:[#allocation2 + $0x11c] sm:$0xf] %v1636_v58  ;;  %v651_v22 = vmul.f32 %v5253_v45, %v6115_v35  ;;  %v509_v8 = vsub.f32 0.0, %v6234_v62  ;;  %v686_v9 = vadd.s32 72, %v5840_v15  ;;  %v687_v55 = vadd.s32 80, %v5840_v15  ;;  %v469_v35 = vpop.f32.mrf.mxu2 }
 0x12b   : > { %5260 = vpow2.f32 %v534_v0  ;;  %v4214_v24 = vsel %vm6224_vm15, 1.0, %v5648_v50  ;;  %vm6250_vm2 = vcmp.ne.s32.totalorder %v881_v47, 0  ;;  %v494_v11 = vsub.f32 0.0, %v6243_v52 }
 0x12c   : > { %v1292_v42 = vrot.slane %v651_v22, 7  ;;  %v1389_v14 = vrot.slane %v651_v22, 1  ;;  %v1558_v19 = vpack.c.bf16 %v651_v22, %v651_v22  ;;  %v566_v31 = vmul.f32 1.442695, %v509_v8  ;;  %v5255_v32 = vpop.eup %5254  ;;  %v431_v48 = vpop.f32.mrf.mxu0  ;;  %v4980_v8 = vld [vmem:[#allocation8 + $0x38] sm:$0xff] }
 0x12d   : > { %v6266_v51 = vsel %vm6237_vm0, 1.0, %v5648_v50  ;;  %v776_v23 = vand.u32 15, %v686_v9  ;;  %v6269_v39 = vmul.f32 %v5255_v32, %v6141_v30  ;;  %v536_v41 = vmul.f32 1.442695, %v494_v11  ;;  %2671 = vmatpush.bf16.msrb.mxu0 %v4980_v8 }
 0x12e   : > { %v1342_v6 = vsel %vm1317_vm1, %v1291_v44, %v1292_v42  ;;  %v1439_v21 = vsel %vm1414_vm3, %v1388_v63, %v1389_v14  ;;  %1590 = vst [vmem:[#allocation2 + $0x70] sm:$0xf] %v1558_v19  ;;  %v5257_v13 = vpop.eup %5256  ;;  %5262 = vpow2.f32 %v566_v31  ;;  %v783_v63 = vand.u32 15, %v687_v55 }
 0x12f   : > { %v1494_v37 = vpack.c.bf16 %v1342_v6, %v1342_v6  ;;  %v1621_v38 = vpack.c.bf16 %v1439_v21, %v1439_v21  ;;  %v5259_v44 = vpop.eup %5258  ;;  %v6272_v57 = vmul.f32 %v5257_v13, %v6149_v33  ;;  %v6275_v20 = vadd.f32 %v5829_v60, %v469_v35 }
 0x130   : > { %v1308_v17 = vrot.slane %v6269_v39, 7  ;;  %v1405_v27 = vrot.slane %v6269_v39, 1  ;;  %v1574_v30 = vpack.c.bf16 %v6269_v39, %v6269_v39  ;;  %v604_v49 = vadd.f32 1.0, %v5259_v44 }
 0x131   : > { %1526 = vst [vmem:[#allocation2 + $0x6c] sm:$0xf] %v1494_v37  ;;  %v5261_v1 = vpop.eup %5260  ;;  %v1293_v33 = vrot.slane %v6272_v57, 7  ;;  %v1390_v53 = vrot.slane %v6272_v57, 1  ;;  %v1559_v56 = vpack.c.bf16 %v6272_v57, %v6272_v57  ;;  %5264 = vpow2.f32 %v536_v41 }
 0x132   : > { %1653 = vst [vmem:[#allocation2 + $0x68] sm:$0xf] %v1621_v38  ;;  %v1326_v58 = vsel %vm1317_vm1, %v1307_v25, %v1308_v17  ;;  %v1423_v43 = vsel %vm1414_vm3, %v1404_v16, %v1405_v27  ;;  %5266 = vrcp.f32 %v604_v49  ;;  %v589_v26 = vadd.f32 1.0, %v5261_v1 }
 0x133   : > { %1606 = vst [vmem:[#allocation2 + $0x130] sm:$0xf] %v1574_v30  ;;  %v1510_v59 = vpack.c.bf16 %v1326_v58, %v1326_v58  ;;  %v1637_v40 = vpack.c.bf16 %v1423_v43, %v1423_v43  ;;  %v1341_v45 = vsel %vm1317_vm1, %v1292_v42, %v1293_v33  ;;  %v1438_v25 = vsel %vm1414_vm3, %v1389_v14, %v1390_v53  ;;  %v471_v42 = vpop.f32.mrf.mxu2 }
 0x134   : > { %1591 = vst [vmem:[#allocation2 + $0x7c] sm:$0xf] %v1559_v56  ;;  %v5263_v10 = vpop.eup %5262  ;;  %v1358_v47 = vmul.f32 %v4199_v61, %v1341_v45  ;;  %v1454_v22 = vmul.f32 %v4214_v24, %v1438_v25  ;;  %5268 = vrcp.f32 %v589_v26  ;;  %v6306_v16 = vadd.s32 200, %v5840_v15  ;;  %v4937_v24 = vld [vmem:[#allocation2 + $0x64] sm:$0xf] }
 0x135   : > { %v4267_v46 = vld [vmem:[#allocation2 + $0x6c] sm:$0xf0]  ;;  %1542 = vst [vmem:[#allocation2 + $0x12c] sm:$0xf] %v1510_v59  ;;  %v605_v0 = vadd.f32 1.0, %v5263_v10  ;;  %vm6308_vm4 = vcmp.ne.s32.totalorder %v783_v63, 0  ;;  %v6321_v35 = vadd.f32 %v5829_v60, %v431_v48  ;;  %v6335_v38 = vadd.f32 %v5829_v60, %v471_v42  ;;  %v434_v63 = vpop.f32.mrf.mxu0 }
 0x136   : > { %vm6312_vm5 = vcmp.ne.s32.totalorder %v776_v23, 15  ;;  %v510_v55 = vsub.f32 0.0, %v6275_v20  ;;  %1669 = vst [vmem:[#allocation2 + $0x128] sm:$0xf] %v1637_v40  ;;  %v1495_v61 = vpack.c.bf16 %v1358_v47, %v1358_v47  ;;  %v1622_v14 = vpack.c.bf16 %v1454_v22, %v1454_v22 }
 0x137   : > { %v6318_v19 = vadd.s32 208, %v5840_v15  ;;  %v5265_v31 = vpop.eup %5264  ;;  %v4207_v11 = vsel %vm6250_vm2, 1.0, %v5648_v50  ;;  %5270 = vrcp.f32 %v605_v0  ;;  %v6326_v6 = vor.u32 %v4937_v24, %v4267_v46 }
 0x138   : > { %v568_v32 = vmul.f32 1.442695, %v510_v55  ;;  %v5267_v21 = vpop.eup %5266  ;;  %1527 = vst [vmem:[#allocation2 + $0x78] sm:$0xf] %v1495_v61  ;;  %v590_v23 = vadd.f32 1.0, %v5265_v31  ;;  %v6331_v13 = vsel %vm6308_vm4, 1.0, %v5648_v50  ;;  %v6349_v59 = vadd.f32 %v5829_v60, %v434_v63 }
 0x139   : > { %v495_v37 = vsub.f32 0.0, %v6321_v35  ;;  %1654 = vst [vmem:[#allocation2 + $0x74] sm:$0xf] %v1622_v14  ;;  %v668_v2 = vmul.f32 %v5267_v21, %v6214_v12  ;;  %v6341_v44 = vsel %vm6312_vm5, 1.0, %v5648_v50  ;;  %v888_v41 = vand.u32 15, %v6306_v16  ;;  %2356 = vmatmul.bf16.gmra.mxu2 %v6326_v6 }
 0x13a   : > { %5272 = vpow2.f32 %v568_v32  ;;  %v5269_v48 = vpop.eup %5268  ;;  %v895_v30 = vand.u32 15, %v6318_v19  ;;  %v511_v1 = vsub.f32 0.0, %v6335_v38  ;;  %v6352_v40 = vadd.s32 88, %v5840_v15 }
 0x13b   : > { %5274 = vrcp.f32 %v590_v23  ;;  %v538_v49 = vmul.f32 1.442695, %v495_v37  ;;  %v1309_v56 = vrot.slane %v668_v2, 7  ;;  %v1406_v12 = vrot.slane %v668_v2, 1  ;;  %v6386_v23 = vld [vmem:[%s7418_s2] ss:$0 sm:$0xff] }
 0x13c   : > { %v1575_v58 = vpack.c.bf16 %v668_v2, %v668_v2  ;;  %v653_v43 = vmul.f32 %v5269_v48, %v6219_v7  ;;  %v570_v26 = vmul.f32 1.442695, %v511_v1  ;;  %v689_v21 = vadd.s32 96, %v5840_v15  ;;  %v4979_v1 = vld [vmem:[#allocation8 + $0x30] sm:$0xff] }
 0x13d   : > { %5276 = vpow2.f32 %v538_v49  ;;  %v5271_v45 = vpop.eup %5270  ;;  %v1325_v25 = vsel %vm1317_vm1, %v1308_v17, %v1309_v56  ;;  %v1422_v10 = vsel %vm1414_vm3, %v1405_v27, %v1406_v12  ;;  %v496_v27 = vsub.f32 0.0, %v6349_v59  ;;  %v436_v49 = vpop.f32.mrf.mxu0  ;;  %2672 = vmatpush.bf16.msrb.mxu0 %v4979_v1 }
 0x13e   : > { %1607 = vst [vmem:[#allocation2 + $0x13c] sm:$0xf] %v1575_v58  ;;  %v1294_v7 = vrot.slane %v653_v43, 7  ;;  %v1391_v47 = vrot.slane %v653_v43, 1  ;;  %v1374_v22 = vmul.f32 %v4207_v11, %v1325_v25  ;;  %v1470_v60 = vmul.f32 %v6266_v51, %v1422_v10  ;;  %v474_v51 = vpop.f32.mrf.mxu2 }
 0x13f   : > { %v1560_v46 = vpack.c.bf16 %v653_v43, %v653_v43  ;;  %v6364_v0 = vmul.f32 %v5271_v45, %v6234_v62  ;;  %5278 = vpow2.f32 %v570_v26  ;;  %v540_v32 = vmul.f32 1.442695, %v496_v27 }
 0x140   : > { %v5273_v9 = vpop.eup %5272  ;;  %v1340_v39 = vsel %vm1317_vm1, %v1293_v33, %v1294_v7  ;;  %v1437_v17 = vsel %vm1414_vm3, %v1390_v53, %v1391_v47  ;;  %v1511_v42 = vpack.c.bf16 %v1374_v22, %v1374_v22  ;;  %v1638_v62 = vpack.c.bf16 %v1470_v60, %v1470_v60 }
 0x141   : > { %v5275_v55 = vpop.eup %5274  ;;  %v1496_v61 = vpack.c.bf16 %v1340_v39, %v1340_v39  ;;  %1592 = vst [vmem:[#allocation2 + $0x88] sm:$0xf] %v1560_v46  ;;  %v1623_v14 = vpack.c.bf16 %v1437_v17, %v1437_v17  ;;  %v1310_v24 = vrot.slane %v6364_v0, 7  ;;  %v1407_v31 = vrot.slane %v6364_v0, 1 }
 0x142   : > { %v1576_v57 = vpack.c.bf16 %v6364_v0, %v6364_v0  ;;  %v6380_v33 = vmul.f32 %v5275_v55, %v6243_v52  ;;  %1543 = vst [vmem:[#allocation2 + $0x138] sm:$0xf] %v1511_v42  ;;  %v606_v11 = vadd.f32 1.0, %v5273_v9  ;;  %v6389_v37 = vadd.f32 %v6386_v23, %v474_v51  ;;  %v4978_v9 = vld [vmem:[#allocation8 + $0x28] sm:$0xff] }
 0x143   : > { %v5277_v53 = vpop.eup %5276  ;;  %1670 = vst [vmem:[#allocation2 + $0x134] sm:$0xf] %v1638_v62  ;;  %v1324_v52 = vsel %vm1317_vm1, %v1309_v56, %v1310_v24  ;;  %v1421_v2 = vsel %vm1414_vm3, %v1406_v12, %v1407_v31  ;;  %v790_v46 = vand.u32 15, %v6352_v40  ;;  %vm6416_vm6 = vcmp.ne.s32.totalorder %v888_v41, 15  ;;  %2673 = vmatpush.bf16.msrb.mxu0 %v4978_v9 }
 0x144   : > { %v1295_v63 = vrot.slane %v6380_v33, 7  ;;  %v1392_v48 = vrot.slane %v6380_v33, 1  ;;  %1528 = vst [vmem:[#allocation2 + $0x84] sm:$0xf] %v1496_v61  ;;  %v1512_v58 = vpack.c.bf16 %v1324_v52, %v1324_v52  ;;  %v1639_v43 = vpack.c.bf16 %v1421_v2, %v1421_v2 }
 0x145   : > { %v1561_v26 = vpack.c.bf16 %v6380_v33, %v6380_v33  ;;  %5280 = vrcp.f32 %v606_v11  ;;  %v5279_v45 = vpop.eup %5278  ;;  %1655 = vst [vmem:[#allocation2 + $0x80] sm:$0xf] %v1623_v14  ;;  %v591_v25 = vadd.f32 1.0, %v5277_v53  ;;  %v512_v8 = vsub.f32 0.0, %v6389_v37  ;;  %v4977_v53 = vld [vmem:[#allocation8 + $0x20] sm:$0xff] }
 0x146   : > { %v1339_v56 = vsel %vm1317_vm1, %v1294_v7, %v1295_v63  ;;  %v1436_v12 = vsel %vm1414_vm3, %v1391_v47, %v1392_v48  ;;  %5282 = vpow2.f32 %v540_v32  ;;  %1544 = vst [vmem:[#allocation2 + $0x144] sm:$0xf] %v1512_v58  ;;  %v607_v60 = vadd.f32 1.0, %v5279_v45  ;;  %v476_v51 = vpop.f32.mrf.mxu2 }
 0x147   : > { %v1360_v10 = vmul.f32 %v6331_v13, %v1339_v56  ;;  %v1456_v22 = vmul.f32 %v6341_v44, %v1436_v12  ;;  %1608 = vst [vmem:[#allocation2 + $0x148] sm:$0xf] %v1576_v57  ;;  %5284 = vrcp.f32 %v591_v25  ;;  %v797_v47 = vand.u32 15, %v689_v21  ;;  %v4940_v44 = vld [vmem:[#allocation2 + $0x7c] sm:$0xf]  ;;  %2674 = vmatpush.bf16.msrb.mxu0 %v4977_v53 }
 0x148   : > { %1671 = vst [vmem:[#allocation2 + $0x140] sm:$0xf] %v1639_v43  ;;  %5286 = vrcp.f32 %v607_v60  ;;  %v4279_v17 = vld [vmem:[#allocation2 + $0x84] sm:$0xf0]  ;;  %vm6423_vm7 = vcmp.ne.s32.totalorder %v895_v30, 0  ;;  %vm6427_vm8 = vcmp.ne.s32.totalorder %v790_v46, 15  ;;  %v6432_v27 = vadd.f32 %v6386_v23, %v436_v49  ;;  %v439_v43 = vpop.f32.mrf.mxu0 }
 0x149   : > { %v1497_v39 = vpack.c.bf16 %v1360_v10, %v1360_v10  ;;  %v1624_v13 = vpack.c.bf16 %v1456_v22, %v1456_v22  ;;  %1593 = vst [vmem:[#allocation2 + $0x94] sm:$0xf] %v1561_v26  ;;  %v572_v40 = vmul.f32 1.442695, %v512_v8  ;;  %vm6434_vm9 = vcmp.ne.s32.totalorder %v797_v47, 0  ;;  %v5007_v30 = vld [vmem:[#allocation8 + $0xf8] sm:$0xff] }
 0x14a   : > { %v6438_v19 = vor.u32 %v4940_v44, %v4279_v17  ;;  %v4223_v14 = vsel %vm6416_vm6, 1.0, %v5648_v50  ;;  %v497_v57 = vsub.f32 0.0, %v6432_v27  ;;  %v4208_v11 = vsel %vm6423_vm7, 1.0, %v5648_v50  ;;  %5105 = vmatpush.bf16.msra.mxu3 %v5007_v30  ;;  %v5006_v26 = vld [vmem:[#allocation8 + $0xf0] sm:$0xff]  ;;  %2244 = vmatpush.bf16.msra.mxu1 %v5007_v30  ;;  %v4976_v46 = vld [vmem:[#allocation8 + $0x18] sm:$0xff] }
 0x14b   : > { %v5281_v55 = vpop.eup %5280  ;;  %1529 = vst [vmem:[#allocation2 + $0x90] sm:$0xf] %v1497_v39  ;;  %5288 = vpow2.f32 %v572_v40  ;;  %v6451_v21 = vsel %vm6427_vm8, 1.0, %v5648_v50  ;;  %v6460_v58 = vsel %vm6434_vm9, 1.0, %v5648_v50  ;;  %v6466_v12 = vadd.s32 224, %v5840_v15  ;;  %2675 = vmatpush.bf16.msrb.mxu0 %v4976_v46  ;;  %v4974_v46 = vld [vmem:[#allocation8 + $0x8] sm:$0xff] }
 0x14c   : > { %v5283_v62 = vpop.eup %5282  ;;  %1656 = vst [vmem:[#allocation2 + $0x8c] sm:$0xf] %v1624_v13  ;;  %v670_v61 = vmul.f32 %v5281_v55, %v6275_v20  ;;  %v6454_v20 = vadd.s32 216, %v5840_v15  ;;  %2361 = vmatmul.bf16.gmra.mxu2 %v6438_v19  ;;  %v6469_v25 = vadd.f32 %v6386_v23, %v476_v51  ;;  %v542_v60 = vmul.f32 1.442695, %v497_v57  ;;  %v5005_v13 = vld [vmem:[#allocation8 + $0xe8] sm:$0xff] }
 0x14d   : > { %v592_v32 = vadd.f32 1.0, %v5283_v62  ;;  %v5285_v52 = vpop.eup %5284 }
 0x14e   : > { %v1311_v2 = vrot.slane %v670_v61, 7  ;;  %v1408_v49 = vrot.slane %v670_v61, 1  ;;  %v1577_v1 = vpack.c.bf16 %v670_v61, %v670_v61  ;;  %v5287_v45 = vpop.eup %5286  ;;  %v6463_v56 = vmul.f32 %v5285_v52, %v6321_v35  ;;  %5106 = vmatpush.bf16.msra.mxu3 %v5006_v26  ;;  %2245 = vmatpush.bf16.msra.mxu1 %v5006_v26  ;;  %v479_v30 = vpop.f32.mrf.mxu2 }
 0x14f   : > { %5290 = vrcp.f32 %v592_v32  ;;  %v6480_v35 = vmul.f32 %v5287_v45, %v6335_v38  ;;  %v6489_v38 = vadd.f32 %v6386_v23, %v439_v43  ;;  %v513_v53 = vsub.f32 0.0, %v6469_v25  ;;  %v5004_v32 = vld [vmem:[#allocation8 + $0xe0] sm:$0xff] }
 0x150   : > { %v1323_v10 = vsel %vm1317_vm1, %v1310_v24, %v1311_v2  ;;  %v1420_v22 = vsel %vm1414_vm3, %v1407_v31, %v1408_v49  ;;  %1609 = vst [vmem:[#allocation2 + $0x154] sm:$0xf] %v1577_v1  ;;  %v1296_v8 = vrot.slane %v6463_v56, 7  ;;  %v1393_v9 = vrot.slane %v6463_v56, 1  ;;  %v441_v26 = vpop.f32.mrf.mxu0 }
 0x151   : > { %v1376_v7 = vmul.f32 %v4208_v11, %v1323_v10  ;;  %v1472_v47 = vmul.f32 %v4223_v14, %v1420_v22  ;;  %v5289_v39 = vpop.eup %5288  ;;  %v1562_v0 = vpack.c.bf16 %v6463_v56, %v6463_v56  ;;  %v1312_v24 = vrot.slane %v6480_v35, 7 }
 0x152   : > { %v1409_v31 = vrot.slane %v6480_v35, 1  ;;  %v1338_v16 = vsel %vm1317_vm1, %v1295_v63, %v1296_v8  ;;  %v1435_v41 = vsel %vm1414_vm3, %v1392_v48, %v1393_v9  ;;  %v4975_v63 = vld [vmem:[#allocation8 + $0x10] sm:$0xff]  ;;  %v608_v61 = vadd.f32 1.0, %v5289_v39  ;;  %5107 = vmatpush.bf16.msra.mxu3 %v5005_v13  ;;  %2246 = vmatpush.bf16.msra.mxu1 %v5005_v13 }
 0x153   : > { %v1513_v44 = vpack.c.bf16 %v1376_v7, %v1376_v7  ;;  %v1640_v17 = vpack.c.bf16 %v1472_v47, %v1472_v47  ;;  %v1498_v40 = vpack.c.bf16 %v1338_v16, %v1338_v16  ;;  %1594 = vst [vmem:[#allocation2 + $0xa0] sm:$0xf] %v1562_v0  ;;  %v1625_v51 = vpack.c.bf16 %v1435_v41, %v1435_v41  ;;  %v5003_v7 = vld [vmem:[#allocation8 + $0xd8] sm:$0xff] }
 0x154   : > { %v1322_v55 = vsel %vm1317_vm1, %v1311_v2, %v1312_v24  ;;  %v1419_v42 = vsel %vm1414_vm3, %v1408_v49, %v1409_v31  ;;  %v902_v48 = vand.u32 15, %v6454_v20  ;;  %5292 = vpow2.f32 %v542_v60  ;;  %2676 = vmatpush.bf16.msrb.mxu0 %v4975_v63 }
 0x155   : > { %v5291_v62 = vpop.eup %5290  ;;  %1545 = vst [vmem:[#allocation2 + $0x150] sm:$0xf] %v1513_v44  ;;  %v1514_v33 = vpack.c.bf16 %v1322_v55, %v1322_v55  ;;  %v1578_v14 = vpack.c.bf16 %v6480_v35, %v6480_v35  ;;  %v498_v11 = vsub.f32 0.0, %v6489_v38  ;;  %v1641_v52 = vpack.c.bf16 %v1419_v42, %v1419_v42  ;;  %v5002_v42 = vld [vmem:[#allocation8 + $0xd0] sm:$0xff] }
 0x156   : > { %1672 = vst [vmem:[#allocation2 + $0x14c] sm:$0xf] %v1640_v17  ;;  %v6511_v57 = vmul.f32 %v5291_v62, %v6349_v59  ;;  %5294 = vrcp.f32 %v608_v61  ;;  %v909_v20 = vand.u32 15, %v6466_v12  ;;  %v6517_v2 = vadd.f32 %v6386_v23, %v479_v30  ;;  %5108 = vmatpush.bf16.msra.mxu3 %v5004_v32  ;;  %2247 = vmatpush.bf16.msra.mxu1 %v5004_v32 }
 0x157   : > { %1530 = vst [vmem:[#allocation2 + $0x9c] sm:$0xf] %v1498_v40  ;;  %v574_v43 = vmul.f32 1.442695, %v513_v53  ;;  %vm6523_vm10 = vcmp.ne.s32.totalorder %v902_v48, 15  ;;  %v691_v12 = vadd.s32 112, %v5840_v15 }
 0x158   : > { %1657 = vst [vmem:[#allocation2 + $0x98] sm:$0xf] %v1625_v51  ;;  %v1297_v49 = vrot.slane %v6511_v57, 7  ;;  %v1394_v59 = vrot.slane %v6511_v57, 1  ;;  %v1563_v1 = vpack.c.bf16 %v6511_v57, %v6511_v57  ;;  %v544_v56 = vmul.f32 1.442695, %v498_v11  ;;  %2677 = vmatpush.bf16.msrb.mxu0 %v4974_v46 }
 0x159   : > { %1546 = vst [vmem:[#allocation2 + $0x15c] sm:$0xf] %v1514_v33  ;;  %5296 = vpow2.f32 %v574_v43  ;;  %v514_v60 = vsub.f32 0.0, %v6517_v2  ;;  %vm6542_vm11 = vcmp.ne.s32.totalorder %v909_v20, 0  ;;  %v690_v41 = vadd.s32 104, %v5840_v15 }
 0x15a   : > { %1610 = vst [vmem:[#allocation2 + $0x160] sm:$0xf] %v1578_v14  ;;  %v1337_v10 = vsel %vm1317_vm1, %v1296_v8, %v1297_v49  ;;  %v1434_v22 = vsel %vm1414_vm3, %v1393_v9, %v1394_v59  ;;  %v5293_v47 = vpop.eup %5292  ;;  %5298 = vpow2.f32 %v544_v56  ;;  %v6540_v8 = vadd.f32 %v6386_v23, %v441_v26  ;;  %5109 = vmatpush.bf16.msra.mxu3 %v5003_v7  ;;  %v4291_v20 = vld [vmem:[#allocation2 + $0x9c] sm:$0xf0] }
 0x15b   : > { %1673 = vst [vmem:[#allocation2 + $0x158] sm:$0xf] %v1641_v52  ;;  %v1362_v39 = vmul.f32 %v6460_v58, %v1337_v10  ;;  %v1458_v0 = vmul.f32 %v6451_v21, %v1434_v22  ;;  %v593_v9 = vadd.f32 1.0, %v5293_v47  ;;  %v576_v40 = vmul.f32 1.442695, %v514_v60  ;;  %v4973_v58 = vld [vmem:[#allocation8] sm:$0xff]  ;;  %2248 = vmatpush.bf16.msra.mxu1 %v5003_v7 }
 0x15c   : > { %1595 = vst [vmem:[#allocation2 + $0xac] sm:$0xf] %v1563_v1  ;;  %v5295_v44 = vpop.eup %5294  ;;  %v4224_v51 = vsel %vm6523_vm10, 1.0, %v5648_v50  ;;  %v811_v55 = vand.u32 15, %v691_v12  ;;  %v4209_v30 = vsel %vm6542_vm11, 1.0, %v5648_v50  ;;  %v706_v63 = vadd.s32 232, %v5840_v15  ;;  %2678 = vmatpush.bf16.msrb.mxu0 %v4973_v58  ;;  %v481_v1 = vpop.f32.mrf.mxu2 }
 0x15d   : > { %v1499_v17 = vpack.c.bf16 %v1362_v39, %v1362_v39  ;;  %v1626_v16 = vpack.c.bf16 %v1458_v0, %v1458_v0  ;;  %v6548_v21 = vmul.f32 %v5295_v44, %v6389_v37  ;;  %5300 = vrcp.f32 %v593_v9  ;;  %v5001_v12 = vld [vmem:[#allocation8 + $0xc8] sm:$0xff] }
 0x15e   : > { %5302 = vpow2.f32 %v576_v40  ;;  %v499_v62 = vsub.f32 0.0, %v6540_v8  ;;  %v707_v14 = vadd.s32 240, %v5840_v15  ;;  %v804_v32 = vand.u32 15, %v690_v41  ;;  %5110 = vmatpush.bf16.msra.mxu3 %v5002_v42 }
 0x15f   : > { %1531 = vst [vmem:[#allocation2 + $0xa8] sm:$0xf] %v1499_v17  ;;  %v5297_v37 = vpop.eup %5296  ;;  %v1313_v33 = vrot.slane %v6548_v21, 7  ;;  %v1410_v61 = vrot.slane %v6548_v21, 1  ;;  %v1579_v48 = vpack.c.bf16 %v6548_v21, %v6548_v21  ;;  %vm6575_vm12 = vcmp.ne.s32.totalorder %v811_v55, 0  ;;  %2249 = vmatpush.bf16.msra.mxu1 %v5002_v42 }
 0x160   : > { %1658 = vst [vmem:[#allocation2 + $0xa4] sm:$0xf] %v1626_v16  ;;  %v5299_v53 = vpop.eup %5298  ;;  %v609_v11 = vadd.f32 1.0, %v5297_v37  ;;  %v546_v52 = vmul.f32 1.442695, %v499_v62  ;;  %v916_v60 = vand.u32 15, %v706_v63 }
 0x161   : > { %v1321_v43 = vsel %vm1317_vm1, %v1312_v24, %v1313_v33  ;;  %v1418_v26 = vsel %vm1414_vm3, %v1409_v31, %v1410_v61  ;;  %1611 = vst [vmem:[#allocation2 + $0x16c] sm:$0xf] %v1579_v48  ;;  %v594_v45 = vadd.f32 1.0, %v5299_v53  ;;  %v4943_v24 = vld [vmem:[#allocation2 + $0x94] sm:$0xf]  ;;  %v923_v7 = vand.u32 15, %v707_v14 }
 0x162   : > { %v1378_v10 = vmul.f32 %v4209_v30, %v1321_v43  ;;  %v1474_v22 = vmul.f32 %v4224_v51, %v1418_v26  ;;  %5304 = vrcp.f32 %v609_v11  ;;  %v6579_v35 = vor.u32 %v4943_v24, %v4291_v20  ;;  %5111 = vmatpush.bf16.msra.mxu3 %v5001_v12  ;;  %v5000_v16 = vld [vmem:[#allocation8 + $0xc0] sm:$0xff]  ;;  %v5023_v48 = vld [vmem:[#allocation8 + $0x178] sm:$0xff] }
 0x163   : > { %v5301_v46 = vpop.eup %5300  ;;  %5306 = vrcp.f32 %v594_v45  ;;  %v6582_v31 = vadd.f32 %v6386_v23, %v481_v1  ;;  %v6590_v9 = vsel %vm6575_vm12, 1.0, %v5648_v50  ;;  %vm6592_vm13 = vcmp.ne.s32.totalorder %v804_v32, 15  ;;  %2250 = vmatpush.bf16.msra.mxu1 %v5001_v12 }
 0x164   : > { %v5303_v47 = vpop.eup %5302  ;;  %v1515_v39 = vpack.c.bf16 %v1378_v10, %v1378_v10  ;;  %v1642_v0 = vpack.c.bf16 %v1474_v22, %v1474_v22  ;;  %v6585_v13 = vmul.f32 %v5301_v46, %v6432_v27  ;;  %5308 = vpow2.f32 %v546_v52  ;;  %2366 = vmatmul.bf16.gmra.mxu2 %v6579_v35 }
 0x165   : > { %v610_v17 = vadd.f32 1.0, %v5303_v47  ;;  %v515_v23 = vsub.f32 0.0, %v6582_v31  ;;  %v6603_v58 = vadd.s32 120, %v5840_v15  ;;  %vm6605_vm14 = vcmp.ne.s32.totalorder %v923_v7, 0  ;;  %v4988_v7 = vld [vmem:[#allocation8 + $0x78] sm:$0xff] }
 0x166   : > { %1547 = vst [vmem:[#allocation2 + $0x168] sm:$0xf] %v1515_v39  ;;  %v1298_v27 = vrot.slane %v6585_v13, 7  ;;  %v1395_v41 = vrot.slane %v6585_v13, 1  ;;  %v1564_v40 = vpack.c.bf16 %v6585_v13, %v6585_v13  ;;  %vm6609_vm15 = vcmp.ne.s32.totalorder %v916_v60, 15  ;;  %5112 = vmatpush.bf16.msra.mxu3 %v5000_v16 }
 0x167   : > { %1674 = vst [vmem:[#allocation2 + $0x164] sm:$0xf] %v1642_v0  ;;  %5310 = vrcp.f32 %v610_v17  ;;  %v578_v42 = vmul.f32 1.442695, %v515_v23  ;;  %v693_v37 = vadd.s32 128, %v5840_v15  ;;  %v5649_v52 = vmov 0   ;;  %2251 = vmatpush.bf16.msra.mxu1 %v5000_v16 }
 0x168   : > { %v5305_v30 = vpop.eup %5304  ;;  %v1336_v63 = vsel %vm1317_vm1, %v1297_v49, %v1298_v27  ;;  %v1433_v62 = vsel %vm1414_vm3, %v1394_v59, %v1395_v41  ;;  %1596 = vst [vmem:[#allocation2 + $0xb8] sm:$0xf] %v1564_v40  ;;  %v4217_v59 = vsel %vm6592_vm13, 1.0, %v5648_v50  ;;  %v4210_v20 = vsel %vm6605_vm14, 1.0, %v5648_v50 }
 0x169   : > { %v5307_v14 = vpop.eup %5306  ;;  %v1500_v53 = vpack.c.bf16 %v1336_v63, %v1336_v63  ;;  %v1627_v11 = vpack.c.bf16 %v1433_v62, %v1433_v62  ;;  %v6623_v32 = vmul.f32 %v5305_v30, %v6469_v25  ;;  %5312 = vpow2.f32 %v578_v42  ;;  %1479 = vst [vmem:[#allocation2] sm:$0xff] %v5649_v52 }
 0x16a   : > { %v5309_v57 = vpop.eup %5308  ;;  %v6627_v49 = vmul.f32 %v5307_v14, %v6489_v38  ;;  %v4225_v25 = vsel %vm6609_vm15, 1.0, %v5648_v50  ;;  %1481 = vst [vmem:[#allocation2 + $0xc] sm:$0xff] %v5649_v52  ;;  %2422 = vmatpush.bf16.msrb.mxu3 %v5023_v48  ;;  %v825_v10 = vand.u32 15, %v693_v37  ;;  %v818_v46 = vand.u32 15, %v6603_v58 }
 0x16b   : > { %1532 = vst [vmem:[#allocation2 + $0xb4] sm:$0xf] %v1500_v53  ;;  %v1314_v1 = vrot.slane %v6623_v32, 7  ;;  %v1411_v38 = vrot.slane %v6623_v32, 1  ;;  %v1580_v43 = vpack.c.bf16 %v6623_v32, %v6623_v32  ;;  %v595_v26 = vadd.f32 1.0, %v5309_v57  ;;  %2760 = vmatpush.bf16.msrb.mxu1 %v4988_v7 }
 0x16c   : > { %1659 = vst [vmem:[#allocation2 + $0xb0] sm:$0xf] %v1627_v11  ;;  %v1299_v45 = vrot.slane %v6627_v49, 7  ;;  %v1396_v56 = vrot.slane %v6627_v49, 1  ;;  %v1565_v12 = vpack.c.bf16 %v6627_v49, %v6627_v49  ;;  %v708_v23 = vadd.s32 248, %v5840_v15 }
 0x16d   : > { %v5311_v22 = vpop.eup %5310  ;;  %v1320_v60 = vsel %vm1317_vm1, %v1313_v33, %v1314_v1  ;;  %v1417_v24 = vsel %vm1414_vm3, %v1410_v61, %v1411_v38  ;;  %1612 = vst [vmem:[#allocation2 + $0x178] sm:$0xf] %v1580_v43  ;;  %5314 = vrcp.f32 %v595_v26  ;;  %v4946_v33 = vld [vmem:[#allocation2 + $0xac] sm:$0xf]  ;;  %vm6670_vm0 = vcmp.ne.s32.totalorder %v825_v10, 0 }
 0x16e   : > { %v1516_v47 = vpack.c.bf16 %v1320_v60, %v1320_v60  ;;  %v1643_v39 = vpack.c.bf16 %v1417_v24, %v1417_v24  ;;  %v1335_v0 = vsel %vm1317_vm1, %v1298_v27, %v1299_v45  ;;  %v1432_v21 = vsel %vm1414_vm3, %v1395_v41, %v1396_v56  ;;  %1597 = vst [vmem:[#allocation2 + $0xc4] sm:$0xf] %v1565_v12 }
 0x16f   : > { %v5313_v61 = vpop.eup %5312  ;;  %v1364_v13 = vmul.f32 %v6590_v9, %v1335_v0  ;;  %v1460_v44 = vmul.f32 %v4217_v59, %v1432_v21  ;;  %v6666_v17 = vmul.f32 %v5311_v22, %v6517_v2  ;;  %v4303_v16 = vld [vmem:[#allocation2 + $0xb4] sm:$0xf0]  ;;  %1480 = vst [vmem:[#allocation2 + $0x8] sm:$0xf] %v5649_v52  ;;  %vm6680_vm2 = vcmp.ne.s32.totalorder %v818_v46, 15  ;;  %v5022_v22 = vld [vmem:[#allocation8 + $0x170] sm:$0xff] }
 0x170   : > { %1548 = vst [vmem:[#allocation2 + $0x174] sm:$0xf] %v1516_v47  ;;  %v611_v41 = vadd.f32 1.0, %v5313_v61  ;;  %v6674_v40 = vor.u32 %v4946_v33, %v4303_v16  ;;  %v4517_v58 = vld [vmem:[#allocation2] sm:$0xf]  ;;  %v713_v53 = vand.u32 15, %v5840_v15  ;;  %2423 = vmatpush.bf16.msrb.mxu3 %v5022_v22 }
 0x171   : > { %1675 = vst [vmem:[#allocation2 + $0x170] sm:$0xf] %v1643_v39  ;;  %v1501_v9 = vpack.c.bf16 %v1364_v13, %v1364_v13  ;;  %v1628_v51 = vpack.c.bf16 %v1460_v44, %v1460_v44  ;;  %v1315_v2 = vrot.slane %v6666_v17, 7  ;;  %v1412_v55 = vrot.slane %v6666_v17, 1  ;;  %v4926_v42 = vld [vmem:[#allocation2 + $0x8] sm:$0xf0] }
 0x172   : > { %v1581_v30 = vpack.c.bf16 %v6666_v17, %v6666_v17  ;;  %5316 = vrcp.f32 %v611_v41  ;;  %v4518_v62 = vor.u32 %v4926_v42, %v4517_v58  ;;  %1482 = vst [vmem:[#allocation2 + $0x14] sm:$0xf] %v5649_v52  ;;  %v930_v11 = vand.u32 15, %v708_v23  ;;  %v4987_v44 = vld [vmem:[#allocation8 + $0x70] sm:$0xff] }
 0x173   : > { %v5315_v37 = vpop.eup %5314  ;;  %1533 = vst [vmem:[#allocation2 + $0xc0] sm:$0xf] %v1501_v9  ;;  %v1319_v48 = vsel %vm1317_vm1, %v1314_v1, %v1315_v2  ;;  %v1416_v14 = vsel %vm1414_vm3, %v1411_v38, %v1412_v55  ;;  %v4203_v43 = vsel %vm6670_vm0, 1.0, %v5648_v50  ;;  %v4218_v1 = vsel %vm6680_vm2, 1.0, %v5648_v50  ;;  %2761 = vmatpush.bf16.msrb.mxu1 %v4987_v44  ;;  %v4938_v44 = vld [vmem:[#allocation2 + $0x68] sm:$0xf0] }
 0x174   : > { %1660 = vst [vmem:[#allocation2 + $0xbc] sm:$0xf] %v1628_v51  ;;  %v1380_v32 = vmul.f32 %v4210_v20, %v1319_v48  ;;  %v1476_v57 = vmul.f32 %v4225_v25, %v1416_v14  ;;  %v659_v59 = vmul.f32 %v5315_v37, %v6540_v8  ;;  %2679 = vmatmul.bf16.vlgmr.msrb.gmra.mxu0 %v4518_v62  ;;  %vm6699_vm4 = vcmp.ne.s32.totalorder %v713_v53, 0  ;;  %v4929_v62 = vld [vmem:[#allocation2 + $0x20] sm:$0xf0]  ;;  %v4986_v48 = vld [vmem:[#allocation8 + $0x68] sm:$0xff] }
 0x175   : > { %1613 = vst [vmem:[#allocation2 + $0x184] sm:$0xf] %v1581_v30  ;;  %2371 = vmatmul.bf16.gmra.mxu2 %v6674_v40  ;;  %vm6703_vm5 = vcmp.ne.s32.totalorder %v930_v11, 15  ;;  %v5021_v30 = vld [vmem:[#allocation8 + $0x168] sm:$0xff]  ;;  %v4955_v8 = vld [vmem:[#allocation2 + $0xf4] sm:$0xf] }
 0x176   : > { %v1517_v38 = vpack.c.bf16 %v1380_v32, %v1380_v32  ;;  %v1644_v26 = vpack.c.bf16 %v1476_v57, %v1476_v57  ;;  %v1300_v12 = vrot.slane %v659_v59, 7  ;;  %v1397_v10 = vrot.slane %v659_v59, 1  ;;  %1483 = vst [vmem:[#allocation2 + $0x198] sm:$0xff] %v5649_v52  ;;  %2424 = vmatpush.bf16.msrb.mxu3 %v5021_v30  ;;  %v4952_v53 = vld [vmem:[#allocation2 + $0xdc] sm:$0xf] }
 0x177   : > { %v1566_v20 = vpack.c.bf16 %v659_v59, %v659_v59  ;;  %1484 = vst [vmem:[#allocation2 + $0x1a0] sm:$0xf] %v5649_v52  ;;  %v4226_v49 = vsel %vm6703_vm5, 1.0, %v5648_v50  ;;  %2762 = vmatpush.bf16.msrb.mxu1 %v4986_v48  ;;  %v4956_v11 = vld [vmem:[#allocation2 + $0xf8] sm:$0xf0] }
 0x178   : > { %v5317_v60 = vpop.eup %5316  ;;  %1549 = vst [vmem:[#allocation2 + $0x180] sm:$0xf] %v1517_v38  ;;  %v1333_v24 = vsel %vm1317_vm1, %v1300_v12, %v1301_v28  ;;  %v1334_v46 = vsel %vm1317_vm1, %v1299_v45, %v1300_v12  ;;  %v1430_v7 = vsel %vm1414_vm3, %v1397_v10, %v1398_v29  ;;  %v1431_v47 = vsel %vm1414_vm3, %v1396_v56, %v1397_v10  ;;  %v4337_v57 = vld [vmem:[#allocation2 + $0xf0] sm:$0xf]  ;;  %v4959_v25 = vld [vmem:[#allocation2 + $0x110] sm:$0xf0] }
 0x179   : > { %1676 = vst [vmem:[#allocation2 + $0x17c] sm:$0xf] %v1644_v26  ;;  %v1366_v39 = vmul.f32 %v4203_v43, %v1333_v24  ;;  %v1462_v0 = vmul.f32 %v4218_v1, %v1430_v7  ;;  %v1502_v21 = vpack.c.bf16 %v1334_v46, %v1334_v46  ;;  %v1629_v28 = vpack.c.bf16 %v1431_v47, %v1431_v47  ;;  %v5020_v43 = vld [vmem:[#allocation8 + $0x160] sm:$0xff]  ;;  %v4932_v1 = vld [vmem:[#allocation2 + $0x38] sm:$0xf0]  ;;  %v5019_v7 = vld [vmem:[#allocation8 + $0x158] sm:$0xff] }
 0x17a   : > { %1598 = vst [vmem:[#allocation2 + $0xd0] sm:$0xf] %v1566_v20  ;;  %v675_v33 = vmul.f32 %v5317_v60, %v6582_v31  ;;  %v4195_v29 = vsel %vm6699_vm4, 1.0, %v5648_v50  ;;  %v6758_v59 = vor.u32 %v4956_v11, %v4337_v57  ;;  %2425 = vmatpush.bf16.msrb.mxu3 %v5020_v43  ;;  %v4241_v26 = vld [vmem:[#allocation2 + $0x30] sm:$0xf]  ;;  %v4996_v43 = vld [vmem:[#allocation8 + $0xb8] sm:$0xff] }
 0x17b   : > { %v1503_v45 = vpack.c.bf16 %v1366_v39, %v1366_v39  ;;  %1534 = vst [vmem:[#allocation2 + $0xcc] sm:$0xf] %v1502_v21  ;;  %v1630_v54 = vpack.c.bf16 %v1462_v0, %v1462_v0  ;;  %v4242_v12 = vor.u32 %v4932_v1, %v4241_v26  ;;  %v4985_v10 = vld [vmem:[#allocation8 + $0x60] sm:$0xff]  ;;  %v4339_v20 = vld [vmem:[#allocation2 + $0xfc] sm:$0xf0]  ;;  %2849 = vmatpush.bf16.msra.mxu2 %v4996_v43 }
 0x17c   : > { %1661 = vst [vmem:[#allocation2 + $0xc8] sm:$0xf] %v1629_v28  ;;  %v1316_v56 = vrot.slane %v675_v33, 7  ;;  %v1413_v61 = vrot.slane %v675_v33, 1  ;;  %v1582_v13 = vpack.c.bf16 %v675_v33, %v675_v33  ;;  %2763 = vmatpush.bf16.msrb.mxu1 %v4985_v10  ;;  %v6765_v60 = vor.u32 %v4955_v8, %v4339_v20  ;;  %v4349_v24 = vld [vmem:[#allocation2 + $0x108] sm:$0xf] }
 0x17d   : > { %1535 = vst [vmem:[#allocation2 + $0xd8] sm:$0xf] %v1503_v45  ;;  %v6768_v46 = vor.u32 %v4959_v25, %v4349_v24  ;;  %v4935_v47 = vld [vmem:[#allocation2 + $0x50] sm:$0xf0]  ;;  %v4253_v39 = vld [vmem:[#allocation2 + $0x48] sm:$0xf] }
 0x17e   : > { %1662 = vst [vmem:[#allocation2 + $0xd4] sm:$0xf] %v1630_v54  ;;  %v1318_v31 = vsel %vm1317_vm1, %v1315_v2, %v1316_v56  ;;  %v1349_v17 = vsel %vm1317_vm1, %v1316_v56, %v1285_v3  ;;  %v1415_v23 = vsel %vm1414_vm3, %v1412_v55, %v1413_v61  ;;  %v1446_v50 = vsel %vm1414_vm3, %v1413_v61, %v1382_v4  ;;  %v4949_v3 = vld [vmem:[#allocation2 + $0xc4] sm:$0xf]  ;;  %v4984_v28 = vld [vmem:[#allocation8 + $0x58] sm:$0xff]  ;;  %v5016_v26 = vld [vmem:[#allocation8 + $0x140] sm:$0xff] }
 0x17f   : > { %v1350_v16 = vmul.f32 %v4195_v29, %v1349_v17  ;;  %v1478_v27 = vmul.f32 %v4226_v49, %v1446_v50  ;;  %v1518_v41 = vpack.c.bf16 %v1318_v31, %v1318_v31  ;;  %1614 = vst [vmem:[#allocation2 + $0x190] sm:$0xf] %v1582_v13  ;;  %v1645_v58 = vpack.c.bf16 %v1415_v23, %v1415_v23  ;;  %v4351_v33 = vld [vmem:[#allocation2 + $0x114] sm:$0xf0]  ;;  %v4958_v45 = vld [vmem:[#allocation2 + $0x10c] sm:$0xf] }
 0x180   : > { %1485 = vst [vmem:[#allocation2 + $0x1a4] sm:$0xff] %v5649_v52  ;;  %2426 = vmatpush.bf16.msrb.mxu3 %v5019_v7  ;;  %v4254_v0 = vor.u32 %v4935_v47, %v4253_v39  ;;  %2764 = vmatpush.bf16.msrb.mxu1 %v4984_v28  ;;  %v4962_v54 = vld [vmem:[#allocation2 + $0x128] sm:$0xf0]  ;;  %v6773_v29 = vor.u32 %v4958_v45, %v4351_v33  ;;  %v4361_v49 = vld [vmem:[#allocation2 + $0x120] sm:$0xf]  ;;  %v4994_v8 = vld [vmem:[#allocation8 + $0xa8] sm:$0xff] }
 0x181   : > { %v1487_v9 = vpack.c.bf16 %v1350_v16, %v1350_v16  ;;  %1550 = vst [vmem:[#allocation2 + $0x18c] sm:$0xf] %v1518_v41  ;;  %v1646_v51 = vpack.c.bf16 %v1478_v27, %v1478_v27  ;;  %v4315_v2 = vld [vmem:[#allocation2 + $0xcc] sm:$0xf0]  ;;  %v6776_v56 = vor.u32 %v4962_v54, %v4361_v49  ;;  %v5018_v13 = vld [vmem:[#allocation8 + $0x150] sm:$0xff]  ;;  %v4992_v54 = vld [vmem:[#allocation8 + $0x98] sm:$0xff] }
 0x182   : > { %1677 = vst [vmem:[#allocation2 + $0x188] sm:$0xf] %v1645_v58  ;;  %v6744_v55 = vor.u32 %v4949_v3, %v4315_v2  ;;  %v4265_v31 = vld [vmem:[#allocation2 + $0x60] sm:$0xf]  ;;  %v4363_v50 = vld [vmem:[#allocation2 + $0x12c] sm:$0xf0] }
 0x183   : > { %1519 = vst [vmem:[#allocation2 + $0x18] sm:$0xf] %v1487_v9  ;;  %v6750_v42 = vpop.f32.mrf.mxu2  ;;  %v4266_v17 = vor.u32 %v4938_v44, %v4265_v31  ;;  %v4983_v23 = vld [vmem:[#allocation8 + $0x50] sm:$0xff]  ;;  %v4373_v9 = vld [vmem:[#allocation2 + $0x138] sm:$0xf]  ;;  %v4981_v7 = vld [vmem:[#allocation8 + $0x40] sm:$0xff] }
 0x184   : > { %1678 = vst [vmem:[#allocation2 + $0x194] sm:$0xf] %v1646_v51  ;;  %v4325_v15 = vld [vmem:[#allocation2 + $0xd8] sm:$0xf]  ;;  %2427 = vmatpush.bf16.msrb.mxu3 %v5018_v13  ;;  %2765 = vmatpush.bf16.msrb.mxu1 %v4983_v23  ;;  %v4961_v27 = vld [vmem:[#allocation2 + $0x124] sm:$0xf] }
 0x185   : > { %1486 = vst [vmem:[#allocation2 + $0x1ac] sm:$0xf] %v5649_v52  ;;  %2376 = vmatmul.bf16.gmra.mxu2 %v6744_v55  ;;  %v6748_v4 = vor.u32 %v4953_v36, %v4325_v15  ;;  %v4327_v52 = vld [vmem:[#allocation2 + $0xe4] sm:$0xf0]  ;;  %v4965_v41 = vld [vmem:[#allocation2 + $0x140] sm:$0xf0]  ;;  %v6783_v58 = vor.u32 %v4961_v27, %v4363_v50 }
 0x186   : > { %v6755_v32 = vor.u32 %v4952_v53, %v4327_v52  ;;  %v6786_v51 = vor.u32 %v4965_v41, %v4373_v9  ;;  %v4941_v3 = vld [vmem:[#allocation2 + $0x80] sm:$0xf0]  ;;  %v5017_v2 = vld [vmem:[#allocation8 + $0x148] sm:$0xff]  ;;  %v4385_v11 = vld [vmem:[#allocation2 + $0x150] sm:$0xf] }
 0x187   : > { %2292 = vmatmul.bf16.vlgmr.msra.gmra.mxu3 %v6748_v4  ;;  %v4277_v15 = vld [vmem:[#allocation2 + $0x78] sm:$0xf]  ;;  %v4968_v48 = vld [vmem:[#allocation2 + $0x158] sm:$0xf0]  ;;  %v4289_v10 = vld [vmem:[#allocation2 + $0x90] sm:$0xf] }
 0x188   : > { %2428 = vmatpush.bf16.msrb.mxu3 %v5017_v2  ;;  %v4278_v30 = vor.u32 %v4941_v3, %v4277_v15  ;;  %v6796_v57 = vor.u32 %v4968_v48, %v4385_v11  ;;  %v4944_v1 = vld [vmem:[#allocation2 + $0x98] sm:$0xf0]  ;;  %v4387_v24 = vld [vmem:[#allocation2 + $0x15c] sm:$0xf0]  ;;  %v4993_v47 = vld [vmem:[#allocation8 + $0xa0] sm:$0xff] }
 0x189   : > { %v4290_v20 = vor.u32 %v4944_v1, %v4289_v10  ;;  %v4967_v39 = vld [vmem:[#allocation2 + $0x154] sm:$0xf]  ;;  %v4397_v33 = vld [vmem:[#allocation2 + $0x168] sm:$0xf]  ;;  %v4991_v44 = vld [vmem:[#allocation8 + $0x90] sm:$0xff] }
 0x18a   : > { %v4229_v63 = vld [vmem:[#allocation2 + $0x18] sm:$0xf]  ;;  %v6801_v28 = vor.u32 %v4967_v39, %v4387_v24  ;;  %v4947_v13 = vld [vmem:[#allocation2 + $0xb0] sm:$0xf0]  ;;  %v5079_v31 = vld [vmem:[#allocation8 + $0x1b8] sm:$0xff] }
 0x18b   : > { %v4230_v37 = vor.u32 %v4929_v62, %v4229_v63  ;;  %v6753_v14 = vpop.f32.mrf.mxu2  ;;  %v4375_v63 = vld [vmem:[#allocation2 + $0x144] sm:$0xf0]  ;;  %v4982_v62 = vld [vmem:[#allocation8 + $0x48] sm:$0xff]  ;;  %v4989_v3 = vld [vmem:[#allocation8 + $0x80] sm:$0xff] }
 0x18c   : > { %2766 = vmatpush.bf16.msrb.mxu1 %v4982_v62  ;;  %2429 = vmatpush.bf16.msrb.mxu3 %v5016_v26  ;;  %7489 = vst [vmem:[#allocation13_spill] sm:$0xff] %v6801_v28  ;;  %v4990_v50 = vld [vmem:[#allocation8 + $0x88] sm:$0xff]  ;;  %v5087_v9 = vld [vmem:[#allocation8 + $0x1f8] sm:$0xff]  ;;  %v4409_v62 = vld [vmem:[#allocation2 + $0x180] sm:$0xf] }
 0x18d   : > { %2252 = vmatmul.bf16.vlgmr.msra.gmra.mxu1 %v4230_v37  ;;  %2684 = vmatmul.bf16.gmra.mxu0 %v4230_v37  ;;  %v4964_v37 = vld [vmem:[#allocation2 + $0x13c] sm:$0xf]  ;;  %v4399_v41 = vld [vmem:[#allocation2 + $0x174] sm:$0xf0]  ;;  %v5095_v2 = vld [vmem:[#allocation8 + $0x238] sm:$0xff] }
 0x18e   : > { %v6791_v52 = vor.u32 %v4964_v37, %v4375_v63  ;;  %v4970_v15 = vld [vmem:[#allocation2 + $0x16c] sm:$0xf]  ;;  %3540 = vmatpush.bf16.msra.mxu0 %v5087_v9  ;;  %v4313_v1 = vld [vmem:[#allocation2 + $0xc0] sm:$0xf]  ;;  %v4411_v10 = vld [vmem:[#allocation2 + $0x18c] sm:$0xf0] }
 0x18f   : > { %v6811_v63 = vor.u32 %v4970_v15, %v4399_v41  ;;  %v4950_v43 = vld [vmem:[#allocation2 + $0xc8] sm:$0xf0]  ;;  %v4927_v41 = vld [vmem:[#allocation2 + $0x10] sm:$0xf0]  ;;  %v5094_v15 = vld [vmem:[#allocation8 + $0x230] sm:$0xff] }
 0x190   : > { %2767 = vmatpush.bf16.msrb.mxu1 %v4981_v7  ;;  %3451 = vmatpush.bf16.msra.mxu3 %v5079_v31  ;;  %v4314_v26 = vor.u32 %v4950_v43, %v4313_v1  ;;  %v4930_v24 = vld [vmem:[#allocation2 + $0x28] sm:$0xf0]  ;;  %v4249_v1 = vld [vmem:[#allocation2 + $0x38] sm:$0xf] }
 0x191   : > { %7490 = vst [vmem:[#allocation14_spill] sm:$0xff] %v6811_v63 }
 0x194   : > { %3629 = vmatpush.bf16.msra.mxu1 %v5095_v2  ;;  %v5086_v2 = vld [vmem:[#allocation8 + $0x1f0] sm:$0xff] }
 0x195   : > { %2381 = vmatmul.bf16.gmra.mxu2 %v6755_v32  ;;  %3541 = vmatpush.bf16.msra.mxu0 %v5086_v2 }
 0x197   : > { %2297 = vmatmul.bf16.gmra.mxu3 %v6758_v59 }
 0x198   : > { %3630 = vmatpush.bf16.msra.mxu1 %v5094_v15  ;;  %v5077_v15 = vld [vmem:[#allocation8 + $0x1a8] sm:$0xff] }
 0x199   : > { %v6761_v38 = vpop.f32.mrf.mxu2 }
 0x19d   : > { %2257 = vmatmul.bf16.gmra.mxu1 %v4242_v12  ;;  %2689 = vmatmul.bf16.gmra.mxu0 %v4242_v12  ;;  %v4995_v12 = vld [vmem:[#allocation8 + $0xb0] sm:$0xff] }
 0x19e   : > { %2850 = vmatpush.bf16.msra.mxu2 %v4995_v12 }
 0x1a1   : > { %v6763_v22 = vpop.f32.mrf.mxu2 }
 0x1a2   : > { %2851 = vmatpush.bf16.msra.mxu2 %v4994_v8  ;;  %v4997_v8 = vld [vmem:[#allocation2 + $0x184] sm:$0xf] }
 0x1a3   : > { %v4414_v7 = vor.u32 %v4997_v8, %v4411_v10 }
 0x1a5   : > { %2386 = vmatmul.bf16.gmra.mxu2 %v6765_v60 }
 0x1a6   : > { %2852 = vmatpush.bf16.msra.mxu2 %v4993_v47  ;;  %v4237_v47 = vld [vmem:[#allocation2 + $0x20] sm:$0xf] }
 0x1a7   : > { %2302 = vmatmul.bf16.gmra.mxu3 %v6768_v46  ;;  %v4238_v39 = vor.u32 %v4930_v24, %v4237_v47 }
 0x1aa   : > { %2853 = vmatpush.bf16.msra.mxu2 %v4992_v54 }
 0x1ab   : > { %v6771_v21 = vpop.f32.mrf.mxu2 }
 0x1ad   : > { %2262 = vmatmul.bf16.gmra.mxu1 %v4254_v0  ;;  %2694 = vmatmul.bf16.gmra.mxu0 %v4254_v0  ;;  %v4971_v0 = vld [vmem:[#allocation2 + $0x170] sm:$0xf0] }
 0x1ae   : > { %v6804_v45 = vor.u32 %v4971_v0, %v4397_v33  ;;  %2854 = vmatpush.bf16.msra.mxu2 %v4991_v44  ;;  %v4925_v0 = vld [vmem:[#allocation2 + $0x4] sm:$0xf]  ;;  %v4519_v33 = vld [vmem:[#allocation2 + $0xc] sm:$0xf0] }
 0x1af   : > { %v5078_v44 = vld [vmem:[#allocation8 + $0x1b0] sm:$0xff] }
 0x1b0   : > { %3452 = vmatpush.bf16.msra.mxu3 %v5078_v44  ;;  %v4936_v44 = vld [vmem:[#allocation2 + $0x58] sm:$0xf0] }
 0x1b2   : > { %2855 = vmatpush.bf16.msra.mxu2 %v4990_v50  ;;  %v4525_v50 = vld [vmem:[#allocation2 + $0x8] sm:$0xf] }
 0x1b3   : > { %v6778_v61 = vpop.f32.mrf.mxu2 }
 0x1b4   : > { %3453 = vmatpush.bf16.msra.mxu3 %v5077_v15 }
 0x1b5   : > { %2391 = vmatmul.bf16.gmra.mxu2 %v6773_v29 }
 0x1b6   : > { %2856 = vmatpush.bf16.msra.mxu2 %v4989_v3  ;;  %v4526_v3 = vor.u32 %v4927_v41, %v4525_v50 }
 0x1b7   : > { %2307 = vmatmul.bf16.gmra.mxu3 %v6776_v56 }
 0x1bc   : > { %v6781_v16 = vpop.f32.mrf.mxu2 }
 0x1bd   : > { %2267 = vmatmul.bf16.gmra.mxu1 %v4266_v17  ;;  %2699 = vmatmul.bf16.gmra.mxu0 %v4266_v17  ;;  %v4301_v17 = vld [vmem:[#allocation2 + $0xa8] sm:$0xf] }
 0x1be   : > { %v4302_v23 = vor.u32 %v4947_v13, %v4301_v17  ;;  %v4522_v13 = vor.u32 %v4925_v0, %v4519_v33 }
 0x1c4   : > { %v6789_v36 = vpop.f32.mrf.mxu2 }
 0x1c5   : > { %2396 = vmatmul.bf16.gmra.mxu2 %v6783_v58 }
 0x1c7   : > { %2312 = vmatmul.bf16.gmra.mxu3 %v6786_v51 }
 0x1cd   : > { %2272 = vmatmul.bf16.gmra.mxu1 %v4278_v30  ;;  %2704 = vmatmul.bf16.gmra.mxu0 %v4278_v30  ;;  %v4998_v30 = vld [vmem:[#allocation2 + $0x188] sm:$0xf0] }
 0x1ce   : > { %v4410_v37 = vor.u32 %v4998_v30, %v4409_v62 }
 0x1cf   : > { %v6793_v53 = vpop.f32.mrf.mxu2 }
 0x1d5   : > { %2401 = vmatmul.bf16.gmra.mxu2 %v6791_v52 }
 0x1d7   : > { %2317 = vmatmul.bf16.gmra.mxu3 %v6796_v57  ;;  %v6799_v25 = vpop.f32.mrf.mxu2 }
 0x1dd   : > { %2277 = vmatmul.bf16.gmra.mxu1 %v4290_v20  ;;  %2709 = vmatmul.bf16.gmra.mxu0 %v4290_v20 }
 0x1e5   : > { %2406 = vmatmul.bf16.gmra.mxu2 %v6801_v28  ;;  %v4333_v28 = vld [vmem:[#allocation2 + $0xe0] sm:$0xf] }
 0x1e7   : > { %2322 = vmatmul.bf16.gmra.mxu3 %v6804_v45  ;;  %v6807_v49 = vpop.f32.mrf.mxu2 }
 0x1ed   : > { %2282 = vmatmul.bf16.gmra.mxu1 %v4302_v23  ;;  %2714 = vmatmul.bf16.gmra.mxu0 %v4302_v23 }
 0x1ef   : > { %v6809_v27 = vpop.f32.mrf.mxu2 }
 0x1f1   : > { %v6814_v48 = vpop.f32.mrf.mxu0 }
 0x1f5   : > { %2411 = vmatmul.bf16.gmra.mxu2 %v6811_v63 }
 0x1f7   : > { %2327 = vmatmul.bf16.gmra.mxu3 %v4410_v37  ;;  %v4933_v37 = vld [vmem:[#allocation2 + $0x40] sm:$0xf0] }
 0x1f8   : > { %v6816_v11 = vpop.f32.mrf.mxu2 }
 0x1f9   : > { %v6820_v20 = vpop.f32.mrf.mxu0 }
 0x1fd   : > { %2287 = vmatmul.bf16.gmra.mxu1 %v4314_v26  ;;  %2719 = vmatmul.bf16.gmra.mxu0 %v4314_v26  ;;  %v4250_v26 = vor.u32 %v4933_v37, %v4249_v1 }
 0x200   : > { %v6818_v12 = vpop.f32.mrf.mxu2 }
 0x201   : > { %7491 = vst [vmem:[#allocation15_spill] sm:$0xff] %v6818_v12 }
 0x205   : > { %2416 = vmatmul.bf16.gmra.mxu2 %v4414_v7 }
 0x207   : > { %2430 = vmatmul.bf16.vlgmr.msrb.gmra.mxu3 %v4238_v39 }
 0x208   : > { %v6822_v54 = vpop.f32.mrf.mxu2 }
 0x209   : > { %7492 = vst [vmem:[#allocation16_spill] sm:$0xff] %v6822_v54  ;;  %v5080_v54 = vld [vmem:[#allocation8 + $0x1c0] sm:$0xff] }
 0x20a   : > { %v6824_v31 = vpop.f32.mrf.mxu1  ;;  %v2293_v17 = vpop.f32.mrf.mxu3 }
 0x20b   : > { %v6826_v23 = vpop.f32.mrf.mxu0 }
 0x20d   : > { %2724 = vmatmul.bf16.gmra.mxu0 %v6748_v4  ;;  %2768 = vmatmul.bf16.vlgmr.msrb.gmra.mxu1 %v4522_v13 }
 0x210   : > { %v6829_v9 = vpop.f32.mrf.mxu2 }
 0x211   : > { %7493 = vst [vmem:[#allocation17_spill] sm:$0xff] %v6829_v9 }
 0x212   : > { %v6831_v30 = vpop.f32.mrf.mxu1  ;;  %v2295_v62 = vpop.f32.mrf.mxu3 }
 0x213   : > { %v6833_v43 = vpop.f32.mrf.mxu0 }
 0x215   : > { %2857 = vmatmul.bf16.vlgmr.msra.gmra.mxu2 %v4526_v3 }
 0x217   : > { %2435 = vmatmul.bf16.gmra.mxu3 %v4250_v26 }
 0x218   : > { %v2382_v4 = vpop.f32.mrf.mxu2 }
 0x219   : > { %v6835_v10 = vadd.f32 %v2382_v4, %v2293_v17  ;;  %v4261_v17 = vld [vmem:[#allocation2 + $0x50] sm:$0xf]  ;;  %v5093_v4 = vld [vmem:[#allocation8 + $0x228] sm:$0xff] }
 0x21a   : > { %v6837_v8 = vpop.f32.mrf.mxu1  ;;  %v2298_v24 = vpop.f32.mrf.mxu3  ;;  %v4262_v41 = vor.u32 %v4936_v44, %v4261_v17  ;;  %v4939_v44 = vld [vmem:[#allocation2 + $0x70] sm:$0xf0]  ;;  %3631 = vmatpush.bf16.msra.mxu1 %v5093_v4  ;;  %v4942_v4 = vld [vmem:[#allocation2 + $0x88] sm:$0xf0] }
 0x21b   : > { %7494 = vst [vmem:[#allocation18_spill] sm:$0xff] %v6835_v10  ;;  %v6839_v7 = vpop.f32.mrf.mxu0  ;;  %v5076_v10 = vld [vmem:[#allocation8 + $0x1a0] sm:$0xff] }
 0x21c   : > { %3454 = vmatpush.bf16.msra.mxu3 %v5076_v10  ;;  %v4297_v10 = vld [vmem:[#allocation2 + $0x98] sm:$0xf] }
 0x21d   : > { %2729 = vmatmul.bf16.gmra.mxu0 %v6758_v59  ;;  %2773 = vmatmul.bf16.gmra.mxu1 %v5997_v18 }
 0x220   : > { %v2384_v47 = vpop.f32.mrf.mxu2 }
 0x221   : > { %v6843_v0 = vadd.f32 %v2384_v47, %v2295_v62 }
 0x222   : > { %v6845_v33 = vpop.f32.mrf.mxu1  ;;  %v2300_v13 = vpop.f32.mrf.mxu3 }
 0x223   : > { %7495 = vst [vmem:[#allocation19_spill] sm:$0xff] %v6843_v0  ;;  %v6847_v50 = vpop.f32.mrf.mxu0 }
 0x225   : > { %2862 = vmatmul.bf16.gmra.mxu2 %v4238_v39  ;;  %v5085_v39 = vld [vmem:[#allocation8 + $0x1e8] sm:$0xff] }
 0x226   : > { %3542 = vmatpush.bf16.msra.mxu0 %v5085_v39 }
 0x227   : > { %2440 = vmatmul.bf16.gmra.mxu3 %v4262_v41 }
 0x228   : > { %v2387_v3 = vpop.f32.mrf.mxu2 }
 0x229   : > { %v6849_v2 = vadd.f32 %v2387_v3, %v2298_v24  ;;  %v4273_v3 = vld [vmem:[#allocation2 + $0x68] sm:$0xf] }
 0x22a   : > { %v6851_v59 = vpop.f32.mrf.mxu1  ;;  %v2303_v18 = vpop.f32.mrf.mxu3  ;;  %v4274_v15 = vor.u32 %v4939_v44, %v4273_v3  ;;  %v4285_v44 = vld [vmem:[#allocation2 + $0x80] sm:$0xf] }
 0x22b   : > { %7496 = vst [vmem:[#allocation20_spill] sm:$0xff] %v6849_v2  ;;  %v6853_v37 = vpop.f32.mrf.mxu0 }
 0x22d   : > { %2734 = vmatmul.bf16.gmra.mxu0 %v6768_v46  ;;  %2778 = vmatmul.bf16.gmra.mxu1 %v6135_v5 }
 0x230   : > { %v2389_v62 = vpop.f32.mrf.mxu2 }
 0x231   : > { %v6857_v1 = vadd.f32 %v2389_v62, %v2300_v13 }
 0x232   : > { %v6859_v47 = vpop.f32.mrf.mxu1  ;;  %v2305_v24 = vpop.f32.mrf.mxu3 }
 0x233   : > { %7497 = vst [vmem:[#allocation21_spill] sm:$0xff] %v6857_v1  ;;  %v6861_v17 = vpop.f32.mrf.mxu0 }
 0x235   : > { %2867 = vmatmul.bf16.gmra.mxu2 %v4250_v26 }
 0x237   : > { %2445 = vmatmul.bf16.gmra.mxu3 %v4274_v15 }
 0x238   : > { %v2392_v46 = vpop.f32.mrf.mxu2 }
 0x239   : > { %v6863_v2 = vadd.f32 %v2392_v46, %v2303_v18  ;;  %v4286_v18 = vor.u32 %v4942_v4, %v4285_v44  ;;  %v5083_v4 = vld [vmem:[#allocation8 + $0x1d8] sm:$0xff]  ;;  %v5092_v44 = vld [vmem:[#allocation8 + $0x220] sm:$0xff] }
 0x23a   : > { %v6865_v5 = vpop.f32.mrf.mxu1  ;;  %v2308_v13 = vpop.f32.mrf.mxu3  ;;  %3632 = vmatpush.bf16.msra.mxu1 %v5092_v44 }
 0x23b   : > { %7498 = vst [vmem:[#allocation22_spill] sm:$0xff] %v6863_v2  ;;  %v6867_v62 = vpop.f32.mrf.mxu0 }
 0x23d   : > { %2739 = vmatmul.bf16.gmra.mxu0 %v6776_v56  ;;  %2783 = vmatmul.bf16.gmra.mxu1 %v6222_v34 }
 0x240   : > { %v2394_v1 = vpop.f32.mrf.mxu2 }
 0x241   : > { %v6871_v0 = vadd.f32 %v2394_v1, %v2305_v24  ;;  %v5084_v1 = vld [vmem:[#allocation8 + $0x1e0] sm:$0xff] }
 0x242   : > { %v6873_v39 = vpop.f32.mrf.mxu1  ;;  %v2310_v26 = vpop.f32.mrf.mxu3  ;;  %3543 = vmatpush.bf16.msra.mxu0 %v5084_v1 }
 0x243   : > { %7499 = vst [vmem:[#allocation23_spill] sm:$0xff] %v6871_v0  ;;  %v6875_v3 = vpop.f32.mrf.mxu0 }
 0x245   : > { %2872 = vmatmul.bf16.gmra.mxu2 %v4262_v41 }
 0x246   : > { %3544 = vmatpush.bf16.msra.mxu0 %v5083_v4 }
 0x247   : > { %2450 = vmatmul.bf16.gmra.mxu3 %v4286_v18 }
 0x248   : > { %v2397_v46 = vpop.f32.mrf.mxu2 }
 0x249   : > { %v6877_v2 = vadd.f32 %v2397_v46, %v2308_v13 }
 0x24a   : > { %v6879_v56 = vpop.f32.mrf.mxu1  ;;  %v2313_v34 = vpop.f32.mrf.mxu3 }
 0x24b   : > { %7500 = vst [vmem:[#allocation24_spill] sm:$0xff] %v6877_v2  ;;  %v6883_v24 = vpop.f32.mrf.mxu0  ;;  %v4945_v2 = vld [vmem:[#allocation2 + $0xa0] sm:$0xf0] }
 0x24c   : > { %v4298_v9 = vor.u32 %v4945_v2, %v4297_v10  ;;  %v4948_v10 = vld [vmem:[#allocation2 + $0xb8] sm:$0xf0] }
 0x24d   : > { %2744 = vmatmul.bf16.gmra.mxu0 %v6786_v51  ;;  %2788 = vmatmul.bf16.gmra.mxu1 %v6326_v6  ;;  %v5082_v51 = vld [vmem:[#allocation8 + $0x1d0] sm:$0xff] }
 0x24e   : > { %3545 = vmatpush.bf16.msra.mxu0 %v5082_v51  ;;  %v4309_v51 = vld [vmem:[#allocation2 + $0xb0] sm:$0xf] }
 0x250   : > { %v2399_v0 = vpop.f32.mrf.mxu2 }
 0x251   : > { %v6885_v41 = vadd.f32 %v2399_v0, %v2310_v26  ;;  %v5081_v0 = vld [vmem:[#allocation8 + $0x1c8] sm:$0xff] }
 0x252   : > { %v6887_v13 = vpop.f32.mrf.mxu1  ;;  %v2315_v46 = vpop.f32.mrf.mxu3  ;;  %3546 = vmatpush.bf16.msra.mxu0 %v5081_v0 }
 0x253   : > { %7501 = vst [vmem:[#allocation25_spill] sm:$0xff] %v6885_v41  ;;  %v6889_v1 = vpop.f32.mrf.mxu0 }
 0x255   : > { %2877 = vmatmul.bf16.gmra.mxu2 %v4274_v15 }
 0x256   : > { %3547 = vmatpush.bf16.msra.mxu0 %v5080_v54 }
 0x257   : > { %2455 = vmatmul.bf16.gmra.mxu3 %v4298_v9 }
 0x258   : > { %v2402_v6 = vpop.f32.mrf.mxu2 }
 0x259   : > { %v6891_v63 = vadd.f32 %v2402_v6, %v2313_v34  ;;  %v4310_v6 = vor.u32 %v4948_v10, %v4309_v51 }
 0x25a   : > { %v6893_v26 = vpop.f32.mrf.mxu1  ;;  %v2318_v41 = vpop.f32.mrf.mxu3 }
 0x25b   : > { %7502 = vst [vmem:[#allocation26_spill] sm:$0xff] %v6891_v63  ;;  %v6901_v34 = vpop.f32.mrf.mxu0 }
 0x25d   : > { %2749 = vmatmul.bf16.gmra.mxu0 %v6796_v57  ;;  %2793 = vmatmul.bf16.gmra.mxu1 %v6438_v19  ;;  %v5075_v57 = vld [vmem:[#allocation8 + $0x198] sm:$0xff] }
 0x25e   : > { %3455 = vmatpush.bf16.msra.mxu3 %v5075_v57 }
 0x260   : > { %v2404_v2 = vpop.f32.mrf.mxu2 }
 0x261   : > { %v6897_v15 = vadd.f32 %v2404_v2, %v2315_v46 }
 0x262   : > { %v6899_v4 = vpop.f32.mrf.mxu1  ;;  %v2320_v44 = vpop.f32.mrf.mxu3 }
 0x263   : > { %7503 = vst [vmem:[#allocation27_spill] sm:$0xff] %v6897_v15  ;;  %v6907_v54 = vpop.f32.mrf.mxu0 }
 0x264   : > { %7505 = vst [vmem:[#allocation29_spill] sm:$0xff] %v6907_v54  ;;  %v4627_v54 = vld [vmem:[#allocation2 + $0x3c] sm:$0xf0] }
 0x265   : > { %2882 = vmatmul.bf16.gmra.mxu2 %v4286_v18  ;;  %v5091_v18 = vld [vmem:[#allocation8 + $0x218] sm:$0xff] }
 0x266   : > { %3633 = vmatpush.bf16.msra.mxu1 %v5091_v18 }
 0x267   : > { %2460 = vmatmul.bf16.gmra.mxu3 %v4310_v6 }
 0x268   : > { %v2407_v0 = vpop.f32.mrf.mxu2 }
 0x269   : > { %v6903_v63 = vadd.f32 %v2407_v0, %v2318_v41  ;;  %v4951_v41 = vld [vmem:[#allocation2 + $0xd0] sm:$0xf0]  ;;  %v4321_v0 = vld [vmem:[#allocation2 + $0xc8] sm:$0xf] }
 0x26a   : > { %v6905_v12 = vpop.f32.mrf.mxu1  ;;  %v2323_v19 = vpop.f32.mrf.mxu3 }
 0x26b   : > { %7504 = vst [vmem:[#allocation28_spill] sm:$0xff] %v6903_v63  ;;  %v4322_v63 = vor.u32 %v4951_v41, %v4321_v0  ;;  %v6915_v15 = vpop.f32.mrf.mxu0 }
 0x26c   : > { %7508 = vst [vmem:[#allocation32_spill] sm:$0xff] %v6915_v15  ;;  %v4954_v15 = vld [vmem:[#allocation2 + $0xe8] sm:$0xf0] }
 0x26d   : > { %2754 = vmatmul.bf16.gmra.mxu0 %v6804_v45  ;;  %2798 = vmatmul.bf16.gmra.mxu1 %v6579_v35 }
 0x270   : > { %v2409_v46 = vpop.f32.mrf.mxu2 }
 0x271   : > { %v6911_v2 = vadd.f32 %v2409_v46, %v2320_v44  ;;  %v5024_v46 = vld [vmem:[#allocation2 + $0x34] sm:$0xf] }
 0x272   : > { %v6913_v10 = vpop.f32.mrf.mxu1  ;;  %v2325_v51 = vpop.f32.mrf.mxu3 }
 0x273   : > { %7506 = vst [vmem:[#allocation30_spill] sm:$0xff] %v6911_v2  ;;  %v4630_v2 = vor.u32 %v5024_v46, %v4627_v54  ;;  %v6922_v18 = vpop.f32.mrf.mxu0  ;;  %v2343_v54 = vadd.f32 %v6750_v42, %v6824_v31  ;;  %v2345_v42 = vadd.f32 %v6753_v14, %v6831_v30  ;;  %v2348_v14 = vadd.f32 %v6761_v38, %v6837_v8 }
 0x274   : > { %7507 = vst [vmem:[#allocation31_spill] sm:$0xff] %v6913_v10 }
 0x275   : > { %2887 = vmatmul.bf16.gmra.mxu2 %v4298_v9  ;;  %7511 = vst [vmem:[#allocation35_spill] sm:$0xff] %v6922_v18 }
 0x277   : > { %2465 = vmatmul.bf16.gmra.mxu3 %v4322_v63 }
 0x278   : > { %v2412_v57 = vpop.f32.mrf.mxu2 }
 0x279   : > { %v6917_v45 = vadd.f32 %v2412_v57, %v2323_v19  ;;  %v4334_v19 = vor.u32 %v4954_v15, %v4333_v28 }
 0x27a   : > { %v6919_v35 = vpop.f32.mrf.mxu1  ;;  %v2328_v44 = vpop.f32.mrf.mxu3 }
 0x27b   : > { %7509 = vst [vmem:[#allocation33_spill] sm:$0xff] %v6917_v45  ;;  %v4639_v45 = vld [vmem:[#allocation2 + $0x54] sm:$0xf0] }
 0x27c   : > { %7510 = vst [vmem:[#allocation34_spill] sm:$0xff] %v6919_v35  ;;  %v4957_v35 = vld [vmem:[#allocation2 + $0x100] sm:$0xf0] }
 0x27d   : > { %2803 = vmatmul.bf16.gmra.mxu1 %v6674_v40  ;;  %3548 = vmatmul.bf16.vlgmr.msra.gmra.mxu0 %v4630_v2  ;;  %v5074_v2 = vld [vmem:[#allocation8 + $0x190] sm:$0xff] }
 0x27e   : > { %3456 = vmatpush.bf16.msra.mxu3 %v5074_v2 }
 0x280   : > { %v2414_v10 = vpop.f32.mrf.mxu2 }
 0x281   : > { %v6924_v9 = vadd.f32 %v2414_v10, %v2325_v51  ;;  %v5027_v10 = vld [vmem:[#allocation2 + $0x4c] sm:$0xf]  ;;  %v6932_v51 = vpop.f32.mrf.mxu0 }
 0x282   : > { %v6926_v41 = vpop.f32.mrf.mxu1  ;;  %v2330_v0 = vpop.f32.mrf.mxu3  ;;  %7515 = vst [vmem:[#allocation39_spill] sm:$0xff] %v6932_v51 }
 0x283   : > { %7512 = vst [vmem:[#allocation36_spill] sm:$0xff] %v6924_v9 }
 0x284   : > { %7513 = vst [vmem:[#allocation37_spill] sm:$0xff] %v6926_v41  ;;  %v4642_v41 = vor.u32 %v5027_v10, %v4639_v45  ;;  %v4345_v45 = vld [vmem:[#allocation2 + $0xf8] sm:$0xf] }
 0x285   : > { %2892 = vmatmul.bf16.gmra.mxu2 %v4310_v6 }
 0x287   : > { %2470 = vmatmul.bf16.gmra.mxu3 %v4334_v19 }
 0x288   : > { %v2417_v57 = vpop.f32.mrf.mxu2 }
 0x289   : > { %v6930_v40 = vadd.f32 %v2417_v57, %v2328_v44  ;;  %v5090_v44 = vld [vmem:[#allocation8 + $0x210] sm:$0xff] }
 0x28a   : > { %v2431_v46 = vpop.f32.mrf.mxu3  ;;  %v2769_v18 = vpop.f32.mrf.mxu1  ;;  %3634 = vmatpush.bf16.msra.mxu1 %v5090_v44  ;;  %v4357_v44 = vld [vmem:[#allocation2 + $0x110] sm:$0xf] }
 0x28b   : > { %7514 = vst [vmem:[#allocation38_spill] sm:$0xff] %v6930_v40  ;;  %v2432_v9 = vadd.f32 %v2431_v46, %v2343_v54  ;;  %v6940_v54 = vpop.f32.mrf.mxu0  ;;  %v5030_v46 = vld [vmem:[#allocation2 + $0x64] sm:$0xf] }
 0x28d   : > { %v2681_v6 = vadd.f32 %v6814_v48, %v2432_v9  ;;  %2808 = vmatmul.bf16.gmra.mxu1 %v6744_v55  ;;  %3553 = vmatmul.bf16.gmra.mxu0 %v4642_v41  ;;  %v4346_v55 = vor.u32 %v4957_v35, %v4345_v45  ;;  %v4651_v41 = vld [vmem:[#allocation2 + $0x6c] sm:$0xf0] }
 0x28f   : > { %v2770_v28 = vadd.f32 %v2769_v18, %v2681_v6  ;;  %v4654_v6 = vor.u32 %v5030_v46, %v4651_v41 }
 0x290   : > { %v2419_v15 = vpop.f32.mrf.mxu2 }
 0x291   : > { %v6938_v31 = vadd.f32 %v2419_v15, %v2330_v0 }
 0x292   : > { %v2433_v57 = vpop.f32.mrf.mxu3  ;;  %v2771_v40 = vpop.f32.mrf.mxu1 }
 0x293   : > { %v2434_v51 = vadd.f32 %v2433_v57, %v2345_v42 }
 0x295   : > { %v2683_v48 = vadd.f32 %v6820_v20, %v2434_v51  ;;  %2897 = vmatmul.bf16.gmra.mxu2 %v4322_v63  ;;  %v6949_v63 = vpop.f32.mrf.mxu0 }
 0x297   : > { %v2772_v18 = vadd.f32 %v2771_v40, %v2683_v48  ;;  %2475 = vmatmul.bf16.gmra.mxu3 %v4346_v55  ;;  %v2350_v40 = vadd.f32 %v6763_v22, %v6845_v33  ;;  %v4663_v48 = vld [vmem:[#allocation2 + $0x84] sm:$0xf0]  ;;  %v5073_v33 = vld [vmem:[#allocation8 + $0x188] sm:$0xff] }
 0x298   : > { %v2858_v9 = vpop.f32.mrf.mxu2  ;;  %3457 = vmatpush.bf16.msra.mxu3 %v5073_v33 }
 0x299   : > { %v6945_v30 = vadd.f32 %v2858_v9, %v2770_v28  ;;  %v4960_v28 = vld [vmem:[#allocation2 + $0x118] sm:$0xf0]  ;;  %v2353_v9 = vadd.f32 %v6771_v21, %v6851_v59  ;;  %v2355_v21 = vadd.f32 %v6778_v61, %v6859_v47  ;;  %v2358_v61 = vadd.f32 %v6781_v16, %v6865_v5 }
 0x29a   : > { %v2436_v0 = vpop.f32.mrf.mxu3  ;;  %v2774_v2 = vpop.f32.mrf.mxu1 }
 0x29b   : > { %v2437_v10 = vadd.f32 %v2436_v0, %v2348_v14  ;;  %v5033_v0 = vld [vmem:[#allocation2 + $0x7c] sm:$0xf] }
 0x29c   : > { %v4666_v46 = vor.u32 %v5033_v0, %v4663_v48 }
 0x29d   : > { %v2686_v15 = vadd.f32 %v6826_v23, %v2437_v10  ;;  %2813 = vmatmul.bf16.gmra.mxu1 %v6755_v32  ;;  %3558 = vmatmul.bf16.gmra.mxu0 %v4654_v6  ;;  %v4358_v23 = vor.u32 %v4960_v28, %v4357_v44  ;;  %v6958_v41 = vpop.f32.mrf.mxu0  ;;  %v5089_v6 = vld [vmem:[#allocation8 + $0x208] sm:$0xff]  ;;  %v4675_v44 = vld [vmem:[#allocation2 + $0x9c] sm:$0xf0] }
 0x29e   : > { %3635 = vmatpush.bf16.msra.mxu1 %v5089_v6  ;;  %v4687_v6 = vld [vmem:[#allocation2 + $0xb4] sm:$0xf0] }
 0x29f   : > { %v2775_v20 = vadd.f32 %v2774_v2, %v2686_v15 }
 0x2a0   : > { %v2860_v35 = vpop.f32.mrf.mxu2 }
 0x2a1   : > { %v6953_v38 = vadd.f32 %v2860_v35, %v2772_v18  ;;  %v4963_v35 = vld [vmem:[#allocation2 + $0x130] sm:$0xf0] }
 0x2a2   : > { %v2438_v8 = vpop.f32.mrf.mxu3  ;;  %v2776_v51 = vpop.f32.mrf.mxu1 }
 0x2a3   : > { %v2439_v42 = vadd.f32 %v2438_v8, %v2350_v40 }
 0x2a5   : > { %v2688_v57 = vadd.f32 %v6833_v43, %v2439_v42  ;;  %2902 = vmatmul.bf16.gmra.mxu2 %v4334_v19  ;;  %v6968_v40 = vpop.f32.mrf.mxu0 }
 0x2a7   : > { %v2777_v32 = vadd.f32 %v2776_v51, %v2688_v57  ;;  %2480 = vmatmul.bf16.gmra.mxu3 %v4358_v23  ;;  %v4369_v51 = vld [vmem:[#allocation2 + $0x128] sm:$0xf] }
 0x2a8   : > { %v2863_v45 = vpop.f32.mrf.mxu2 }
 0x2a9   : > { %v6960_v22 = vadd.f32 %v2863_v45, %v2775_v20  ;;  %v5036_v45 = vld [vmem:[#allocation2 + $0x94] sm:$0xf] }
 0x2aa   : > { %v2441_v18 = vpop.f32.mrf.mxu3  ;;  %v2779_v14 = vpop.f32.mrf.mxu1 }
 0x2ab   : > { %v2442_v2 = vadd.f32 %v2441_v18, %v2353_v9  ;;  %v4678_v9 = vor.u32 %v5036_v45, %v4675_v44  ;;  %v5088_v44 = vld [vmem:[#allocation8 + $0x200] sm:$0xff] }
 0x2ac   : > { %3636 = vmatpush.bf16.msra.mxu1 %v5088_v44 }
 0x2ad   : > { %v2691_v43 = vadd.f32 %v6839_v7, %v2442_v2  ;;  %2818 = vmatmul.bf16.gmra.mxu1 %v6765_v60  ;;  %3563 = vmatmul.bf16.gmra.mxu0 %v4666_v46  ;;  %v4370_v60 = vor.u32 %v4963_v35, %v4369_v51  ;;  %v6975_v33 = vpop.f32.mrf.mxu0  ;;  %v4966_v2 = vld [vmem:[#allocation2 + $0x148] sm:$0xf0] }
 0x2af   : > { %v2780_v19 = vadd.f32 %v2779_v14, %v2691_v43  ;;  %v2360_v14 = vadd.f32 %v6789_v36, %v6873_v39  ;;  %v4381_v43 = vld [vmem:[#allocation2 + $0x140] sm:$0xf]  ;;  %v2363_v36 = vadd.f32 %v6793_v53, %v6879_v56  ;;  %v2365_v53 = vadd.f32 %v6799_v25, %v6887_v13 }
 0x2b0   : > { %v2865_v10 = vpop.f32.mrf.mxu2  ;;  %v2368_v25 = vadd.f32 %v6807_v49, %v6893_v26  ;;  %v4972_v49 = vld [vmem:[#allocation2 + $0x178] sm:$0xf0] }
 0x2b1   : > { %v6966_v59 = vadd.f32 %v2865_v10, %v2777_v32  ;;  %v4382_v10 = vor.u32 %v4966_v2, %v4381_v43 }
 0x2b2   : > { %v2443_v15 = vpop.f32.mrf.mxu3  ;;  %v2781_v20 = vpop.f32.mrf.mxu1 }
 0x2b3   : > { %v2444_v8 = vadd.f32 %v2443_v15, %v2355_v21  ;;  %v5072_v15 = vld [vmem:[#allocation8 + $0x180] sm:$0xff] }
 0x2b4   : > { %3458 = vmatpush.bf16.msra.mxu3 %v5072_v15 }
 0x2b5   : > { %v2693_v7 = vadd.f32 %v6847_v50, %v2444_v8  ;;  %2907 = vmatmul.bf16.gmra.mxu2 %v4346_v55  ;;  %v5039_v8 = vld [vmem:[#allocation2 + $0xac] sm:$0xf] }
 0x2b7   : > { %v2782_v28 = vadd.f32 %v2781_v20, %v2693_v7  ;;  %2485 = vmatmul.bf16.gmra.mxu3 %v4370_v60  ;;  %v4690_v7 = vor.u32 %v5039_v8, %v4687_v6 }
 0x2b8   : > { %v2868_v42 = vpop.f32.mrf.mxu2 }
 0x2b9   : > { %v6973_v47 = vadd.f32 %v2868_v42, %v2780_v19 }
 0x2ba   : > { %v2446_v57 = vpop.f32.mrf.mxu3  ;;  %v2784_v32 = vpop.f32.mrf.mxu1 }
 0x2bb   : > { %v2447_v48 = vadd.f32 %v2446_v57, %v2358_v61 }
 0x2bd   : > { %v2696_v50 = vadd.f32 %v6853_v37, %v2447_v48  ;;  %2823 = vmatmul.bf16.gmra.mxu1 %v6773_v29  ;;  %3568 = vmatmul.bf16.gmra.mxu0 %v4678_v9  ;;  %v6984_v37 = vpop.f32.mrf.mxu0 }
 0x2bf   : > { %v2785_v55 = vadd.f32 %v2784_v32, %v2696_v50  ;;  %v4969_v32 = vld [vmem:[#allocation2 + $0x160] sm:$0xf0]  ;;  %v4699_v50 = vld [vmem:[#allocation2 + $0xcc] sm:$0xf0] }
 0x2c0   : > { %v2870_v18 = vpop.f32.mrf.mxu2 }
 0x2c1   : > { %v6981_v16 = vadd.f32 %v2870_v18, %v2782_v28  ;;  %v5042_v18 = vld [vmem:[#allocation2 + $0xc4] sm:$0xf] }
 0x2c2   : > { %v2448_v5 = vpop.f32.mrf.mxu3  ;;  %v2786_v0 = vpop.f32.mrf.mxu1 }
 0x2c3   : > { %v2449_v46 = vadd.f32 %v2448_v5, %v2360_v14 }
 0x2c5   : > { %v2698_v19 = vadd.f32 %v6861_v17, %v2449_v46  ;;  %2912 = vmatmul.bf16.gmra.mxu2 %v4358_v23  ;;  %v6996_v56 = vpop.f32.mrf.mxu0 }
 0x2c7   : > { %v2787_v29 = vadd.f32 %v2786_v0, %v2698_v19  ;;  %2490 = vmatmul.bf16.gmra.mxu3 %v4382_v10  ;;  %v4702_v0 = vor.u32 %v5042_v18, %v4699_v50  ;;  %v4405_v19 = vld [vmem:[#allocation2 + $0x170] sm:$0xf]  ;;  %v7521_v50 = vld [vmem:[#allocation16_spill] sm:$0xff] }
 0x2c8   : > { %v2873_v21 = vpop.f32.mrf.mxu2  ;;  %v4406_v6 = vor.u32 %v4972_v49, %v4405_v19  ;;  %v7524_v49 = vld [vmem:[#allocation37_spill] sm:$0xff] }
 0x2c9   : > { %v6988_v39 = vadd.f32 %v2873_v21, %v2785_v55 }
 0x2ca   : > { %v2451_v20 = vpop.f32.mrf.mxu3  ;;  %v2789_v35 = vpop.f32.mrf.mxu1 }
 0x2cb   : > { %v2452_v51 = vadd.f32 %v2451_v20, %v2363_v36  ;;  %v2373_v36 = vadd.f32 %v6816_v11, %v6905_v12  ;;  %v4999_v11 = vld [vmem:[#allocation2 + $0x190] sm:$0xf0] }
 0x2cd   : > { %v2701_v17 = vadd.f32 %v6867_v62, %v2452_v51  ;;  %2828 = vmatmul.bf16.gmra.mxu1 %v6783_v58  ;;  %3573 = vmatmul.bf16.gmra.mxu0 %v4690_v7  ;;  %v4393_v62 = vld [vmem:[#allocation2 + $0x158] sm:$0xf]  ;;  %v7005_v14 = vpop.f32.mrf.mxu0  ;;  %v7516_v51 = vld [vmem:[#allocation13_spill] sm:$0xff]  ;;  %v7517_v7 = vld [vmem:[#allocation31_spill] sm:$0xff] }
 0x2ce   : > { %v4394_v48 = vor.u32 %v4969_v32, %v4393_v62  ;;  %v4723_v62 = vld [vmem:[#allocation2 + $0xfc] sm:$0xf0] }
 0x2cf   : > { %v6992_v23 = vadd.f32 %v2789_v35, %v2701_v17  ;;  %v7518_v17 = vld [vmem:[#allocation15_spill] sm:$0xff] }
 0x2d0   : > { %v2875_v28 = vpop.f32.mrf.mxu2 }
 0x2d1   : > { %v6998_v42 = vadd.f32 %v2875_v28, %v2787_v29  ;;  %v2375_v28 = vadd.f32 %v7518_v17, %v7517_v7  ;;  %v4735_v7 = vld [vmem:[#allocation2 + $0x114] sm:$0xf0]  ;;  %v5026_v17 = vld [vmem:[#allocation2 + $0x40] sm:$0xf0] }
 0x2d2   : > { %v2453_v61 = vpop.f32.mrf.mxu3  ;;  %v2791_v57 = vpop.f32.mrf.mxu1 }
 0x2d3   : > { %v2454_v45 = vadd.f32 %v2453_v61, %v2365_v53  ;;  %v4417_v61 = vld [vmem:[#allocation2 + $0x188] sm:$0xf] }
 0x2d5   : > { %v2703_v58 = vadd.f32 %v6875_v3, %v2454_v45  ;;  %2917 = vmatmul.bf16.gmra.mxu2 %v4370_v60  ;;  %v2370_v60 = vadd.f32 %v6809_v27, %v6899_v4  ;;  %v7013_v29 = vpop.f32.mrf.mxu0  ;;  %v5045_v4 = vld [vmem:[#allocation2 + $0xdc] sm:$0xf]  ;;  %v4418_v45 = vor.u32 %v4999_v11, %v4417_v61  ;;  %v4633_v11 = vld [vmem:[#allocation2 + $0x38] sm:$0xf] }
 0x2d7   : > { %v7001_v9 = vadd.f32 %v2791_v57, %v2703_v58  ;;  %2495 = vmatmul.bf16.gmra.mxu3 %v4394_v48  ;;  %v7519_v57 = vld [vmem:[#allocation29_spill] sm:$0xff]  ;;  %v7520_v58 = vld [vmem:[#allocation34_spill] sm:$0xff] }
 0x2da   : > { %v2456_v13 = vpop.f32.mrf.mxu3  ;;  %v2794_v55 = vpop.f32.mrf.mxu1 }
 0x2db   : > { %v2457_v5 = vadd.f32 %v2456_v13, %v2368_v25  ;;  %v2378_v25 = vadd.f32 %v7521_v50, %v7520_v58 }
 0x2dd   : > { %v2706_v2 = vadd.f32 %v6883_v24, %v2457_v5  ;;  %2833 = vmatmul.bf16.gmra.mxu1 %v6791_v52  ;;  %3578 = vmatmul.bf16.gmra.mxu0 %v4702_v0  ;;  %v4711_v52 = vld [vmem:[#allocation2 + $0xe4] sm:$0xf0]  ;;  %v5048_v5 = vld [vmem:[#allocation2 + $0xf4] sm:$0xf] }
 0x2de   : > { %v4714_v35 = vor.u32 %v5045_v4, %v4711_v52  ;;  %v4625_v4 = vld [vmem:[#allocation2 + $0x30] sm:$0xf] }
 0x2df   : > { %v7009_v3 = vadd.f32 %v2794_v55, %v2706_v2  ;;  %v4726_v2 = vor.u32 %v5048_v5, %v4723_v62  ;;  %v7528_v62 = vld [vmem:[#allocation39_spill] sm:$0xff] }
 0x2e2   : > { %v2458_v46 = vpop.f32.mrf.mxu3  ;;  %v2796_v43 = vpop.f32.mrf.mxu1 }
 0x2e3   : > { %v2459_v26 = vadd.f32 %v2458_v46, %v2370_v60  ;;  %v7522_v60 = vld [vmem:[#allocation32_spill] sm:$0xff] }
 0x2e5   : > { %v2708_v21 = vadd.f32 %v6889_v1, %v2459_v26  ;;  %2922 = vmatmul.bf16.gmra.mxu2 %v4382_v10  ;;  %v7022_v1 = vpop.f32.mrf.mxu0  ;;  %v7525_v26 = vld [vmem:[#allocation17_spill] sm:$0xff] }
 0x2e6   : > { %v2380_v19 = vadd.f32 %v7525_v26, %v7524_v49  ;;  %v4747_v49 = vld [vmem:[#allocation2 + $0x12c] sm:$0xf0]  ;;  %v5029_v26 = vld [vmem:[#allocation2 + $0x58] sm:$0xf0] }
 0x2e7   : > { %v7016_v24 = vadd.f32 %v2796_v43, %v2708_v21  ;;  %2500 = vmatmul.bf16.gmra.mxu3 %v4406_v6  ;;  %v7523_v43 = vld [vmem:[#allocation14_spill] sm:$0xff] }
 0x2ea   : > { %v2461_v15 = vpop.f32.mrf.mxu3  ;;  %v2799_v27 = vpop.f32.mrf.mxu1 }
 0x2eb   : > { %v2462_v20 = vadd.f32 %v2461_v15, %v2373_v36  ;;  %v5025_v36 = vld [vmem:[#allocation2 + $0x38] sm:$0xf0] }
 0x2ed   : > { %v2711_v8 = vadd.f32 %v6901_v34, %v2462_v20  ;;  %2838 = vmatmul.bf16.gmra.mxu1 %v7516_v51  ;;  %3583 = vmatmul.bf16.gmra.mxu0 %v4714_v35  ;;  %v7033_v13 = vpop.f32.mrf.mxu0  ;;  %v7526_v20 = vld [vmem:[#allocation35_spill] sm:$0xff] }
 0x2ef   : > { %v7024_v10 = vadd.f32 %v2799_v27, %v2711_v8  ;;  %v4626_v8 = vor.u32 %v5025_v36, %v4625_v4  ;;  %v4645_v36 = vld [vmem:[#allocation2 + $0x50] sm:$0xf] }
 0x2f2   : > { %v2463_v53 = vpop.f32.mrf.mxu3  ;;  %v2801_v44 = vpop.f32.mrf.mxu1 }
 0x2f3   : > { %v2464_v12 = vadd.f32 %v2463_v53, %v2375_v28 }
 0x2f5   : > { %v2713_v32 = vadd.f32 %v7519_v57, %v2464_v12  ;;  %2927 = vmatmul.bf16.gmra.mxu2 %v4394_v48  ;;  %v7041_v15 = vpop.f32.mrf.mxu0  ;;  %v7527_v12 = vld [vmem:[#allocation18_spill] sm:$0xff] }
 0x2f7   : > { %v7029_v34 = vadd.f32 %v2801_v44, %v2713_v32  ;;  %2505 = vmatmul.bf16.gmra.mxu3 %v4418_v45  ;;  %v5051_v44 = vld [vmem:[#allocation2 + $0x10c] sm:$0xf]  ;;  %v4634_v32 = vor.u32 %v5026_v17, %v4633_v11 }
 0x2f8   : > { %v4738_v57 = vor.u32 %v5051_v44, %v4735_v7  ;;  %v7531_v44 = vld [vmem:[#allocation21_spill] sm:$0xff] }
 0x2fa   : > { %v2466_v55 = vpop.f32.mrf.mxu3  ;;  %v2804_v18 = vpop.f32.mrf.mxu1 }
 0x2fb   : > { %v2467_v0 = vadd.f32 %v2466_v55, %v2378_v25  ;;  %v5028_v55 = vld [vmem:[#allocation2 + $0x50] sm:$0xf0] }
 0x2fd   : > { %v2716_v46 = vadd.f32 %v7522_v60, %v2467_v0  ;;  %2843 = vmatmul.bf16.gmra.mxu1 %v7523_v43  ;;  %3588 = vmatmul.bf16.gmra.mxu0 %v4726_v2  ;;  %v7047_v45 = vpop.f32.mrf.mxu0  ;;  %v4637_v0 = vld [vmem:[#allocation2 + $0x48] sm:$0xf] }
 0x2fe   : > { %v4638_v60 = vor.u32 %v5028_v55, %v4637_v0  ;;  %v4657_v55 = vld [vmem:[#allocation2 + $0x68] sm:$0xf] }
 0x2ff   : > { %v7037_v48 = vadd.f32 %v2804_v18, %v2716_v46  ;;  %v7529_v18 = vld [vmem:[#allocation19_spill] sm:$0xff] }
 0x302   : > { %v2468_v21 = vpop.f32.mrf.mxu3  ;;  %v2806_v52 = vpop.f32.mrf.mxu1 }
 0x303   : > { %v2469_v27 = vadd.f32 %v2468_v21, %v2380_v19 }
 0x305   : > { %v2718_v35 = vadd.f32 %v7526_v20, %v2469_v27  ;;  %2932 = vmatmul.bf16.gmra.mxu2 %v4406_v6  ;;  %v7054_v46 = vpop.f32.mrf.mxu0  ;;  %v7530_v27 = vld [vmem:[#allocation20_spill] sm:$0xff] }
 0x307   : > { %v7044_v51 = vadd.f32 %v2806_v52, %v2718_v35  ;;  %3459 = vmatmul.bf16.vlgmr.msra.gmra.mxu3 %v4626_v8  ;;  %v5054_v52 = vld [vmem:[#allocation2 + $0x124] sm:$0xf]  ;;  %v4646_v35 = vor.u32 %v5029_v26, %v4645_v36 }
 0x308   : > { %v4750_v20 = vor.u32 %v5054_v52, %v4747_v49  ;;  %v7533_v52 = vld [vmem:[#allocation23_spill] sm:$0xff] }
 0x30a   : > { %v2471_v28 = vpop.f32.mrf.mxu3  ;;  %v2809_v53 = vpop.f32.mrf.mxu1 }
 0x30b   : > { %v2472_v61 = vadd.f32 %v2471_v28, %v7527_v12  ;;  %v4649_v12 = vld [vmem:[#allocation2 + $0x60] sm:$0xf] }
 0x30d   : > { %v2721_v58 = vadd.f32 %v7528_v62, %v2472_v61  ;;  %3593 = vmatmul.bf16.gmra.mxu0 %v4738_v57  ;;  %3637 = vmatmul.bf16.vlgmr.msra.gmra.mxu1 %v4634_v32  ;;  %v7062_v7 = vpop.f32.mrf.mxu0  ;;  %v4759_v62 = vld [vmem:[#allocation2 + $0x144] sm:$0xf0] }
 0x30f   : > { %v7050_v6 = vadd.f32 %v2809_v53, %v2721_v58  ;;  %v5031_v53 = vld [vmem:[#allocation2 + $0x68] sm:$0xf0] }
 0x310   : > { %v4650_v57 = vor.u32 %v5031_v53, %v4649_v12  ;;  %v7534_v12 = vld [vmem:[#allocation24_spill] sm:$0xff] }
 0x312   : > { %v2473_v50 = vpop.f32.mrf.mxu3  ;;  %v2811_v25 = vpop.f32.mrf.mxu1 }
 0x313   : > { %v2474_v5 = vadd.f32 %v2473_v50, %v7529_v18 }
 0x315   : > { %v2723_v2 = vadd.f32 %v6940_v54, %v2474_v5  ;;  %v7068_v18 = vpop.f32.mrf.mxu0  ;;  %v7532_v5 = vld [vmem:[#allocation22_spill] sm:$0xff] }
 0x317   : > { %v7056_v43 = vadd.f32 %v2811_v25, %v2723_v2  ;;  %3464 = vmatmul.bf16.gmra.mxu3 %v4638_v60  ;;  %v5057_v25 = vld [vmem:[#allocation2 + $0x13c] sm:$0xf] }
 0x318   : > { %v4762_v2 = vor.u32 %v5057_v25, %v4759_v62 }
 0x31a   : > { %v2476_v19 = vpop.f32.mrf.mxu3  ;;  %v2814_v21 = vpop.f32.mrf.mxu1 }
 0x31b   : > { %v2477_v4 = vadd.f32 %v2476_v19, %v7530_v27  ;;  %v4661_v27 = vld [vmem:[#allocation2 + $0x78] sm:$0xf] }
 0x31d   : > { %v2726_v8 = vadd.f32 %v6949_v63, %v2477_v4  ;;  %3598 = vmatmul.bf16.gmra.mxu0 %v4750_v20  ;;  %3642 = vmatmul.bf16.gmra.mxu1 %v4646_v35  ;;  %v5032_v63 = vld [vmem:[#allocation2 + $0x70] sm:$0xf0]  ;;  %v7075_v4 = vpop.f32.mrf.mxu0 }
 0x31e   : > { %v4658_v60 = vor.u32 %v5032_v63, %v4657_v55  ;;  %v5037_v55 = vld [vmem:[#allocation2 + $0x98] sm:$0xf0] }
 0x31f   : > { %v7060_v54 = vadd.f32 %v2814_v21, %v2726_v8  ;;  %v5034_v21 = vld [vmem:[#allocation2 + $0x80] sm:$0xf0] }
 0x320   : > { %v4662_v35 = vor.u32 %v5034_v21, %v4661_v27  ;;  %v5063_v27 = vld [vmem:[#allocation2 + $0x16c] sm:$0xf] }
 0x322   : > { %v2478_v17 = vpop.f32.mrf.mxu3  ;;  %v2816_v28 = vpop.f32.mrf.mxu1 }
 0x323   : > { %v2479_v11 = vadd.f32 %v2478_v17, %v7531_v44  ;;  %v4771_v17 = vld [vmem:[#allocation2 + $0x15c] sm:$0xf0]  ;;  %v5060_v44 = vld [vmem:[#allocation2 + $0x154] sm:$0xf] }
 0x325   : > { %v2728_v61 = vadd.f32 %v6958_v41, %v2479_v11  ;;  %v4669_v11 = vld [vmem:[#allocation2 + $0x80] sm:$0xf] }
 0x327   : > { %v7066_v32 = vadd.f32 %v2816_v28, %v2728_v61  ;;  %3469 = vmatmul.bf16.gmra.mxu3 %v4650_v57  ;;  %v4774_v57 = vor.u32 %v5060_v44, %v4771_v17 }
 0x32a   : > { %v2481_v58 = vpop.f32.mrf.mxu3  ;;  %v2819_v50 = vpop.f32.mrf.mxu1 }
 0x32b   : > { %v2482_v0 = vadd.f32 %v2481_v58, %v7532_v5  ;;  %v7082_v58 = vpop.f32.mrf.mxu0  ;;  %v7535_v5 = vld [vmem:[#allocation25_spill] sm:$0xff] }
 0x32d   : > { %v2731_v49 = vadd.f32 %v6968_v40, %v2482_v0  ;;  %3603 = vmatmul.bf16.gmra.mxu0 %v4762_v2  ;;  %3647 = vmatmul.bf16.gmra.mxu1 %v4658_v60  ;;  %v5035_v40 = vld [vmem:[#allocation2 + $0x88] sm:$0xf0]  ;;  %v4673_v2 = vld [vmem:[#allocation2 + $0x90] sm:$0xf] }
 0x32e   : > { %v4670_v62 = vor.u32 %v5035_v40, %v4669_v11 }
 0x32f   : > { %v7072_v41 = vadd.f32 %v2819_v50, %v2731_v49  ;;  %v4674_v49 = vor.u32 %v5037_v55, %v4673_v2 }
 0x332   : > { %v2483_v26 = vpop.f32.mrf.mxu3  ;;  %v2821_v19 = vpop.f32.mrf.mxu1 }
 0x333   : > { %v2484_v36 = vadd.f32 %v2483_v26, %v7533_v52  ;;  %v7090_v21 = vpop.f32.mrf.mxu0 }
 0x335   : > { %v2733_v20 = vadd.f32 %v6975_v33, %v2484_v36 }
 0x337   : > { %v7078_v8 = vadd.f32 %v2821_v19, %v2733_v20  ;;  %3474 = vmatmul.bf16.gmra.mxu3 %v4662_v35  ;;  %v4783_v19 = vld [vmem:[#allocation2 + $0x174] sm:$0xf0] }
 0x338   : > { %v4681_v20 = vld [vmem:[#allocation2 + $0x98] sm:$0xf]  ;;  %v4786_v40 = vor.u32 %v5063_v27, %v4783_v19  ;;  %v7538_v19 = vld [vmem:[#allocation28_spill] sm:$0xff] }
 0x339   : > { %v7536_v35 = vld [vmem:[#allocation26_spill] sm:$0xff] }
 0x33a   : > { %v2486_v28 = vpop.f32.mrf.mxu3  ;;  %v2824_v53 = vpop.f32.mrf.mxu1 }
 0x33b   : > { %v2487_v61 = vadd.f32 %v2486_v28, %v7534_v12  ;;  %v5040_v12 = vld [vmem:[#allocation2 + $0xb0] sm:$0xf0] }
 0x33d   : > { %v2736_v63 = vadd.f32 %v6984_v37, %v2487_v61  ;;  %3608 = vmatmul.bf16.gmra.mxu0 %v4774_v57  ;;  %3652 = vmatmul.bf16.gmra.mxu1 %v4670_v62  ;;  %v5038_v37 = vld [vmem:[#allocation2 + $0xa0] sm:$0xf0]  ;;  %v7096_v61 = vpop.f32.mrf.mxu0 }
 0x33e   : > { %v4682_v28 = vor.u32 %v5038_v37, %v4681_v20  ;;  %v7537_v57 = vld [vmem:[#allocation27_spill] sm:$0xff] }
 0x33f   : > { %v7084_v33 = vadd.f32 %v2824_v53, %v2736_v63  ;;  %v4685_v63 = vld [vmem:[#allocation2 + $0xa8] sm:$0xf] }
 0x342   : > { %v2488_v50 = vpop.f32.mrf.mxu3  ;;  %v2826_v25 = vpop.f32.mrf.mxu1 }
 0x343   : > { %v2489_v0 = vadd.f32 %v2488_v50, %v7535_v5  ;;  %v4795_v5 = vld [vmem:[#allocation2 + $0x18c] sm:$0xf0] }
 0x345   : > { %v2738_v60 = vadd.f32 %v6996_v56, %v2489_v0  ;;  %v7103_v27 = vpop.f32.mrf.mxu0 }
 0x347   : > { %v7088_v26 = vadd.f32 %v2826_v25, %v2738_v60  ;;  %3479 = vmatmul.bf16.gmra.mxu3 %v4674_v49  ;;  %v4686_v25 = vor.u32 %v5040_v12, %v4685_v63  ;;  %v5066_v60 = vld [vmem:[#allocation2 + $0x184] sm:$0xf]  ;;  %v4693_v49 = vld [vmem:[#allocation2 + $0xb0] sm:$0xf] }
 0x34a   : > { %v2491_v52 = vpop.f32.mrf.mxu3  ;;  %v2829_v36 = vpop.f32.mrf.mxu1 }
 0x34b   : > { %v2492_v17 = vadd.f32 %v2491_v52, %v7536_v35  ;;  %v4798_v52 = vor.u32 %v5066_v60, %v4795_v5 }
 0x34d   : > { %v2741_v53 = vadd.f32 %v7005_v14, %v2492_v17  ;;  %3613 = vmatmul.bf16.gmra.mxu0 %v4786_v40  ;;  %3657 = vmatmul.bf16.gmra.mxu1 %v4682_v28  ;;  %v5041_v14 = vld [vmem:[#allocation2 + $0xb8] sm:$0xf0]  ;;  %v5043_v40 = vld [vmem:[#allocation2 + $0xc8] sm:$0xf0] }
 0x34e   : > { %v7539_v28 = vld [vmem:[#allocation30_spill] sm:$0xff] }
 0x34f   : > { %v7094_v56 = vadd.f32 %v2829_v36, %v2741_v53  ;;  %v4694_v36 = vor.u32 %v5041_v14, %v4693_v49 }
 0x352   : > { %v2493_v44 = vpop.f32.mrf.mxu3  ;;  %v2831_v11 = vpop.f32.mrf.mxu1 }
 0x353   : > { %v2494_v62 = vadd.f32 %v2493_v44, %v7537_v57  ;;  %v4697_v44 = vld [vmem:[#allocation2 + $0xc0] sm:$0xf] }
 0x354   : > { %v4698_v12 = vor.u32 %v5043_v40, %v4697_v44 }
 0x355   : > { %v2743_v50 = vadd.f32 %v7013_v29, %v2494_v62  ;;  %v5044_v62 = vld [vmem:[#allocation2 + $0xd0] sm:$0xf0] }
 0x357   : > { %v7100_v55 = vadd.f32 %v2831_v11, %v2743_v50  ;;  %3484 = vmatmul.bf16.gmra.mxu3 %v4686_v25  ;;  %v7540_v25 = vld [vmem:[#allocation33_spill] sm:$0xff] }
 0x35a   : > { %v2496_v0 = vpop.f32.mrf.mxu3  ;;  %v2834_v2 = vpop.f32.mrf.mxu1 }
 0x35b   : > { %v2497_v37 = vadd.f32 %v2496_v0, %v7538_v19  ;;  %v4709_v19 = vld [vmem:[#allocation2 + $0xd8] sm:$0xf] }
 0x35d   : > { %v2746_v20 = vadd.f32 %v7022_v1, %v2497_v37  ;;  %3618 = vmatmul.bf16.gmra.mxu0 %v4798_v52  ;;  %3662 = vmatmul.bf16.gmra.mxu1 %v4694_v36  ;;  %v4705_v1 = vld [vmem:[#allocation2 + $0xc8] sm:$0xf]  ;;  %v5046_v52 = vld [vmem:[#allocation2 + $0xe0] sm:$0xf0] }
 0x35e   : > { %v4706_v14 = vor.u32 %v5044_v62, %v4705_v1  ;;  %v5049_v1 = vld [vmem:[#allocation2 + $0xf8] sm:$0xf0] }
 0x35f   : > { %v7106_v29 = vadd.f32 %v2834_v2, %v2746_v20  ;;  %v4710_v20 = vor.u32 %v5046_v52, %v4709_v19 }
 0x362   : > { %v2498_v35 = vpop.f32.mrf.mxu3  ;;  %v2836_v17 = vpop.f32.mrf.mxu1 }
 0x363   : > { %v2499_v53 = vadd.f32 %v2498_v35, %v7539_v28 }
 0x365   : > { %v2748_v11 = vadd.f32 %v7033_v13, %v2499_v53  ;;  %v7541_v13 = vld [vmem:[#allocation36_spill] sm:$0xff]  ;;  %v4717_v53 = vld [vmem:[#allocation2 + $0xe0] sm:$0xf] }
 0x367   : > { %v7110_v57 = vadd.f32 %v2836_v17, %v2748_v11  ;;  %3489 = vmatmul.bf16.gmra.mxu3 %v4698_v12  ;;  %v5047_v17 = vld [vmem:[#allocation2 + $0xe8] sm:$0xf0] }
 0x368   : > { %v4718_v11 = vor.u32 %v5047_v17, %v4717_v53 }
 0x36a   : > { %v2501_v63 = vpop.f32.mrf.mxu3  ;;  %v2839_v50 = vpop.f32.mrf.mxu1 }
 0x36b   : > { %v2502_v5 = vadd.f32 %v2501_v63, %v7540_v25  ;;  %v4721_v25 = vld [vmem:[#allocation2 + $0xf0] sm:$0xf] }
 0x36d   : > { %v2751_v0 = vadd.f32 %v7041_v15, %v2502_v5  ;;  %3667 = vmatmul.bf16.gmra.mxu1 %v4706_v14  ;;  %v7542_v15 = vld [vmem:[#allocation38_spill] sm:$0xff]  ;;  %v4722_v14 = vor.u32 %v5049_v1, %v4721_v25 }
 0x36e   : > { %v5053_v1 = vld [vmem:[#allocation2 + $0x118] sm:$0xf0] }
 0x36f   : > { %v7114_v2 = vadd.f32 %v2839_v50, %v2751_v0 }
 0x372   : > { %v2503_v60 = vpop.f32.mrf.mxu3  ;;  %v2841_v49 = vpop.f32.mrf.mxu1 }
 0x373   : > { %v2504_v37 = vadd.f32 %v2503_v60, %v7541_v13  ;;  %v5050_v60 = vld [vmem:[#allocation2 + $0x100] sm:$0xf0]  ;;  %v4729_v13 = vld [vmem:[#allocation2 + $0xf8] sm:$0xf] }
 0x374   : > { %v4730_v52 = vor.u32 %v5050_v60, %v4729_v13 }
 0x375   : > { %v2753_v36 = vadd.f32 %v7047_v45, %v2504_v37 }
 0x377   : > { %v7118_v35 = vadd.f32 %v2841_v49, %v2753_v36  ;;  %3494 = vmatmul.bf16.gmra.mxu3 %v4710_v20  ;;  %v7128_v49 = vpop.f32.mrf.mxu0 }
 0x37a   : > { %v2506_v40 = vpop.f32.mrf.mxu3  ;;  %v2844_v28 = vpop.f32.mrf.mxu1 }
 0x37b   : > { %v2507_v44 = vadd.f32 %v2506_v40, %v7542_v15 }
 0x37d   : > { %v2756_v12 = vadd.f32 %v7054_v46, %v2507_v44  ;;  %3672 = vmatmul.bf16.gmra.mxu1 %v4718_v11  ;;  %v4733_v44 = vld [vmem:[#allocation2 + $0x108] sm:$0xf] }
 0x37f   : > { %v7122_v62 = vadd.f32 %v2844_v28, %v2756_v12  ;;  %v5052_v28 = vld [vmem:[#allocation2 + $0x110] sm:$0xf0]  ;;  %v7138_v53 = vpop.f32.mrf.mxu0 }
 0x382   : > { %v2508_v63 = vpop.f32.mrf.mxu3  ;;  %v2846_v50 = vpop.f32.mrf.mxu1 }
 0x383   : > { %v2509_v45 = vadd.f32 %v2508_v63, %v6938_v31  ;;  %v7134_v31 = vld [vmem:[%s7420_s4] ss:$0 sm:$0xff]  ;;  %v4734_v63 = vor.u32 %v5052_v28, %v4733_v44  ;;  %v5055_v28 = vld [vmem:[#allocation2 + $0x128] sm:$0xf0] }
 0x385   : > { %v2758_v5 = vadd.f32 %v7062_v7, %v2509_v45 }
 0x387   : > { %v7126_v0 = vadd.f32 %v2846_v50, %v2758_v5  ;;  %3499 = vmatmul.bf16.gmra.mxu3 %v4722_v14  ;;  %v4741_v5 = vld [vmem:[#allocation2 + $0x110] sm:$0xf]  ;;  %v7143_v14 = vpop.f32.mrf.mxu2  ;;  %v7146_v13 = vpop.f32.mrf.mxu0 }
 0x38a   : > { %v3460_v19 = vpop.f32.mrf.mxu3  ;;  %v3638_v46 = vpop.f32.mrf.mxu1 }
 0x38b   : > { %v3550_v37 = vadd.f32 %v7068_v18, %v3460_v19 }
 0x38d   : > { %v3639_v36 = vadd.f32 %v3638_v46, %v3550_v37  ;;  %3677 = vmatmul.bf16.gmra.mxu1 %v4730_v52 }
 0x38f   : > { %v3718_v7 = vadd.f32 %v3639_v36, %v6945_v30 }
 0x391   : > { %v3754_v20 = vadd.f32 %v7134_v31, %v3718_v7 }
 0x392   : > { %v3462_v17 = vpop.f32.mrf.mxu3  ;;  %v3640_v40 = vpop.f32.mrf.mxu1 }
 0x393   : > { %v3786_v15 = vsub.f32 0.0, %v3754_v20  ;;  %v3552_v18 = vadd.f32 %v7075_v4, %v3462_v17  ;;  %v4742_v4 = vor.u32 %v5053_v1, %v4741_v5 }
 0x395   : > { %v3818_v11 = vmul.f32 1.442695, %v3786_v15  ;;  %v3641_v12 = vadd.f32 %v3640_v40, %v3552_v18  ;;  %v4745_v18 = vld [vmem:[#allocation2 + $0x120] sm:$0xf] }
 0x397   : > { %5318 = vpow2.f32 %v3818_v11  ;;  %v3719_v50 = vadd.f32 %v3641_v12, %v6953_v38  ;;  %3504 = vmatmul.bf16.gmra.mxu3 %v4734_v63  ;;  %v7151_v11 = vpop.f32.mrf.mxu2 }
 0x399   : > { %v3755_v30 = vadd.f32 %v7134_v31, %v3719_v50  ;;  %v4746_v50 = vor.u32 %v5055_v28, %v4745_v18 }
 0x39a   : > { %v3465_v45 = vpop.f32.mrf.mxu3  ;;  %v3643_v25 = vpop.f32.mrf.mxu1 }
 0x39b   : > { %v3787_v60 = vsub.f32 0.0, %v3755_v30  ;;  %v3555_v19 = vadd.f32 %v7082_v58, %v3465_v45  ;;  %v7153_v45 = vpop.f32.mrf.mxu0 }
 0x39d   : > { %v5319_v46 = vpop.eup %5318  ;;  %v3820_v37 = vmul.f32 1.442695, %v3787_v60  ;;  %v3644_v52 = vadd.f32 %v3643_v25, %v3555_v19  ;;  %3682 = vmatmul.bf16.gmra.mxu1 %v4742_v4  ;;  %v5447_v60 = vld [vmem:[%s5784_s16] sm:$0xff] }
 0x39e   : > { %v3882_v38 = vadd.f32 1.0, %v5319_v46 }
 0x39f   : > { %5320 = vpow2.f32 %v3820_v37  ;;  %v3720_v36 = vadd.f32 %v3644_v52, %v6960_v22  ;;  %v4753_v52 = vld [vmem:[#allocation2 + $0x128] sm:$0xf] }
 0x3a0   : > { %5322 = vrcp.f32 %v3882_v38 }
 0x3a1   : > { %v3756_v7 = vadd.f32 %v7134_v31, %v3720_v36 }
 0x3a2   : > { %v3467_v17 = vpop.f32.mrf.mxu3  ;;  %v3645_v40 = vpop.f32.mrf.mxu1 }
 0x3a3   : > { %v3788_v15 = vsub.f32 0.0, %v3756_v7  ;;  %v3557_v58 = vadd.f32 %v7090_v21, %v3467_v17  ;;  %v5056_v21 = vld [vmem:[#allocation2 + $0x130] sm:$0xf0] }
 0x3a5   : > { %v5321_v44 = vpop.eup %5320  ;;  %v3822_v12 = vmul.f32 1.442695, %v3788_v15  ;;  %v3646_v63 = vadd.f32 %v3645_v40, %v3557_v58  ;;  %v7164_v58 = vpop.f32.mrf.mxu2 }
 0x3a6   : > { %v5323_v1 = vpop.eup %5322  ;;  %v3883_v22 = vadd.f32 1.0, %v5321_v44 }
 0x3a7   : > { %v3946_v25 = vmul.f32 %v5323_v1, %v3754_v20  ;;  %5324 = vpow2.f32 %v3822_v12  ;;  %v3721_v5 = vadd.f32 %v3646_v63, %v6966_v59  ;;  %3509 = vmatmul.bf16.gmra.mxu3 %v4746_v50  ;;  %v4754_v59 = vor.u32 %v5056_v21, %v4753_v52  ;;  %v7167_v12 = vpop.f32.mrf.mxu0  ;;  %v5448_v63 = vld [vmem:[%s5784_s16 + $0x8] sm:$0xff] }
 0x3a8   : > { %5326 = vrcp.f32 %v3883_v22 }
 0x3a9   : > { %v3978_v19 = vadd.f32 %v5447_v60, %v3946_v25  ;;  %v3757_v4 = vadd.f32 %v7134_v31, %v3721_v5  ;;  %v5058_v25 = vld [vmem:[#allocation2 + $0x140] sm:$0xf0]  ;;  %v4757_v60 = vld [vmem:[#allocation2 + $0x138] sm:$0xf] }
 0x3aa   : > { %v3470_v46 = vpop.f32.mrf.mxu3  ;;  %v3648_v37 = vpop.f32.mrf.mxu1 }
 0x3ab   : > { %4010 = vst [vmem:[%s7160_s27] sm:$0xff] %v3978_v19  ;;  %v3789_v20 = vsub.f32 0.0, %v3757_v4  ;;  %v3560_v38 = vadd.f32 %v7096_v61, %v3470_v46 }
 0x3ad   : > { %v5325_v36 = vpop.eup %5324  ;;  %v3824_v17 = vmul.f32 1.442695, %v3789_v20  ;;  %v3649_v40 = vadd.f32 %v3648_v37, %v3560_v38  ;;  %3687 = vmatmul.bf16.gmra.mxu1 %v4754_v59  ;;  %v5059_v59 = vld [vmem:[#allocation2 + $0x148] sm:$0xf0] }
 0x3ae   : > { %v5327_v28 = vpop.eup %5326  ;;  %v3884_v15 = vadd.f32 1.0, %v5325_v36  ;;  %v7174_v36 = vpop.f32.mrf.mxu2 }
 0x3af   : > { %v3947_v18 = vmul.f32 %v5327_v28, %v3755_v30  ;;  %5328 = vpow2.f32 %v3824_v17  ;;  %v3722_v44 = vadd.f32 %v3649_v40, %v6973_v47  ;;  %v4758_v47 = vor.u32 %v5058_v25, %v4757_v60  ;;  %v5449_v17 = vld [vmem:[%s5784_s16 + $0x10] sm:$0xff] }
 0x3b0   : > { %5330 = vrcp.f32 %v3884_v15 }
 0x3b1   : > { %v3979_v50 = vadd.f32 %v5448_v63, %v3947_v18  ;;  %v3758_v61 = vadd.f32 %v7134_v31, %v3722_v44  ;;  %v4765_v18 = vld [vmem:[#allocation2 + $0x140] sm:$0xf]  ;;  %v7178_v44 = vpop.f32.mrf.mxu0 }
 0x3b2   : > { %v3472_v1 = vpop.f32.mrf.mxu3  ;;  %v3650_v22 = vpop.f32.mrf.mxu1 }
 0x3b3   : > { %4011 = vst [vmem:[%s7160_s27 + $0x8] sm:$0xff] %v3979_v50  ;;  %v3790_v5 = vsub.f32 0.0, %v3758_v61  ;;  %v3562_v21 = vadd.f32 %v7103_v27, %v3472_v1 }
 0x3b5   : > { %v5329_v30 = vpop.eup %5328  ;;  %v3826_v19 = vmul.f32 1.442695, %v3790_v5  ;;  %v3651_v46 = vadd.f32 %v3650_v22, %v3562_v21 }
 0x3b6   : > { %v5331_v37 = vpop.eup %5330  ;;  %v3885_v52 = vadd.f32 1.0, %v5329_v30  ;;  %v5450_v30 = vld [vmem:[%s5784_s16 + $0x18] sm:$0xff] }
 0x3b7   : > { %v3948_v20 = vmul.f32 %v5331_v37, %v3756_v7  ;;  %5332 = vpow2.f32 %v3826_v19  ;;  %v3723_v38 = vadd.f32 %v3651_v46, %v6981_v16  ;;  %3514 = vmatmul.bf16.gmra.mxu3 %v4758_v47  ;;  %v4766_v16 = vor.u32 %v5059_v59, %v4765_v18  ;;  %v5061_v37 = vld [vmem:[#allocation2 + $0x158] sm:$0xf0] }
 0x3b8   : > { %5334 = vrcp.f32 %v3885_v52  ;;  %v7187_v52 = vpop.f32.mrf.mxu2 }
 0x3b9   : > { %v3980_v40 = vadd.f32 %v5449_v17, %v3948_v20  ;;  %v3759_v27 = vadd.f32 %v7134_v31, %v3723_v38  ;;  %v4769_v38 = vld [vmem:[#allocation2 + $0x150] sm:$0xf] }
 0x3ba   : > { %v3475_v28 = vpop.f32.mrf.mxu3  ;;  %v3653_v15 = vpop.f32.mrf.mxu1 }
 0x3bb   : > { %4012 = vst [vmem:[%s7160_s27 + $0x10] sm:$0xff] %v3980_v40  ;;  %v3791_v7 = vsub.f32 0.0, %v3759_v27  ;;  %v3565_v63 = vadd.f32 %v7128_v49, %v3475_v28  ;;  %v4770_v28 = vor.u32 %v5061_v37, %v4769_v38 }
 0x3bd   : > { %v5333_v50 = vpop.eup %5332  ;;  %v3828_v1 = vmul.f32 1.442695, %v3791_v7  ;;  %v3654_v22 = vadd.f32 %v3653_v15, %v3565_v63  ;;  %3692 = vmatmul.bf16.gmra.mxu1 %v4766_v16  ;;  %v5062_v16 = vld [vmem:[#allocation2 + $0x160] sm:$0xf0] }
 0x3be   : > { %v5335_v25 = vpop.eup %5334  ;;  %v3886_v5 = vadd.f32 1.0, %v5333_v50  ;;  %v5451_v50 = vld [vmem:[%s5784_s16 + $0x20] sm:$0xff] }
 0x3bf   : > { %v3949_v21 = vmul.f32 %v5335_v25, %v3757_v4  ;;  %5336 = vpow2.f32 %v3828_v1  ;;  %v3724_v60 = vadd.f32 %v3654_v22, %v6988_v39  ;;  %v7192_v39 = vpop.f32.mrf.mxu0 }
 0x3c0   : > { %5338 = vrcp.f32 %v3886_v5  ;;  %v4777_v5 = vld [vmem:[#allocation2 + $0x158] sm:$0xf] }
 0x3c1   : > { %v3981_v19 = vadd.f32 %v5450_v30, %v3949_v21  ;;  %v7185_v46 = vadd.f32 %v7134_v31, %v3724_v60  ;;  %v4778_v60 = vor.u32 %v5062_v16, %v4777_v5 }
 0x3c2   : > { %v3477_v47 = vpop.f32.mrf.mxu3  ;;  %v3655_v49 = vpop.f32.mrf.mxu1 }
 0x3c3   : > { %4013 = vst [vmem:[%s7160_s27 + $0x18] sm:$0xff] %v3981_v19  ;;  %v3792_v20 = vsub.f32 0.0, %v7185_v46  ;;  %v3567_v4 = vadd.f32 %v7138_v53, %v3477_v47  ;;  %v7204_v19 = vpop.f32.mrf.mxu2 }
 0x3c5   : > { %v5337_v59 = vpop.eup %5336  ;;  %v3830_v17 = vmul.f32 1.442695, %v3792_v20  ;;  %v3656_v40 = vadd.f32 %v3655_v49, %v3567_v4 }
 0x3c6   : > { %v5339_v15 = vpop.eup %5338  ;;  %v3887_v18 = vadd.f32 1.0, %v5337_v59 }
 0x3c7   : > { %v3950_v7 = vmul.f32 %v5339_v15, %v3758_v61  ;;  %5340 = vpow2.f32 %v3830_v17  ;;  %v3725_v63 = vadd.f32 %v3656_v40, %v6998_v42  ;;  %3519 = vmatmul.bf16.gmra.mxu3 %v4770_v28  ;;  %v2879_v42 = vadd.f32 %v7143_v14, %v6992_v23  ;;  %v7206_v4 = vpop.f32.mrf.mxu0  ;;  %v5064_v28 = vld [vmem:[#allocation2 + $0x170] sm:$0xf0] }
 0x3c8   : > { %5342 = vrcp.f32 %v3887_v18 }
 0x3c9   : > { %v3982_v1 = vadd.f32 %v5451_v50, %v3950_v7  ;;  %v7197_v53 = vadd.f32 %v7134_v31, %v3725_v63  ;;  %v4781_v7 = vld [vmem:[#allocation2 + $0x168] sm:$0xf] }
 0x3ca   : > { %v3480_v22 = vpop.f32.mrf.mxu3  ;;  %v3658_v25 = vpop.f32.mrf.mxu1 }
 0x3cb   : > { %4014 = vst [vmem:[%s7160_s27 + $0x20] sm:$0xff] %v3982_v1  ;;  %v3793_v21 = vsub.f32 0.0, %v7197_v53  ;;  %v3570_v61 = vadd.f32 %v7146_v13, %v3480_v22  ;;  %v5452_v13 = vld [vmem:[%s5784_s16 + $0x28] sm:$0xff]  ;;  %v4782_v1 = vor.u32 %v5064_v28, %v4781_v7  ;;  %v7217_v5 = vpop.f32.mrf.mxu2  ;;  %v5454_v7 = vld [vmem:[%s5784_s16 + $0x38] sm:$0xff] }
 0x3cd   : > { %v5341_v30 = vpop.eup %5340  ;;  %v3832_v47 = vmul.f32 1.442695, %v3793_v21  ;;  %v3659_v49 = vadd.f32 %v3658_v25, %v3570_v61  ;;  %3697 = vmatmul.bf16.gmra.mxu1 %v4778_v60 }
 0x3ce   : > { %v5343_v37 = vpop.eup %5342  ;;  %v3888_v20 = vadd.f32 1.0, %v5341_v30  ;;  %v5453_v30 = vld [vmem:[%s5784_s16 + $0x30] sm:$0xff] }
 0x3cf   : > { %v3951_v38 = vmul.f32 %v5343_v37, %v3759_v27  ;;  %5344 = vpow2.f32 %v3832_v47  ;;  %v3726_v59 = vadd.f32 %v3659_v49, %v2879_v42  ;;  %v2881_v27 = vadd.f32 %v7151_v11, %v7001_v9  ;;  %v7220_v60 = vpop.f32.mrf.mxu0  ;;  %v4789_v49 = vld [vmem:[#allocation2 + $0x170] sm:$0xf] }
 0x3d0   : > { %5346 = vrcp.f32 %v3888_v20 }
 0x3d1   : > { %v3983_v17 = vadd.f32 %v5452_v13, %v3951_v38  ;;  %v7210_v40 = vadd.f32 %v7134_v31, %v3726_v59  ;;  %v2884_v59 = vadd.f32 %v7164_v58, %v7009_v3  ;;  %v5067_v58 = vld [vmem:[#allocation2 + $0x188] sm:$0xf0] }
 0x3d2   : > { %v3482_v23 = vpop.f32.mrf.mxu3  ;;  %v3660_v14 = vpop.f32.mrf.mxu1 }
 0x3d3   : > { %4015 = vst [vmem:[%s7160_s27 + $0x28] sm:$0xff] %v3983_v17  ;;  %v3794_v15 = vsub.f32 0.0, %v7210_v40  ;;  %v3572_v18 = vadd.f32 %v7153_v45, %v3482_v23  ;;  %v5065_v45 = vld [vmem:[#allocation2 + $0x178] sm:$0xf0] }
 0x3d4   : > { %v4790_v20 = vor.u32 %v5065_v45, %v4789_v49  ;;  %v5068_v49 = vld [vmem:[#allocation2 + $0x190] sm:$0xf0] }
 0x3d5   : > { %v5345_v63 = vpop.eup %5344  ;;  %v3834_v16 = vmul.f32 1.442695, %v3794_v15  ;;  %v3661_v50 = vadd.f32 %v3660_v14, %v3572_v18  ;;  %v7232_v18 = vpop.f32.mrf.mxu2 }
 0x3d6   : > { %v5347_v22 = vpop.eup %5346  ;;  %v3889_v25 = vadd.f32 1.0, %v5345_v63 }
 0x3d7   : > { %v3952_v21 = vmul.f32 %v5347_v22, %v7185_v46  ;;  %5348 = vpow2.f32 %v3834_v16  ;;  %v3727_v61 = vadd.f32 %v3661_v50, %v2881_v27  ;;  %3524 = vmatmul.bf16.gmra.mxu3 %v4782_v1  ;;  %v7238_v16 = vpop.f32.mrf.mxu0  ;;  %v4793_v1 = vld [vmem:[#allocation2 + $0x180] sm:$0xf] }
 0x3d8   : > { %5350 = vrcp.f32 %v3889_v25  ;;  %v2886_v25 = vadd.f32 %v7174_v36, %v7016_v24  ;;  %v4794_v45 = vor.u32 %v5067_v58, %v4793_v1  ;;  %v4801_v36 = vld [vmem:[#allocation2 + $0x188] sm:$0xf]  ;;  %v5456_v58 = vld [vmem:[%s5784_s16 + $0x48] sm:$0xff] }
 0x3d9   : > { %v3984_v42 = vadd.f32 %v5453_v30, %v3952_v21  ;;  %v7224_v9 = vadd.f32 %v7134_v31, %v3727_v61 }
 0x3da   : > { %v3485_v11 = vpop.f32.mrf.mxu3  ;;  %v3663_v47 = vpop.f32.mrf.mxu1 }
 0x3db   : > { %4016 = vst [vmem:[%s7160_s27 + $0x30] sm:$0xff] %v3984_v42  ;;  %v3795_v37 = vsub.f32 0.0, %v7224_v9  ;;  %v3575_v46 = vadd.f32 %v7167_v12, %v3485_v11 }
 0x3dd   : > { %v5349_v38 = vpop.eup %5348  ;;  %v3836_v13 = vmul.f32 1.442695, %v3795_v37  ;;  %v3664_v17 = vadd.f32 %v3663_v47, %v3575_v46  ;;  %3702 = vmatmul.bf16.gmra.mxu1 %v4790_v20  ;;  %v5455_v37 = vld [vmem:[%s5784_s16 + $0x40] sm:$0xff] }
 0x3de   : > { %v5351_v23 = vpop.eup %5350  ;;  %v3890_v14 = vadd.f32 1.0, %v5349_v38  ;;  %v7250_v38 = vpop.f32.mrf.mxu2 }
 0x3df   : > { %v3953_v28 = vmul.f32 %v5351_v23, %v7197_v53  ;;  %5352 = vpow2.f32 %v3836_v13  ;;  %v3728_v15 = vadd.f32 %v3664_v17, %v2884_v59  ;;  %v4802_v13 = vor.u32 %v5068_v49, %v4801_v36  ;;  %v5457_v36 = vld [vmem:[%s5784_s16 + $0x50] sm:$0xff] }
 0x3e0   : > { %5354 = vrcp.f32 %v3890_v14  ;;  %v2889_v23 = vadd.f32 %v7187_v52, %v7024_v10  ;;  %v7257_v14 = vpop.f32.mrf.mxu0 }
 0x3e1   : > { %v3985_v12 = vadd.f32 %v5454_v7, %v3953_v28  ;;  %v7236_v63 = vadd.f32 %v7134_v31, %v3728_v15 }
 0x3e2   : > { %v3487_v27 = vpop.f32.mrf.mxu3  ;;  %v3665_v3 = vpop.f32.mrf.mxu1 }
 0x3e3   : > { %4017 = vst [vmem:[%s7160_s27 + $0x38] sm:$0xff] %v3985_v12  ;;  %v3796_v50 = vsub.f32 0.0, %v7236_v63  ;;  %v3577_v53 = vadd.f32 %v7178_v44, %v3487_v27 }
 0x3e5   : > { %v5353_v22 = vpop.eup %5352  ;;  %v3838_v21 = vmul.f32 1.442695, %v3796_v50  ;;  %v3666_v61 = vadd.f32 %v3665_v3, %v3577_v53 }
 0x3e6   : > { %v5355_v30 = vpop.eup %5354  ;;  %v3891_v42 = vadd.f32 1.0, %v5353_v22  ;;  %v5069_v22 = vld [vmem:[#allocation2 + $0x19c] sm:$0xf] }
 0x3e7   : > { %v3954_v11 = vmul.f32 %v5355_v30, %v7210_v40  ;;  %5356 = vpow2.f32 %v3838_v21  ;;  %v3729_v47 = vadd.f32 %v3666_v61, %v2886_v25  ;;  %3529 = vmatmul.bf16.gmra.mxu3 %v4794_v45  ;;  %v4807_v25 = vld [vmem:[#allocation2 + $0x1a4] sm:$0xf0]  ;;  %v4805_v61 = vld [vmem:[#allocation2 + $0x198] sm:$0xf]  ;;  %v2891_v30 = vadd.f32 %v7204_v19, %v7029_v34 }
 0x3e8   : > { %5358 = vrcp.f32 %v3891_v42  ;;  %v4810_v21 = vor.u32 %v5069_v22, %v4807_v25  ;;  %v7269_v42 = vpop.f32.mrf.mxu2 }
 0x3e9   : > { %v3986_v44 = vadd.f32 %v5455_v37, %v3954_v11  ;;  %v7248_v46 = vadd.f32 %v7134_v31, %v3729_v47 }
 0x3ea   : > { %v3490_v20 = vpop.f32.mrf.mxu3  ;;  %v3668_v24 = vpop.f32.mrf.mxu1  ;;  %3623 = vmatmul.bf16.gmra.mxu0 %v4810_v21 }
 0x3eb   : > { %4018 = vst [vmem:[%s7160_s27 + $0x40] sm:$0xff] %v3986_v44  ;;  %v3797_v59 = vsub.f32 0.0, %v7248_v46  ;;  %v3580_v40 = vadd.f32 %v7192_v39, %v3490_v20 }
 0x3ed   : > { %v5357_v17 = vpop.eup %5356  ;;  %v3840_v28 = vmul.f32 1.442695, %v3797_v59  ;;  %v3669_v15 = vadd.f32 %v3668_v24, %v3580_v40  ;;  %3707 = vmatmul.bf16.gmra.mxu1 %v4802_v13 }
 0x3ee   : > { %v5359_v7 = vpop.eup %5358  ;;  %v3892_v12 = vadd.f32 1.0, %v5357_v17 }
 0x3ef   : > { %v3955_v27 = vmul.f32 %v5359_v7, %v7224_v9  ;;  %5360 = vpow2.f32 %v3840_v28  ;;  %v3730_v3 = vadd.f32 %v3669_v15, %v2889_v23  ;;  %v5070_v9 = vld [vmem:[#allocation2 + $0x1a0] sm:$0xf0]  ;;  %v4813_v23 = vld [vmem:[#allocation2 + $0x1a0] sm:$0xf]  ;;  %v5071_v28 = vld [vmem:[#allocation2 + $0x1a8] sm:$0xf0] }
 0x3f0   : > { %5362 = vrcp.f32 %v3892_v12  ;;  %v4806_v49 = vor.u32 %v5070_v9, %v4805_v61  ;;  %v4814_v15 = vor.u32 %v5071_v28, %v4813_v23 }
 0x3f1   : > { %v3987_v39 = vadd.f32 %v5456_v58, %v3955_v27  ;;  %v7262_v50 = vadd.f32 %v7134_v31, %v3730_v3 }
 0x3f2   : > { %v3492_v53 = vpop.f32.mrf.mxu3  ;;  %v3670_v10 = vpop.f32.mrf.mxu1 }
 0x3f3   : > { %4019 = vst [vmem:[%s7160_s27 + $0x48] sm:$0xff] %v3987_v39  ;;  %v3798_v52 = vsub.f32 0.0, %v7262_v50  ;;  %v3582_v1 = vadd.f32 %v7206_v4, %v3492_v53  ;;  %v7271_v4 = vpop.f32.mrf.mxu0  ;;  %v7280_v39 = vpop.f32.mrf.mxu2 }
 0x3f5   : > { %v5361_v45 = vpop.eup %5360  ;;  %v3842_v11 = vmul.f32 1.442695, %v3798_v52  ;;  %v3671_v47 = vadd.f32 %v3670_v10, %v3582_v1  ;;  %v5458_v52 = vld [vmem:[%s5784_s16 + $0x58] sm:$0xff] }
 0x3f6   : > { %v5363_v37 = vpop.eup %5362  ;;  %v3893_v44 = vadd.f32 1.0, %v5361_v45 }
 0x3f7   : > { %v3956_v20 = vmul.f32 %v5363_v37, %v7236_v63  ;;  %5364 = vpow2.f32 %v3842_v11  ;;  %v3731_v24 = vadd.f32 %v3671_v47, %v2891_v30  ;;  %3534 = vmatmul.bf16.gmra.mxu3 %v4806_v49  ;;  %v2894_v63 = vadd.f32 %v7217_v5, %v7037_v48 }
 0x3f8   : > { %5366 = vrcp.f32 %v3893_v44  ;;  %v5459_v44 = vld [vmem:[%s5784_s16 + $0x60] sm:$0xff] }
 0x3f9   : > { %v3988_v59 = vadd.f32 %v5457_v36, %v3956_v20  ;;  %v3767_v34 = vadd.f32 %v7134_v31, %v3731_v24 }
 0x3fa   : > { %v3495_v19 = vpop.f32.mrf.mxu3  ;;  %v3673_v40 = vpop.f32.mrf.mxu1 }
 0x3fb   : > { %4020 = vst [vmem:[%s7160_s27 + $0x50] sm:$0xff] %v3988_v59  ;;  %v3799_v13 = vsub.f32 0.0, %v3767_v34  ;;  %v3585_v17 = vadd.f32 %v7220_v60, %v3495_v19  ;;  %v7283_v10 = vpop.f32.mrf.mxu0  ;;  %v7292_v37 = vpop.f32.mrf.mxu2 }
 0x3fd   : > { %v5365_v7 = vpop.eup %5364  ;;  %v3844_v12 = vmul.f32 1.442695, %v3799_v13  ;;  %v3674_v27 = vadd.f32 %v3673_v40, %v3585_v17  ;;  %3712 = vmatmul.bf16.gmra.mxu1 %v4814_v15 }
 0x3fe   : > { %v5367_v3 = vpop.eup %5366  ;;  %v3894_v58 = vadd.f32 1.0, %v5365_v7  ;;  %v5460_v7 = vld [vmem:[%s5784_s16 + $0x68] sm:$0xff] }
 0x3ff   : > { %v3957_v53 = vmul.f32 %v5367_v3, %v7248_v46  ;;  %5368 = vpow2.f32 %v3844_v12  ;;  %v3732_v60 = vadd.f32 %v3674_v27, %v2894_v63  ;;  %v2896_v46 = vadd.f32 %v7232_v18, %v7044_v51 }
 0x400   : > { %5370 = vrcp.f32 %v3894_v58 }
 0x401   : > { %v3989_v1 = vadd.f32 %v5458_v52, %v3957_v53  ;;  %v3768_v22 = vadd.f32 %v7134_v31, %v3732_v60 }
 0x402   : > { %v3497_v48 = vpop.f32.mrf.mxu3  ;;  %v3675_v5 = vpop.f32.mrf.mxu1 }
 0x403   : > { %4021 = vst [vmem:[%s7160_s27 + $0x58] sm:$0xff] %v3989_v1  ;;  %v3800_v25 = vsub.f32 0.0, %v3768_v22  ;;  %v3587_v21 = vadd.f32 %v7238_v16, %v3497_v48  ;;  %v3596_v51 = vpop.f32.mrf.mxu0 }
 0x405   : > { %v5369_v61 = vpop.eup %5368  ;;  %v3846_v9 = vmul.f32 1.442695, %v3800_v25  ;;  %v3676_v45 = vadd.f32 %v3675_v5, %v3587_v21  ;;  %v5461_v21 = vld [vmem:[%s5784_s16 + $0x70] sm:$0xff] }
 0x406   : > { %v5371_v30 = vpop.eup %5370  ;;  %v3895_v11 = vadd.f32 1.0, %v5369_v61 }
 0x407   : > { %v3958_v47 = vmul.f32 %v5371_v30, %v7262_v50  ;;  %5372 = vpow2.f32 %v3846_v9  ;;  %v3733_v49 = vadd.f32 %v3676_v45, %v2896_v46  ;;  %v2899_v50 = vadd.f32 %v7250_v38, %v7050_v6 }
 0x408   : > { %5374 = vrcp.f32 %v3895_v11  ;;  %v2904_v30 = vadd.f32 %v7280_v39, %v7060_v54 }
 0x409   : > { %v3990_v20 = vadd.f32 %v5459_v44, %v3958_v47  ;;  %v3769_v16 = vadd.f32 %v7134_v31, %v3733_v49 }
 0x40a   : > { %v3500_v24 = vpop.f32.mrf.mxu3  ;;  %v3678_v36 = vpop.f32.mrf.mxu1 }
 0x40b   : > { %4022 = vst [vmem:[%s7160_s27 + $0x60] sm:$0xff] %v3990_v20  ;;  %v3801_v18 = vsub.f32 0.0, %v3769_v16  ;;  %v3590_v59 = vadd.f32 %v7257_v14, %v3500_v24  ;;  %v7302_v14 = vpop.f32.mrf.mxu2  ;;  %v3599_v53 = vpop.f32.mrf.mxu0 }
 0x40d   : > { %v5373_v19 = vpop.eup %5372  ;;  %v3848_v40 = vmul.f32 1.442695, %v3801_v18  ;;  %v3679_v13 = vadd.f32 %v3678_v36, %v3590_v59  ;;  %v5462_v18 = vld [vmem:[%s5784_s16 + $0x78] sm:$0xff] }
 0x40e   : > { %v5375_v17 = vpop.eup %5374  ;;  %v3896_v23 = vadd.f32 1.0, %v5373_v19 }
 0x40f   : > { %v3959_v28 = vmul.f32 %v5375_v17, %v3767_v34  ;;  %5376 = vpow2.f32 %v3848_v40  ;;  %v3734_v15 = vadd.f32 %v3679_v13, %v2899_v50  ;;  %v2901_v34 = vadd.f32 %v7269_v42, %v7056_v43 }
 0x410   : > { %5378 = vrcp.f32 %v3896_v23  ;;  %v2906_v13 = vadd.f32 %v7292_v37, %v7066_v32 }
 0x411   : > { %v3991_v63 = vadd.f32 %v5460_v7, %v3959_v28  ;;  %v3770_v12 = vadd.f32 %v7134_v31, %v3734_v15 }
 0x412   : > { %v3502_v27 = vpop.f32.mrf.mxu3  ;;  %v3680_v3 = vpop.f32.mrf.mxu1 }
 0x413   : > { %4023 = vst [vmem:[%s7160_s27 + $0x68] sm:$0xff] %v3991_v63  ;;  %v3802_v58 = vsub.f32 0.0, %v3770_v12  ;;  %v3592_v6 = vadd.f32 %v7271_v4, %v3502_v27  ;;  %v3601_v20 = vpop.f32.mrf.mxu0 }
 0x415   : > { %v5377_v38 = vpop.eup %5376  ;;  %v3850_v60 = vmul.f32 1.442695, %v3802_v58  ;;  %v3681_v52 = vadd.f32 %v3680_v3, %v3592_v6  ;;  %v5463_v3 = vld [vmem:[%s5784_s16 + $0x80] sm:$0xff] }
 0x416   : > { %v5379_v1 = vpop.eup %5378  ;;  %v3897_v48 = vadd.f32 1.0, %v5377_v38 }
 0x417   : > { %v3960_v5 = vmul.f32 %v5379_v1, %v3768_v22  ;;  %5380 = vpow2.f32 %v3850_v60  ;;  %v3735_v25 = vadd.f32 %v3681_v52, %v2901_v34  ;;  %v2910_v22 = vpop.f32.mrf.mxu2  ;;  %v2909_v60 = vadd.f32 %v7302_v14, %v7072_v41 }
 0x418   : > { %5382 = vrcp.f32 %v3897_v48 }
 0x419   : > { %v3992_v61 = vadd.f32 %v5461_v21, %v3960_v5  ;;  %v3771_v46 = vadd.f32 %v7134_v31, %v3735_v25 }
 0x41a   : > { %v3505_v9 = vpop.f32.mrf.mxu3  ;;  %v3683_v4 = vpop.f32.mrf.mxu1 }
 0x41b   : > { %4024 = vst [vmem:[%s7160_s27 + $0x70] sm:$0xff] %v3992_v61  ;;  %v3803_v45 = vsub.f32 0.0, %v3771_v46  ;;  %v3595_v43 = vadd.f32 %v7283_v10, %v3505_v9  ;;  %v3604_v27 = vpop.f32.mrf.mxu0  ;;  %v5464_v61 = vld [vmem:[%s5784_s16 + $0x88] sm:$0xff] }
 0x41d   : > { %v5381_v42 = vpop.eup %5380  ;;  %v3852_v11 = vmul.f32 1.442695, %v3803_v45  ;;  %v3684_v47 = vadd.f32 %v3683_v4, %v3595_v43 }
 0x41e   : > { %v5383_v49 = vpop.eup %5382  ;;  %v3898_v44 = vadd.f32 1.0, %v5381_v42 }
 0x41f   : > { %v3961_v24 = vmul.f32 %v5383_v49, %v3769_v16  ;;  %5384 = vpow2.f32 %v3852_v11  ;;  %v3736_v36 = vadd.f32 %v3684_v47, %v2904_v30  ;;  %v2913_v15 = vpop.f32.mrf.mxu2  ;;  %v2911_v30 = vadd.f32 %v2910_v22, %v7078_v8 }
 0x420   : > { %5386 = vrcp.f32 %v3898_v44  ;;  %v2914_v22 = vadd.f32 %v2913_v15, %v7084_v33 }
 0x421   : > { %v3993_v59 = vadd.f32 %v5462_v18, %v3961_v24  ;;  %v3772_v19 = vadd.f32 %v7134_v31, %v3736_v36  ;;  %v5465_v36 = vld [vmem:[%s5784_s16 + $0x90] sm:$0xff] }
 0x422   : > { %v3507_v10 = vpop.f32.mrf.mxu3  ;;  %v3685_v50 = vpop.f32.mrf.mxu1 }
 0x423   : > { %4025 = vst [vmem:[%s7160_s27 + $0x78] sm:$0xff] %v3993_v59  ;;  %v3804_v54 = vsub.f32 0.0, %v3772_v19  ;;  %v3597_v39 = vadd.f32 %v3596_v51, %v3507_v10  ;;  %v3606_v43 = vpop.f32.mrf.mxu0 }
 0x425   : > { %v5385_v40 = vpop.eup %5384  ;;  %v3854_v17 = vmul.f32 1.442695, %v3804_v54  ;;  %v3686_v16 = vadd.f32 %v3685_v50, %v3597_v39 }
 0x426   : > { %v5387_v23 = vpop.eup %5386  ;;  %v3899_v28 = vadd.f32 1.0, %v5385_v40 }
 0x427   : > { %v3962_v7 = vmul.f32 %v5387_v23, %v3770_v12  ;;  %5388 = vpow2.f32 %v3854_v17  ;;  %v3737_v63 = vadd.f32 %v3686_v16, %v2906_v13  ;;  %v2915_v21 = vpop.f32.mrf.mxu2 }
 0x428   : > { %5390 = vrcp.f32 %v3899_v28  ;;  %v2916_v15 = vadd.f32 %v2915_v21, %v7088_v26 }
 0x429   : > { %v3994_v58 = vadd.f32 %v5463_v3, %v3962_v7  ;;  %v3773_v6 = vadd.f32 %v7134_v31, %v3737_v63  ;;  %v5466_v7 = vld [vmem:[%s5784_s16 + $0x98] sm:$0xff] }
 0x42a   : > { %v3510_v51 = vpop.f32.mrf.mxu3  ;;  %v3688_v38 = vpop.f32.mrf.mxu1 }
 0x42b   : > { %4026 = vst [vmem:[%s7160_s27 + $0x80] sm:$0xff] %v3994_v58  ;;  %v3805_v32 = vsub.f32 0.0, %v3773_v6  ;;  %v3600_v37 = vadd.f32 %v3599_v53, %v3510_v51  ;;  %v3609_v40 = vpop.f32.mrf.mxu0 }
 0x42d   : > { %v5389_v34 = vpop.eup %5388  ;;  %v3856_v12 = vmul.f32 1.442695, %v3805_v32  ;;  %v3689_v52 = vadd.f32 %v3688_v38, %v3600_v37 }
 0x42e   : > { %v5391_v1 = vpop.eup %5390  ;;  %v3900_v48 = vadd.f32 1.0, %v5389_v34 }
 0x42f   : > { %v3963_v5 = vmul.f32 %v5391_v1, %v3771_v46  ;;  %5392 = vpow2.f32 %v3856_v12  ;;  %v3738_v25 = vadd.f32 %v3689_v52, %v2909_v60 }
 0x430   : > { %5394 = vrcp.f32 %v3900_v48  ;;  %v5467_v48 = vld [vmem:[%s5784_s16 + $0xa0] sm:$0xff] }
 0x431   : > { %v3995_v9 = vadd.f32 %v5464_v61, %v3963_v5  ;;  %v3774_v4 = vadd.f32 %v7134_v31, %v3738_v25 }
 0x432   : > { %v3512_v45 = vpop.f32.mrf.mxu3  ;;  %v3690_v53 = vpop.f32.mrf.mxu1 }
 0x433   : > { %4027 = vst [vmem:[%s7160_s27 + $0x88] sm:$0xff] %v3995_v9  ;;  %v3806_v41 = vsub.f32 0.0, %v3774_v4  ;;  %v3602_v14 = vadd.f32 %v3601_v20, %v3512_v45  ;;  %v2918_v20 = vpop.f32.mrf.mxu2  ;;  %v3611_v12 = vpop.f32.mrf.mxu0 }
 0x435   : > { %v5393_v42 = vpop.eup %5392  ;;  %v3858_v46 = vmul.f32 1.442695, %v3806_v41  ;;  %v3691_v11 = vadd.f32 %v3690_v53, %v3602_v14  ;;  %v2919_v53 = vadd.f32 %v2918_v20, %v7094_v56 }
 0x436   : > { %v5395_v47 = vpop.eup %5394  ;;  %v3901_v49 = vadd.f32 1.0, %v5393_v42 }
 0x437   : > { %v3964_v44 = vmul.f32 %v5395_v47, %v3772_v19  ;;  %5396 = vpow2.f32 %v3858_v46  ;;  %v3739_v24 = vadd.f32 %v3691_v11, %v2911_v30  ;;  %v5468_v47 = vld [vmem:[%s5784_s16 + $0xa8] sm:$0xff] }
 0x438   : > { %5398 = vrcp.f32 %v3901_v49 }
 0x439   : > { %v3996_v18 = vadd.f32 %v5465_v36, %v3964_v44  ;;  %v3775_v59 = vadd.f32 %v7134_v31, %v3739_v24 }
 0x43a   : > { %v3515_v10 = vpop.f32.mrf.mxu3  ;;  %v3693_v50 = vpop.f32.mrf.mxu1 }
 0x43b   : > { %4028 = vst [vmem:[%s7160_s27 + $0x90] sm:$0xff] %v3996_v18  ;;  %v3807_v54 = vsub.f32 0.0, %v3775_v59  ;;  %v3605_v39 = vadd.f32 %v3604_v27, %v3515_v10  ;;  %v2920_v32 = vpop.f32.mrf.mxu2  ;;  %v3614_v11 = vpop.f32.mrf.mxu0 }
 0x43d   : > { %v5397_v8 = vpop.eup %5396  ;;  %v3860_v19 = vmul.f32 1.442695, %v3807_v54  ;;  %v3694_v13 = vadd.f32 %v3693_v50, %v3605_v39  ;;  %v2921_v50 = vadd.f32 %v2920_v32, %v7100_v55 }
 0x43e   : > { %v5399_v17 = vpop.eup %5398  ;;  %v3902_v16 = vadd.f32 1.0, %v5397_v8 }
 0x43f   : > { %v3965_v23 = vmul.f32 %v5399_v17, %v3773_v6  ;;  %5400 = vpow2.f32 %v3860_v19  ;;  %v3740_v28 = vadd.f32 %v3694_v13, %v2914_v22  ;;  %v5469_v19 = vld [vmem:[%s5784_s16 + $0xb0] sm:$0xff] }
 0x440   : > { %5402 = vrcp.f32 %v3902_v16 }
 0x441   : > { %v3997_v63 = vadd.f32 %v5466_v7, %v3965_v23  ;;  %v3776_v3 = vadd.f32 %v7134_v31, %v3740_v28 }
 0x442   : > { %v3517_v58 = vpop.f32.mrf.mxu3  ;;  %v3695_v51 = vpop.f32.mrf.mxu1 }
 0x443   : > { %4029 = vst [vmem:[%s7160_s27 + $0x98] sm:$0xff] %v3997_v63  ;;  %v3808_v27 = vsub.f32 0.0, %v3776_v3  ;;  %v3607_v38 = vadd.f32 %v3606_v43, %v3517_v58  ;;  %v2923_v42 = vpop.f32.mrf.mxu2  ;;  %v3616_v55 = vpop.f32.mrf.mxu0 }
 0x444   : > { %v2924_v58 = vadd.f32 %v2923_v42, %v7106_v29 }
 0x445   : > { %v5401_v33 = vpop.eup %5400  ;;  %v3862_v37 = vmul.f32 1.442695, %v3808_v27  ;;  %v3696_v6 = vadd.f32 %v3695_v51, %v3607_v38 }
 0x446   : > { %v5403_v34 = vpop.eup %5402  ;;  %v3903_v60 = vadd.f32 1.0, %v5401_v33 }
 0x447   : > { %v3966_v52 = vmul.f32 %v5403_v34, %v3774_v4  ;;  %5404 = vpow2.f32 %v3862_v37  ;;  %v3741_v1 = vadd.f32 %v3696_v6, %v2916_v15  ;;  %v7352_v37 = vld [vmem:[%s7420_s4] ss:$0 sm:$0xff] }
 0x448   : > { %5406 = vrcp.f32 %v3903_v60 }
 0x449   : > { %v3998_v5 = vadd.f32 %v5467_v48, %v3966_v52  ;;  %v3777_v25 = vadd.f32 %v7134_v31, %v3741_v1 }
 0x44a   : > { %v3520_v61 = vpop.f32.mrf.mxu3  ;;  %v3698_v9 = vpop.f32.mrf.mxu1 }
 0x44b   : > { %4030 = vst [vmem:[%s7160_s27 + $0xa0] sm:$0xff] %v3998_v5  ;;  %v3809_v26 = vsub.f32 0.0, %v3777_v25  ;;  %v3610_v21 = vadd.f32 %v3609_v40, %v3520_v61  ;;  %v2925_v40 = vpop.f32.mrf.mxu2 }
 0x44c   : > { %v2926_v48 = vadd.f32 %v2925_v40, %v7110_v57 }
 0x44d   : > { %v5405_v45 = vpop.eup %5404  ;;  %v3864_v43 = vmul.f32 1.442695, %v3809_v26  ;;  %v3699_v41 = vadd.f32 %v3698_v9, %v3610_v21  ;;  %v3619_v9 = vpop.f32.mrf.mxu0 }
 0x44e   : > { %v5407_v4 = vpop.eup %5406  ;;  %v3904_v14 = vadd.f32 1.0, %v5405_v45 }
 0x44f   : > { %v3967_v30 = vmul.f32 %v5407_v4, %v3775_v59  ;;  %5408 = vpow2.f32 %v3864_v43  ;;  %v3742_v46 = vadd.f32 %v3699_v41, %v2919_v53  ;;  %v5472_v53 = vld [vmem:[%s5784_s16 + $0xc0] sm:$0xff] }
 0x450   : > { %5410 = vrcp.f32 %v3904_v14 }
 0x451   : > { %v3999_v49 = vadd.f32 %v5468_v47, %v3967_v30  ;;  %v3778_v44 = vadd.f32 %v7134_v31, %v3742_v46 }
 0x452   : > { %v3522_v24 = vpop.f32.mrf.mxu3  ;;  %v3700_v36 = vpop.f32.mrf.mxu1 }
 0x453   : > { %4031 = vst [vmem:[%s7160_s27 + $0xa8] sm:$0xff] %v3999_v49  ;;  %v3810_v56 = vsub.f32 0.0, %v3778_v44  ;;  %v3612_v18 = vadd.f32 %v3611_v12, %v3522_v24  ;;  %v2928_v60 = vpop.f32.mrf.mxu2 }
 0x454   : > { %v2929_v46 = vadd.f32 %v2928_v60, %v7114_v2 }
 0x455   : > { %v5409_v10 = vpop.eup %5408  ;;  %v3866_v20 = vmul.f32 1.442695, %v3810_v56  ;;  %v3701_v59 = vadd.f32 %v3700_v36, %v3612_v18  ;;  %v3621_v18 = vpop.f32.mrf.mxu0 }
 0x456   : > { %v5411_v54 = vpop.eup %5410  ;;  %v3905_v39 = vadd.f32 1.0, %v5409_v10  ;;  %v5473_v10 = vld [vmem:[%s5784_s16 + $0xc8] sm:$0xff] }
 0x457   : > { %v3968_v8 = vmul.f32 %v5411_v54, %v3776_v3  ;;  %5412 = vpow2.f32 %v3866_v20  ;;  %v3743_v22 = vadd.f32 %v3701_v59, %v2921_v50 }
 0x458   : > { %5414 = vrcp.f32 %v3905_v39 }
 0x459   : > { %v4000_v13 = vadd.f32 %v5469_v19, %v3968_v8  ;;  %v3779_v17 = vadd.f32 %v7134_v31, %v3743_v22  ;;  %v5470_v31 = vld [vmem:[%s5784_s16 + $0xb8] sm:$0xff] }
 0x45a   : > { %v3525_v16 = vpop.f32.mrf.mxu3  ;;  %v3703_v23 = vpop.f32.mrf.mxu1 }
 0x45b   : > { %4032 = vst [vmem:[%s7160_s27 + $0xb0] sm:$0xff] %v4000_v13  ;;  %v3811_v28 = vsub.f32 0.0, %v3779_v17  ;;  %v3615_v7 = vadd.f32 %v3614_v11, %v3525_v16  ;;  %v2930_v11 = vpop.f32.mrf.mxu2 }
 0x45c   : > { %v2931_v22 = vadd.f32 %v2930_v11, %v7118_v35 }
 0x45d   : > { %v5413_v63 = vpop.eup %5412  ;;  %v3868_v3 = vmul.f32 1.442695, %v3811_v28  ;;  %v3704_v51 = vadd.f32 %v3703_v23, %v3615_v7 }
 0x45e   : > { %v5415_v27 = vpop.eup %5414  ;;  %v3906_v38 = vadd.f32 1.0, %v5413_v63 }
 0x45f   : > { %v3969_v33 = vmul.f32 %v5415_v27, %v3777_v25  ;;  %5416 = vpow2.f32 %v3868_v3  ;;  %v3744_v15 = vadd.f32 %v3704_v51, %v2924_v58 }
 0x460   : > { %5418 = vrcp.f32 %v3906_v38 }
 0x461   : > { %v4001_v32 = vadd.f32 %v5470_v31, %v3969_v33  ;;  %v3780_v6 = vadd.f32 %v7352_v37, %v3744_v15 }
 0x462   : > { %v3527_v34 = vpop.f32.mrf.mxu3  ;;  %v3705_v29 = vpop.f32.mrf.mxu1 }
 0x463   : > { %4033 = vst [vmem:[%s7160_s27 + $0xb8] sm:$0xff] %v4001_v32  ;;  %v3812_v12 = vsub.f32 0.0, %v3780_v6  ;;  %v3617_v52 = vadd.f32 %v3616_v55, %v3527_v34  ;;  %v2933_v16 = vpop.f32.mrf.mxu2  ;;  %v5474_v55 = vld [vmem:[%s5784_s16 + $0xd0] sm:$0xff] }
 0x464   : > { %v2934_v33 = vadd.f32 %v2933_v16, %v7122_v62 }
 0x465   : > { %v5417_v1 = vpop.eup %5416  ;;  %v3870_v5 = vmul.f32 1.442695, %v3812_v12  ;;  %v3706_v25 = vadd.f32 %v3705_v29, %v3617_v52  ;;  %v5475_v12 = vld [vmem:[%s5784_s16 + $0xd8] sm:$0xff] }
 0x466   : > { %v5419_v61 = vpop.eup %5418  ;;  %v3907_v26 = vadd.f32 1.0, %v5417_v1 }
 0x467   : > { %v3970_v21 = vmul.f32 %v5419_v61, %v3778_v44  ;;  %5420 = vpow2.f32 %v3870_v5  ;;  %v3745_v45 = vadd.f32 %v3706_v25, %v2926_v48  ;;  %v3624_v7 = vpop.f32.mrf.mxu0 }
 0x468   : > { %5422 = vrcp.f32 %v3907_v26 }
 0x469   : > { %v4002_v43 = vadd.f32 %v5472_v53, %v3970_v21  ;;  %v3781_v41 = vadd.f32 %v7352_v37, %v3745_v45 }
 0x46a   : > { %v3530_v4 = vpop.f32.mrf.mxu3  ;;  %v3708_v14 = vpop.f32.mrf.mxu1 }
 0x46b   : > { %4034 = vst [vmem:[%s7160_s27 + $0xc0] sm:$0xff] %v4002_v43  ;;  %v3813_v42 = vsub.f32 0.0, %v3781_v41  ;;  %v3620_v30 = vadd.f32 %v3619_v9, %v3530_v4  ;;  %v2935_v60 = vpop.f32.mrf.mxu2 }
 0x46c   : > { %v2936_v26 = vadd.f32 %v2935_v60, %v7126_v0 }
 0x46d   : > { %v5421_v57 = vpop.eup %5420  ;;  %v3872_v47 = vmul.f32 1.442695, %v3813_v42  ;;  %v3709_v49 = vadd.f32 %v3708_v14, %v3620_v30  ;;  %v5476_v14 = vld [vmem:[%s5784_s16 + $0xe0] sm:$0xff] }
 0x46e   : > { %v5423_v44 = vpop.eup %5422  ;;  %v3908_v24 = vadd.f32 1.0, %v5421_v57 }
 0x46f   : > { %v3971_v36 = vmul.f32 %v5423_v44, %v3779_v17  ;;  %5424 = vpow2.f32 %v3872_v47  ;;  %v3746_v56 = vadd.f32 %v3709_v49, %v2929_v46  ;;  %v3626_v48 = vpop.f32.mrf.mxu0  ;;  %v5477_v44 = vld [vmem:[%s5784_s16 + $0xe8] sm:$0xff] }
 0x470   : > { %5426 = vrcp.f32 %v3908_v24 }
 0x471   : > { %v4003_v50 = vadd.f32 %v5473_v10, %v3971_v36  ;;  %v3782_v20 = vadd.f32 %v7352_v37, %v3746_v56  ;;  %v5478_v10 = vld [vmem:[%s5784_s16 + $0xf0] sm:$0xff] }
 0x472   : > { %v3532_v59 = vpop.f32.mrf.mxu3  ;;  %v3710_v54 = vpop.f32.mrf.mxu1 }
 0x473   : > { %4035 = vst [vmem:[%s7160_s27 + $0xc8] sm:$0xff] %v4003_v50  ;;  %v3814_v2 = vsub.f32 0.0, %v3782_v20  ;;  %v3622_v39 = vadd.f32 %v3621_v18, %v3532_v59 }
 0x475   : > { %v5425_v8 = vpop.eup %5424  ;;  %v3874_v40 = vmul.f32 1.442695, %v3814_v2  ;;  %v3711_v19 = vadd.f32 %v3710_v54, %v3622_v39  ;;  %v5479_v54 = vld [vmem:[%s5784_s16 + $0xf8] sm:$0xff] }
 0x476   : > { %v5427_v13 = vpop.eup %5426  ;;  %v3909_v17 = vadd.f32 1.0, %v5425_v8 }
 0x477   : > { %v3972_v23 = vmul.f32 %v5427_v13, %v3780_v6  ;;  %5428 = vpow2.f32 %v3874_v40  ;;  %v3747_v28 = vadd.f32 %v3711_v19, %v2931_v22 }
 0x478   : > { %5430 = vrcp.f32 %v3909_v17 }
 0x479   : > { %v4004_v63 = vadd.f32 %v5474_v55, %v3972_v23  ;;  %v3783_v58 = vadd.f32 %v7352_v37, %v3747_v28 }
 0x47a   : > { %v3535_v3 = vpop.f32.mrf.mxu3  ;;  %v3713_v35 = vpop.f32.mrf.mxu1 }
 0x47b   : > { %4036 = vst [vmem:[%s7160_s27 + $0xd0] sm:$0xff] %v4004_v63  ;;  %v3815_v51 = vsub.f32 0.0, %v3783_v58  ;;  %v3625_v27 = vadd.f32 %v3624_v7, %v3535_v3 }
 0x47d   : > { %v5429_v38 = vpop.eup %5428  ;;  %v3876_v15 = vmul.f32 1.442695, %v3815_v51  ;;  %v3714_v31 = vadd.f32 %v3713_v35, %v3625_v27 }
 0x47e   : > { %v5431_v32 = vpop.eup %5430  ;;  %v3910_v6 = vadd.f32 1.0, %v5429_v38 }
 0x47f   : > { %v3973_v34 = vmul.f32 %v5431_v32, %v3781_v41  ;;  %5432 = vpow2.f32 %v3876_v15  ;;  %v3748_v29 = vadd.f32 %v3714_v31, %v2934_v33 }
 0x480   : > { %5434 = vrcp.f32 %v3910_v6 }
 0x481   : > { %v4005_v52 = vadd.f32 %v5475_v12, %v3973_v34  ;;  %v3784_v1 = vadd.f32 %v7352_v37, %v3748_v29 }
 0x482   : > { %v3537_v5 = vpop.f32.mrf.mxu3  ;;  %v3715_v61 = vpop.f32.mrf.mxu1 }
 0x483   : > { %4037 = vst [vmem:[%s7160_s27 + $0xd8] sm:$0xff] %v4005_v52  ;;  %v3816_v25 = vsub.f32 0.0, %v3784_v1  ;;  %v3627_v62 = vadd.f32 %v3626_v48, %v3537_v5 }
 0x485   : > { %v5433_v9 = vpop.eup %5432  ;;  %v3878_v21 = vmul.f32 1.442695, %v3816_v25  ;;  %v3716_v45 = vadd.f32 %v3715_v61, %v3627_v62 }
 0x486   : > { %v5435_v53 = vpop.eup %5434  ;;  %v3911_v43 = vadd.f32 1.0, %v5433_v9 }
 0x487   : > { %v3974_v41 = vmul.f32 %v5435_v53, %v3782_v20  ;;  %5436 = vpow2.f32 %v3878_v21  ;;  %v3749_v4 = vadd.f32 %v3716_v45, %v2936_v26 }
 0x488   : > { %5438 = vrcp.f32 %v3911_v43 }
 0x489   : > { %v4006_v42 = vadd.f32 %v5476_v14, %v3974_v41  ;;  %v3785_v30 = vadd.f32 %v7352_v37, %v3749_v4 }
 0x48b   : > { %4038 = vst [vmem:[%s7160_s27 + $0xe0] sm:$0xff] %v4006_v42  ;;  %v3817_v57 = vsub.f32 0.0, %v3785_v30 }
 0x48d   : > { %v5437_v46 = vpop.eup %5436  ;;  %v3880_v0 = vmul.f32 1.442695, %v3817_v57 }
 0x48e   : > { %v5439_v11 = vpop.eup %5438  ;;  %v3912_v47 = vadd.f32 1.0, %v5437_v46 }
 0x48f   : > { %v3975_v49 = vmul.f32 %v5439_v11, %v3783_v58  ;;  %5440 = vpow2.f32 %v3880_v0 }
 0x490   : > { %5442 = vrcp.f32 %v3912_v47 }
 0x491   : > { %v4007_v24 = vadd.f32 %v5477_v44, %v3975_v49 }
 0x493   : > { %4039 = vst [vmem:[%s7160_s27 + $0xe8] sm:$0xff] %v4007_v24 }
 0x495   : > { %v5441_v36 = vpop.eup %5440 }
 0x496   : > { %v5443_v56 = vpop.eup %5442  ;;  %v3913_v37 = vadd.f32 1.0, %v5441_v36 }
 0x497   : > { %v3976_v18 = vmul.f32 %v5443_v56, %v3784_v1 }
 0x498   : > { %5444 = vrcp.f32 %v3913_v37 }
 0x499   : > { %v4008_v50 = vadd.f32 %v5478_v10, %v3976_v18 }
 0x49b   : > { %4040 = vst [vmem:[%s7160_s27 + $0xf0] sm:$0xff] %v4008_v50 }
 0x49e   : > { %v5445_v20 = vpop.eup %5444 }
 0x49f   : > { %v3977_v59 = vmul.f32 %v5445_v20, %v3785_v30 }
 0x4a1   : > { %v4009_v2 = vadd.f32 %v5479_v54, %v3977_v59 }
 0x4a3   : > { %4041 = vst [vmem:[%s7160_s27 + $0xf8] sm:$0xff] %v4009_v2 }
 0x4a4   : > { %5597 = shalt.err (!%p5594_p10)
}
 0x4a5   : > { %s5650_s8 = smov 128   ;;  %s5651_s16 = smov 8  }
 0x4a6   : > { %5123 = dma.vmem_to_hbm [thread:$0]  (%p5748_p3), %s4056_s15, 4096, %s4058_s24, %s4043_s29, %s5650_s8, %s5650_s8, %s5651_s16  }
 0x4a7 PF: > { %s4072_s27 = sand.u32 1, %s5628_s18   ;;  %p7543_p12 = scmp.ge.s32.totalorder %s5640_s21, 2 }
 0x4a8   : > { %s4073_s6 = scalar_lea.sflag [#allocation5], %s4072_s27 }
 0x4a9   : > { %p5137_p13 = pnand %p7543_p12, %p5717_p6 }
 0x4ab   : > { %p5138_p0 = pneg %p5137_p13 }
 0x4ad   : > { %5623 = dma.done.wait (%p5138_p0), %s4073_s6, 4096  }
 0x4ae   : > { %5625 = vsyncadd (%p5138_p0), %s4073_s6, 4294963200  ;;  %p19_p5 = scmp.ge.s32.totalorder %s5738_s14, 4   ;;  %s7544_s18 = smov %s5632_s19 }
 0x4af   : > { %s7545_s19 = smov %s5636_s20  ;;  %s7546_s20 = smov %s5754_s23 }
 0x4b0   : > { %s7547_s21 = smov %s5738_s14  ;;  %21 = sbr.rel (!%p19_p5) target bundleno = 6 (0x6), region = 95 }
 0x4b5   :  { %4079 = vsyncpa [#allocation4], 1 }
 0x4b6   :  { %4081 = vsyncpa [#allocation4 + $0x1], 1 }
 0x4b7   :  { %4082 = vsyncpa [#allocation7], 1 }
 0x4b8   :  { %4083 = vsyncpa [#allocation5], 1 }
 0x4b9   :  { %4085 = vsyncpa [#allocation5 + $0x1], 1 }

</bundles_post_ra>
